<compile_context>
chip_gen: v6e
topology: v6e:2x2x1
jax: 0.10.0
libtpu: 0.0.40
codegen_flags: <defaults>
</compile_context>

<pallas_src>
import math
import functools

import jax
import jax.numpy as jnp
from jax import lax
from jax.experimental import pallas as pl
from jax.experimental.pallas import tpu as pltpu

LN_EPS = 1e-12        # BertConfig default layer_norm_eps
MASK_VALUE = -1e9     # additive causal-mask constant


# ----------------------------- in-kernel helpers -----------------------------

def _erf(x):
    # Abramowitz & Stegun 7.1.26 polynomial erf (|err| < 1.5e-7); only uses
    # exp/mul/add/div/where, all of which lower on Mosaic.
    a1, a2, a3, a4, a5 = (0.254829592, -0.284496736, 1.421413741,
                          -1.453152027, 1.061405429)
    p = 0.3275911
    ax = jnp.abs(x)
    t = 1.0 / (1.0 + p * ax)
    poly = ((((a5 * t + a4) * t + a3) * t + a2) * t + a1) * t
    y = 1.0 - poly * jnp.exp(-ax * ax)
    return jnp.where(x < 0, -y, y)


def _gelu(x):
    # erf-based GELU (HF hidden_act="gelu")
    return 0.5 * x * (1.0 + _erf(x * 0.7071067811865475))


def _layer_norm(x, g, b, eps=LN_EPS):
    mu = jnp.mean(x, axis=-1, keepdims=True)
    var = jnp.mean(jnp.square(x - mu), axis=-1, keepdims=True)
    return (x - mu) * lax.rsqrt(var + eps) * g + b


# ------------------------------ fused kernel ---------------------------------

def fused_bert_kernel(x0_ref, wout_ref, bout_ref,
                      wqkv_ref, bqkv_ref, wo_ref, w1_ref, b1_ref, w2_ref,
                      bias_ref, o_ref, x_scr,
                      *, batch, seq, hidden, num_heads, head_dim, inter,
                      ffn_chunk):
    B, S, H = batch, seq, hidden
    nH, dH, I = num_heads, head_dim, inter
    N = B * S
    layer = pl.program_id(0)
    scale = 1.0 / math.sqrt(dH)

    # Layer 0: seed the residual stream; it persists in VMEM scratch across the
    # layer grid (no HBM activation round-trips).
    @pl.when(layer == 0)
    def _():
        x_scr[...] = x0_ref[...]

    x = x_scr[...]                               # (N, H) f32 residual stream
    xb = x.astype(jnp.bfloat16)

    # Additive causal mask, regenerated in-kernel per step (tiny, no HBM).
    row = lax.broadcasted_iota(jnp.int32, (B, S, S), 1)
    col = lax.broadcasted_iota(jnp.int32, (B, S, S), 2)
    mask = jnp.where(col <= row, 0.0, MASK_VALUE).astype(jnp.float32)

    # Packed per-layer small params: rows are
    # 0: attn-out bias | 1: ln1 gamma | 2: ln1 beta | 3: ffn-out bias
    # 4: ln2 gamma     | 5: ln2 beta  | 6-7: padding
    bvec = bias_ref[...]                         # (8, H) f32
    bo, ln1g, ln1b = bvec[0:1], bvec[1:2], bvec[2:3]
    b2, ln2g, ln2b = bvec[3:4], bvec[4:5], bvec[5:6]

    # ---- multi-head self-attention: head-major weights, batched over B ----
    attn = jnp.zeros((N, H), jnp.float32)
    for h in range(nH):                          # nH=4, static unroll
        q = (jnp.dot(xb, wqkv_ref[0, h], preferred_element_type=jnp.float32)
             + bqkv_ref[0, h])                   # (N, dH) f32
        k = (jnp.dot(xb, wqkv_ref[1, h], preferred_element_type=jnp.float32)
             + bqkv_ref[1, h])
        v = (jnp.dot(xb, wqkv_ref[2, h], preferred_element_type=jnp.float32)
             + bqkv_ref[2, h])
        qb = q.reshape(B, S, dH).astype(jnp.bfloat16)   # leading-dim reshape
        kb = k.reshape(B, S, dH).astype(jnp.bfloat16)
        vb = v.reshape(B, S, dH).astype(jnp.bfloat16)

        s = jnp.einsum('bqd,bkd->bqk', qb, kb,
                       preferred_element_type=jnp.float32) * scale + mask
        s = s - jnp.max(s, axis=-1, keepdims=True)
        p = jnp.exp(s)
        p = p * pl.reciprocal(jnp.sum(p, axis=-1, keepdims=True), approx=True)
        ctx = jnp.einsum('bqk,bkd->bqd', p.astype(jnp.bfloat16), vb,
                         preferred_element_type=jnp.float32)      # (B,S,dH)

        # per-head slice of the output projection: concat-free accumulation
        attn = attn + jnp.dot(ctx.reshape(N, dH).astype(jnp.bfloat16),
                              wo_ref[h], preferred_element_type=jnp.float32)
    x = _layer_norm(attn + bo + x, ln1g, ln1b)

    # ---- FFN: chunked over the 3072-wide intermediate dim (bounds live vregs,
    # interleaves EUP gelu with MXU K-passes); natural (I, H) w2 layout. ----
    xb2 = x.astype(jnp.bfloat16)
    h2 = jnp.zeros((N, H), jnp.float32)
    for c in range(I // ffn_chunk):              # static chunk offsets
        lo, hi = c * ffn_chunk, (c + 1) * ffn_chunk
        h1 = _gelu(jnp.dot(xb2, w1_ref[:, lo:hi],
                           preferred_element_type=jnp.float32)
                   + b1_ref[:, lo:hi])
        h2 = h2 + jnp.dot(h1.astype(jnp.bfloat16), w2_ref[lo:hi, :],
                          preferred_element_type=jnp.float32)
    x = _layer_norm(h2 + b2 + x, ln2g, ln2b)

    x_scr[...] = x

    # ---- output head on the last layer only; lane-dense (N, 128) store ----
    @pl.when(layer == pl.num_programs(0) - 1)
    def _():
        o_ref[...] = (jnp.dot(x.astype(jnp.bfloat16), wout_ref[...],
                              preferred_element_type=jnp.float32)
                      + bout_ref[...])


# --------------------------------- parameters ---------------------------------

def init_params(key, hidden, num_heads, num_layers, intermediate,
                feature2vocab, max_pos=512, vocab_pad=128):
    H, I, L, nH = hidden, intermediate, num_layers, num_heads
    dH = H // nH
    keys = iter(jax.random.split(key, 128))

    def nrm(shape):
        return (0.02 * jax.random.normal(next(keys), shape)).astype(jnp.float32)

    def stack(make):
        return jnp.stack([make() for _ in range(L)], axis=0)

    p = {}
    p['feat_emb'] = [nrm((v, H)) for v in feature2vocab.values()]
    p['pos_emb'] = nrm((max_pos, H))
    p['tok_emb'] = nrm((2, H))
    p['emb_ln_g'] = jnp.ones((H,), jnp.float32)
    p['emb_ln_b'] = jnp.zeros((H,), jnp.float32)

    # Q/K/V weights, head-major: wqkv[l, i, h] = W_i[:, h*dH:(h+1)*dH]
    def make_qkv():
        w = jnp.stack([nrm((H, H)) for _ in range(3)], axis=0)       # (3, H, H)
        return w.reshape(3, H, nH, dH).transpose(0, 2, 1, 3)         # (3,nH,H,dH)
    p['wqkv'] = stack(make_qkv).astype(jnp.bfloat16)
    p['bqkv'] = stack(lambda: nrm((3, nH, 1, dH)))                    # f32

    # attention output dense, head-major rows: wo[l, h] = Wo[h*dH:(h+1)*dH, :]
    p['wo'] = stack(lambda: nrm((H, H)).reshape(nH, dH, H)).astype(jnp.bfloat16)

    p['w1'] = stack(lambda: nrm((H, I))).astype(jnp.bfloat16)
    p['b1'] = stack(lambda: nrm((1, I)))                              # f32
    p['w2'] = stack(lambda: nrm((I, H))).astype(jnp.bfloat16)         # natural (I,H)

    def make_pack():   # (8, H): bo | ln1g | ln1b | b2 | ln2g | ln2b | pad | pad
        return jnp.stack([nrm((H,)),
                          jnp.ones((H,), jnp.float32),
                          jnp.zeros((H,), jnp.float32),
                          nrm((H,)),
                          jnp.ones((H,), jnp.float32),
                          jnp.zeros((H,), jnp.float32),
                          jnp.zeros((H,), jnp.float32),
                          jnp.zeros((H,), jnp.float32)], axis=0)
    p['bias_pack'] = stack(make_pack)

    V = feature2vocab['mcc']
    Vp = max(vocab_pad, V)
    p['w_out'] = (jnp.zeros((H, Vp), jnp.float32)
                  .at[:, :V].set(nrm((H, V)))).astype(jnp.bfloat16)
    p['b_out'] = jnp.zeros((1, Vp), jnp.float32).at[:, :V].set(nrm((1, V)))
    return p


# ---------------------------------- forward -----------------------------------

def bert_sequence_forward(params, x_tokens, cfg):
    B, S, n_feat = x_tokens.shape
    H, nH, dH = cfg['hidden'], cfg['num_heads'], cfg['head_dim']
    N = B * S
    L = params['wqkv'].shape[0]
    I = params['w1'].shape[-1]
    Vp = params['w_out'].shape[-1]

    # Feature-embedding gather + sum, positional + token-type-0 add, and the
    # embedding LayerNorm stay in XLA (dynamic gather has no clean Pallas form
    # at this size, and folding them here removes 4 kernel operands/DMAs).
    emb = params['feat_emb'][0][x_tokens[..., 0]]
    for i in range(1, n_feat):
        emb = emb + params['feat_emb'][i][x_tokens[..., i]]            # (B,S,H)
    x0 = emb + params['pos_emb'][:S][None] + params['tok_emb'][0][None, None]
    mu = jnp.mean(x0, axis=-1, keepdims=True)
    var = jnp.mean(jnp.square(x0 - mu), axis=-1, keepdims=True)
    x0 = (x0 - mu) * lax.rsqrt(var + LN_EPS) * params['emb_ln_g'] + params['emb_ln_b']
    x0 = x0.reshape(N, H).astype(jnp.float32)

    kern = functools.partial(
        fused_bert_kernel, batch=B, seq=S, hidden=H, num_heads=nH,
        head_dim=dH, inter=I, ffn_chunk=512)

    grid_spec = pltpu.PrefetchScalarGridSpec(
        num_scalar_prefetch=0,
        grid=(L,),
        in_specs=[
            # resident across layers (block index constant -> fetched once)
            pl.BlockSpec((N, H), lambda l: (0, 0)),                        # x0
            pl.BlockSpec((H, Vp), lambda l: (0, 0)),                       # w_out
            pl.BlockSpec((1, Vp), lambda l: (0, 0)),                       # b_out
            # per-layer blocks (double-buffered by the pipeline)
            pl.BlockSpec((None, 3, nH, H, dH), lambda l: (l, 0, 0, 0, 0)),  # wqkv
            pl.BlockSpec((None, 3, nH, 1, dH), lambda l: (l, 0, 0, 0, 0)),  # bqkv
            pl.BlockSpec((None, nH, dH, H), lambda l: (l, 0, 0, 0)),        # wo
            pl.BlockSpec((None, H, I), lambda l: (l, 0, 0)),                # w1
            pl.BlockSpec((None, 1, I), lambda l: (l, 0, 0)),                # b1
            pl.BlockSpec((None, I, H), lambda l: (l, 0, 0)),                # w2
            pl.BlockSpec((None, 8, H), lambda l: (l, 0, 0)),                # bias pack
        ],
        out_specs=pl.BlockSpec((N, Vp), lambda l: (0, 0)),
        scratch_shapes=[pltpu.VMEM((N, H), jnp.float32)],
    )

    logits_pad = pl.pallas_call(
        kern,
        out_shape=jax.ShapeDtypeStruct((N, Vp), jnp.float32),
        grid_spec=grid_spec,
        compiler_params=pltpu.CompilerParams(
            dimension_semantics=("arbitrary",),
            vmem_limit_bytes=32 * 1024 * 1024),
    )(x0, params['w_out'], params['b_out'],
      params['wqkv'], params['bqkv'], params['wo'],
      params['w1'], params['b1'], params['w2'], params['bias_pack'])

    V = cfg['vocab_mcc']
    return logits_pad[:, :V].reshape(B, S, V)


# ----------------------------------- main --------------------------------------

if __name__ == "__main__":
    feature2vocab = {'mcc': 64, 'amount_bin': 16, 'hour': 24}
    hidden, num_layers, num_heads = 32, 4, 4
    intermediate = 3072            # BertConfig default intermediate_size
    B, S = 2, 8
    cfg = dict(hidden=hidden, num_heads=num_heads, head_dim=hidden // num_heads,
               vocab_mcc=feature2vocab['mcc'])

    key = jax.random.PRNGKey(0)
    pkey, xkey = jax.random.split(key)
    params = init_params(pkey, hidden, num_heads, num_layers, intermediate,
                         feature2vocab)

    xkeys = jax.random.split(xkey, len(feature2vocab))
    x_tokens = jnp.stack(
        [jax.random.randint(xkeys[i], (B, S), 0, v)
         for i, v in enumerate(feature2vocab.values())],
        axis=-1).astype(jnp.int32)                                     # (B,S,3)

    fwd = jax.jit(functools.partial(bert_sequence_forward, cfg=cfg))
    logits = jax.block_until_ready(fwd(params, x_tokens))

    assert logits.shape == (B, S, feature2vocab['mcc'])
    assert bool(jnp.all(jnp.isfinite(logits)))
    print("KERNEL_OK")
</pallas_src>

<mosaic_0001>
module attributes {stable_mosaic.version = 11 : i64} {
  func.func @fused_bert_kernel(%arg0: i32, %arg1: memref<16x32xf32, #tpu.memory_space<vmem>>, %arg2: memref<32x128xbf16, #tpu.memory_space<vmem>>, %arg3: memref<1x128xf32, #tpu.memory_space<vmem>>, %arg4: memref<1x3x4x32x8xbf16, #tpu.memory_space<vmem>>, %arg5: memref<1x3x4x1x8xf32, #tpu.memory_space<vmem>>, %arg6: memref<1x4x8x32xbf16, #tpu.memory_space<vmem>>, %arg7: memref<1x32x3072xbf16, #tpu.memory_space<vmem>>, %arg8: memref<1x1x3072xf32, #tpu.memory_space<vmem>>, %arg9: memref<1x3072x32xbf16, #tpu.memory_space<vmem>>, %arg10: memref<1x8x32xf32, #tpu.memory_space<vmem>>, %arg11: memref<16x128xf32, #tpu.memory_space<vmem>>, %arg12: memref<16x32xf32, #tpu.memory_space<vmem>>) attributes {dimension_semantics = [#tpu.dimension_semantics<arbitrary>], iteration_bounds = array<i64: 4>, scalar_prefetch = 0 : i64, scratch_operands = 1 : i64, tpu.core_type = #tpu.core_type<tc>, window_params = [{pipeline_mode = #tpu.pipeline_mode<synchronous>, transform_indices = @transform_0, window_bounds = array<i64: 16, 32>}, {pipeline_mode = #tpu.pipeline_mode<synchronous>, transform_indices = @transform_1, window_bounds = array<i64: 32, 128>}, {pipeline_mode = #tpu.pipeline_mode<synchronous>, transform_indices = @transform_2, window_bounds = array<i64: 1, 128>}, {transform_indices = @transform_3, window_bounds = array<i64: 1, 3, 4, 32, 8>}, {transform_indices = @transform_4, window_bounds = array<i64: 1, 3, 4, 1, 8>}, {transform_indices = @transform_5, window_bounds = array<i64: 1, 4, 8, 32>}, {transform_indices = @transform_6, window_bounds = array<i64: 1, 32, 3072>}, {transform_indices = @transform_7, window_bounds = array<i64: 1, 1, 3072>}, {transform_indices = @transform_8, window_bounds = array<i64: 1, 3072, 32>}, {transform_indices = @transform_9, window_bounds = array<i64: 1, 8, 32>}, {pipeline_mode = #tpu.pipeline_mode<synchronous>, transform_indices = @transform_10, window_bounds = array<i64: 16, 128>}]} {
    %c0_i32 = arith.constant 0 : i32
    %0 = arith.cmpi eq, %arg0, %c0_i32 : i32
    %1 = arith.extui %0 : i1 to i32
    %c0_i32_0 = arith.constant 0 : i32
    %2 = arith.cmpi ne, %1, %c0_i32_0 : i32
    scf.if %2 {
      %c0_341 = arith.constant 0 : index
      %c0_342 = arith.constant 0 : index
      %584 = vector.load %arg1[%c0_341, %c0_342] : memref<16x32xf32, #tpu.memory_space<vmem>>, vector<16x32xf32>
      %c0_343 = arith.constant 0 : index
      %c0_344 = arith.constant 0 : index
      %585 = vector.load %arg12[%c0_343, %c0_344] : memref<16x32xf32, #tpu.memory_space<vmem>>, vector<16x32xf32>
      tpu.vector_store %arg12[%c0_343, %c0_344], %584 {strides = array<i32>} : memref<16x32xf32, #tpu.memory_space<vmem>>, vector<16x32xf32>,
    } else {
    }
    %c0 = arith.constant 0 : index
    %c0_1 = arith.constant 0 : index
    %3 = vector.load %arg12[%c0, %c0_1] : memref<16x32xf32, #tpu.memory_space<vmem>>, vector<16x32xf32>
    %4 = arith.truncf %3 : vector<16x32xf32> to vector<16x32xbf16>
    %5 = tpu.iota {dimensions = array<i32: 1>} : vector<2x8x8xi32>
    %6 = tpu.iota {dimensions = array<i32: 2>} : vector<2x8x8xi32>
    %7 = arith.cmpi sle, %6, %5 : vector<2x8x8xi32>
    %cst = arith.constant 0.000000e+00 : f32
    %cst_2 = arith.constant -1.000000e+09 : f32
    %8 = vector.broadcast %cst : f32 to vector<2x8x8xf32>
    %9 = vector.broadcast %cst_2 : f32 to vector<2x8x8xf32>
    %10 = arith.select %7, %8, %9 : vector<2x8x8xi1>, vector<2x8x8xf32>
    %c0_3 = arith.constant 0 : index
    %c0_4 = arith.constant 0 : index
    %c0_5 = arith.constant 0 : index
    %11 = vector.load %arg10[%c0_3, %c0_4, %c0_5] : memref<1x8x32xf32, #tpu.memory_space<vmem>>, vector<1x8x32xf32>
    %12 = vector.shape_cast %11 : vector<1x8x32xf32> to vector<8x32xf32>
    %13 = vector.extract_strided_slice %12 {offsets = [0, 0], sizes = [1, 32], strides = [1, 1]} : vector<8x32xf32> to vector<1x32xf32>
    %14 = vector.extract_strided_slice %12 {offsets = [1, 0], sizes = [1, 32], strides = [1, 1]} : vector<8x32xf32> to vector<1x32xf32>
    %15 = vector.extract_strided_slice %12 {offsets = [2, 0], sizes = [1, 32], strides = [1, 1]} : vector<8x32xf32> to vector<1x32xf32>
    %16 = vector.extract_strided_slice %12 {offsets = [3, 0], sizes = [1, 32], strides = [1, 1]} : vector<8x32xf32> to vector<1x32xf32>
    %17 = vector.extract_strided_slice %12 {offsets = [4, 0], sizes = [1, 32], strides = [1, 1]} : vector<8x32xf32> to vector<1x32xf32>
    %18 = vector.extract_strided_slice %12 {offsets = [5, 0], sizes = [1, 32], strides = [1, 1]} : vector<8x32xf32> to vector<1x32xf32>
    %cst_6 = arith.constant 0.000000e+00 : f32
    %19 = vector.broadcast %cst_6 : f32 to vector<16x32xf32>
    %c0_7 = arith.constant 0 : index
    %c0_8 = arith.constant 0 : index
    %c0_9 = arith.constant 0 : index
    %c0_10 = arith.constant 0 : index
    %c0_11 = arith.constant 0 : index
    %20 = vector.load %arg4[%c0_7, %c0_8, %c0_9, %c0_10, %c0_11] : memref<1x3x4x32x8xbf16, #tpu.memory_space<vmem>>, vector<1x1x1x32x8xbf16>
    %21 = vector.shape_cast %20 : vector<1x1x1x32x8xbf16> to vector<32x8xbf16>
    %cst_12 = arith.constant dense<0.000000e+00> : vector<16x8xf32>
    %22 = tpu.matmul %4, %21, %cst_12 {dimension_numbers = #tpu.dot_dimension_numbers<[1], [0], [0], [1], [0, 0, 1, 1], [], []>} : vector<16x32xbf16>, vector<32x8xbf16>, vector<16x8xf32> -> vector<16x8xf32>
    %c0_13 = arith.constant 0 : index
    %c0_14 = arith.constant 0 : index
    %c0_15 = arith.constant 0 : index
    %c0_16 = arith.constant 0 : index
    %c0_17 = arith.constant 0 : index
    %23 = vector.load %arg5[%c0_13, %c0_14, %c0_15, %c0_16, %c0_17] : memref<1x3x4x1x8xf32, #tpu.memory_space<vmem>>, vector<1x1x1x1x8xf32>
    %24 = vector.shape_cast %23 : vector<1x1x1x1x8xf32> to vector<1x8xf32>
    %25 = vector.broadcast %24 : vector<1x8xf32> to vector<16x8xf32>
    %26 = arith.addf %22, %25 : vector<16x8xf32>
    %c0_18 = arith.constant 0 : index
    %c1 = arith.constant 1 : index
    %c0_19 = arith.constant 0 : index
    %c0_20 = arith.constant 0 : index
    %c0_21 = arith.constant 0 : index
    %27 = vector.load %arg4[%c0_18, %c1, %c0_19, %c0_20, %c0_21] : memref<1x3x4x32x8xbf16, #tpu.memory_space<vmem>>, vector<1x1x1x32x8xbf16>
    %28 = vector.shape_cast %27 : vector<1x1x1x32x8xbf16> to vector<32x8xbf16>
    %cst_22 = arith.constant dense<0.000000e+00> : vector<16x8xf32>
    %29 = tpu.matmul %4, %28, %cst_22 {dimension_numbers = #tpu.dot_dimension_numbers<[1], [0], [0], [1], [0, 0, 1, 1], [], []>} : vector<16x32xbf16>, vector<32x8xbf16>, vector<16x8xf32> -> vector<16x8xf32>
    %c0_23 = arith.constant 0 : index
    %c1_24 = arith.constant 1 : index
    %c0_25 = arith.constant 0 : index
    %c0_26 = arith.constant 0 : index
    %c0_27 = arith.constant 0 : index
    %30 = vector.load %arg5[%c0_23, %c1_24, %c0_25, %c0_26, %c0_27] : memref<1x3x4x1x8xf32, #tpu.memory_space<vmem>>, vector<1x1x1x1x8xf32>
    %31 = vector.shape_cast %30 : vector<1x1x1x1x8xf32> to vector<1x8xf32>
    %32 = vector.broadcast %31 : vector<1x8xf32> to vector<16x8xf32>
    %33 = arith.addf %29, %32 : vector<16x8xf32>
    %c0_28 = arith.constant 0 : index
    %c2 = arith.constant 2 : index
    %c0_29 = arith.constant 0 : index
    %c0_30 = arith.constant 0 : index
    %c0_31 = arith.constant 0 : index
    %34 = vector.load %arg4[%c0_28, %c2, %c0_29, %c0_30, %c0_31] : memref<1x3x4x32x8xbf16, #tpu.memory_space<vmem>>, vector<1x1x1x32x8xbf16>
    %35 = vector.shape_cast %34 : vector<1x1x1x32x8xbf16> to vector<32x8xbf16>
    %cst_32 = arith.constant dense<0.000000e+00> : vector<16x8xf32>
    %36 = tpu.matmul %4, %35, %cst_32 {dimension_numbers = #tpu.dot_dimension_numbers<[1], [0], [0], [1], [0, 0, 1, 1], [], []>} : vector<16x32xbf16>, vector<32x8xbf16>, vector<16x8xf32> -> vector<16x8xf32>
    %c0_33 = arith.constant 0 : index
    %c2_34 = arith.constant 2 : index
    %c0_35 = arith.constant 0 : index
    %c0_36 = arith.constant 0 : index
    %c0_37 = arith.constant 0 : index
    %37 = vector.load %arg5[%c0_33, %c2_34, %c0_35, %c0_36, %c0_37] : memref<1x3x4x1x8xf32, #tpu.memory_space<vmem>>, vector<1x1x1x1x8xf32>
    %38 = vector.shape_cast %37 : vector<1x1x1x1x8xf32> to vector<1x8xf32>
    %39 = vector.broadcast %38 : vector<1x8xf32> to vector<16x8xf32>
    %40 = arith.addf %36, %39 : vector<16x8xf32>
    %41 = vector.shape_cast %26 : vector<16x8xf32> to vector<2x8x8xf32>
    %42 = arith.truncf %41 : vector<2x8x8xf32> to vector<2x8x8xbf16>
    %43 = vector.shape_cast %33 : vector<16x8xf32> to vector<2x8x8xf32>
    %44 = arith.truncf %43 : vector<2x8x8xf32> to vector<2x8x8xbf16>
    %45 = vector.shape_cast %40 : vector<16x8xf32> to vector<2x8x8xf32>
    %46 = arith.truncf %45 : vector<2x8x8xf32> to vector<2x8x8xbf16>
    "tpu.trace_start"() <{level = 10 : i32, message = "bqd,bkd->bqk"}> : () -> ()
    %cst_38 = arith.constant dense<0.000000e+00> : vector<2x8x8xf32>
    %47 = tpu.matmul %42, %44, %cst_38 {dimension_numbers = #tpu.dot_dimension_numbers<[2], [2], [1], [1], [0, 0, 0, 1, 1, 1], [0], [0]>} : vector<2x8x8xbf16>, vector<2x8x8xbf16>, vector<2x8x8xf32> -> vector<2x8x8xf32>
    "tpu.trace_stop"() : () -> ()
    %cst_39 = arith.constant 0.353553385 : f32
    %48 = vector.broadcast %cst_39 : f32 to vector<2x8x8xf32>
    %49 = arith.mulf %47, %48 : vector<2x8x8xf32>
    %50 = arith.addf %49, %10 : vector<2x8x8xf32>
    %cst_40 = arith.constant dense<0xFF800000> : vector<2x8xf32>
    %51 = vector.multi_reduction <maximumf>, %50, %cst_40 [2] : vector<2x8x8xf32> to vector<2x8xf32>
    %52 = vector.shape_cast %51 : vector<2x8xf32> to vector<2x8x1xf32>
    %53 = vector.broadcast %52 : vector<2x8x1xf32> to vector<2x8x8xf32>
    %54 = arith.subf %50, %53 : vector<2x8x8xf32>
    %55 = math.exp %54 : vector<2x8x8xf32>
    %cst_41 = arith.constant dense<0.000000e+00> : vector<2x8xf32>
    %56 = vector.multi_reduction <add>, %55, %cst_41 [2] : vector<2x8x8xf32> to vector<2x8xf32>
    %57 = vector.shape_cast %56 : vector<2x8xf32> to vector<2x8x1xf32>
    %58 = tpu.reciprocal %57 {approx = true} : vector<2x8x1xf32> -> vector<2x8x1xf32>
    %59 = vector.broadcast %58 : vector<2x8x1xf32> to vector<2x8x8xf32>
    %60 = arith.mulf %55, %59 : vector<2x8x8xf32>
    %61 = arith.truncf %60 : vector<2x8x8xf32> to vector<2x8x8xbf16>
    "tpu.trace_start"() <{level = 10 : i32, message = "bqk,bkd->bqd"}> : () -> ()
    %cst_42 = arith.constant dense<0.000000e+00> : vector<2x8x8xf32>
    %62 = tpu.matmul %61, %46, %cst_42 {dimension_numbers = #tpu.dot_dimension_numbers<[2], [1], [1], [2], [0, 0, 0, 1, 1, 2], [0], [0]>} : vector<2x8x8xbf16>, vector<2x8x8xbf16>, vector<2x8x8xf32> -> vector<2x8x8xf32>
    "tpu.trace_stop"() : () -> ()
    %63 = vector.shape_cast %62 : vector<2x8x8xf32> to vector<16x8xf32>
    %64 = arith.truncf %63 : vector<16x8xf32> to vector<16x8xbf16>
    %c0_43 = arith.constant 0 : index
    %c0_44 = arith.constant 0 : index
    %c0_45 = arith.constant 0 : index
    %c0_46 = arith.constant 0 : index
    %65 = vector.load %arg6[%c0_43, %c0_44, %c0_45, %c0_46] : memref<1x4x8x32xbf16, #tpu.memory_space<vmem>>, vector<1x1x8x32xbf16>
    %66 = vector.shape_cast %65 : vector<1x1x8x32xbf16> to vector<8x32xbf16>
    %cst_47 = arith.constant dense<0.000000e+00> : vector<16x32xf32>
    %67 = tpu.matmul %64, %66, %cst_47 {dimension_numbers = #tpu.dot_dimension_numbers<[1], [0], [0], [1], [0, 0, 1, 1], [], []>} : vector<16x8xbf16>, vector<8x32xbf16>, vector<16x32xf32> -> vector<16x32xf32>
    %68 = arith.addf %19, %67 : vector<16x32xf32>
    %c0_48 = arith.constant 0 : index
    %c0_49 = arith.constant 0 : index
    %c1_50 = arith.constant 1 : index
    %c0_51 = arith.constant 0 : index
    %c0_52 = arith.constant 0 : index
    %69 = vector.load %arg4[%c0_48, %c0_49, %c1_50, %c0_51, %c0_52] : memref<1x3x4x32x8xbf16, #tpu.memory_space<vmem>>, vector<1x1x1x32x8xbf16>
    %70 = vector.shape_cast %69 : vector<1x1x1x32x8xbf16> to vector<32x8xbf16>
    %cst_53 = arith.constant dense<0.000000e+00> : vector<16x8xf32>
    %71 = tpu.matmul %4, %70, %cst_53 {dimension_numbers = #tpu.dot_dimension_numbers<[1], [0], [0], [1], [0, 0, 1, 1], [], []>} : vector<16x32xbf16>, vector<32x8xbf16>, vector<16x8xf32> -> vector<16x8xf32>
    %c0_54 = arith.constant 0 : index
    %c0_55 = arith.constant 0 : index
    %c1_56 = arith.constant 1 : index
    %c0_57 = arith.constant 0 : index
    %c0_58 = arith.constant 0 : index
    %72 = vector.load %arg5[%c0_54, %c0_55, %c1_56, %c0_57, %c0_58] : memref<1x3x4x1x8xf32, #tpu.memory_space<vmem>>, vector<1x1x1x1x8xf32>
    %73 = vector.shape_cast %72 : vector<1x1x1x1x8xf32> to vector<1x8xf32>
    %74 = vector.broadcast %73 : vector<1x8xf32> to vector<16x8xf32>
    %75 = arith.addf %71, %74 : vector<16x8xf32>
    %c0_59 = arith.constant 0 : index
    %c1_60 = arith.constant 1 : index
    %c1_61 = arith.constant 1 : index
    %c0_62 = arith.constant 0 : index
    %c0_63 = arith.constant 0 : index
    %76 = vector.load %arg4[%c0_59, %c1_60, %c1_61, %c0_62, %c0_63] : memref<1x3x4x32x8xbf16, #tpu.memory_space<vmem>>, vector<1x1x1x32x8xbf16>
    %77 = vector.shape_cast %76 : vector<1x1x1x32x8xbf16> to vector<32x8xbf16>
    %cst_64 = arith.constant dense<0.000000e+00> : vector<16x8xf32>
    %78 = tpu.matmul %4, %77, %cst_64 {dimension_numbers = #tpu.dot_dimension_numbers<[1], [0], [0], [1], [0, 0, 1, 1], [], []>} : vector<16x32xbf16>, vector<32x8xbf16>, vector<16x8xf32> -> vector<16x8xf32>
    %c0_65 = arith.constant 0 : index
    %c1_66 = arith.constant 1 : index
    %c1_67 = arith.constant 1 : index
    %c0_68 = arith.constant 0 : index
    %c0_69 = arith.constant 0 : index
    %79 = vector.load %arg5[%c0_65, %c1_66, %c1_67, %c0_68, %c0_69] : memref<1x3x4x1x8xf32, #tpu.memory_space<vmem>>, vector<1x1x1x1x8xf32>
    %80 = vector.shape_cast %79 : vector<1x1x1x1x8xf32> to vector<1x8xf32>
    %81 = vector.broadcast %80 : vector<1x8xf32> to vector<16x8xf32>
    %82 = arith.addf %78, %81 : vector<16x8xf32>
    %c0_70 = arith.constant 0 : index
    %c2_71 = arith.constant 2 : index
    %c1_72 = arith.constant 1 : index
    %c0_73 = arith.constant 0 : index
    %c0_74 = arith.constant 0 : index
    %83 = vector.load %arg4[%c0_70, %c2_71, %c1_72, %c0_73, %c0_74] : memref<1x3x4x32x8xbf16, #tpu.memory_space<vmem>>, vector<1x1x1x32x8xbf16>
    %84 = vector.shape_cast %83 : vector<1x1x1x32x8xbf16> to vector<32x8xbf16>
    %cst_75 = arith.constant dense<0.000000e+00> : vector<16x8xf32>
    %85 = tpu.matmul %4, %84, %cst_75 {dimension_numbers = #tpu.dot_dimension_numbers<[1], [0], [0], [1], [0, 0, 1, 1], [], []>} : vector<16x32xbf16>, vector<32x8xbf16>, vector<16x8xf32> -> vector<16x8xf32>
    %c0_76 = arith.constant 0 : index
    %c2_77 = arith.constant 2 : index
    %c1_78 = arith.constant 1 : index
    %c0_79 = arith.constant 0 : index
    %c0_80 = arith.constant 0 : index
    %86 = vector.load %arg5[%c0_76, %c2_77, %c1_78, %c0_79, %c0_80] : memref<1x3x4x1x8xf32, #tpu.memory_space<vmem>>, vector<1x1x1x1x8xf32>
    %87 = vector.shape_cast %86 : vector<1x1x1x1x8xf32> to vector<1x8xf32>
    %88 = vector.broadcast %87 : vector<1x8xf32> to vector<16x8xf32>
    %89 = arith.addf %85, %88 : vector<16x8xf32>
    %90 = vector.shape_cast %75 : vector<16x8xf32> to vector<2x8x8xf32>
    %91 = arith.truncf %90 : vector<2x8x8xf32> to vector<2x8x8xbf16>
    %92 = vector.shape_cast %82 : vector<16x8xf32> to vector<2x8x8xf32>
    %93 = arith.truncf %92 : vector<2x8x8xf32> to vector<2x8x8xbf16>
    %94 = vector.shape_cast %89 : vector<16x8xf32> to vector<2x8x8xf32>
    %95 = arith.truncf %94 : vector<2x8x8xf32> to vector<2x8x8xbf16>
    "tpu.trace_start"() <{level = 10 : i32, message = "bqd,bkd->bqk"}> : () -> ()
    %cst_81 = arith.constant dense<0.000000e+00> : vector<2x8x8xf32>
    %96 = tpu.matmul %91, %93, %cst_81 {dimension_numbers = #tpu.dot_dimension_numbers<[2], [2], [1], [1], [0, 0, 0, 1, 1, 1], [0], [0]>} : vector<2x8x8xbf16>, vector<2x8x8xbf16>, vector<2x8x8xf32> -> vector<2x8x8xf32>
    "tpu.trace_stop"() : () -> ()
    %cst_82 = arith.constant 0.353553385 : f32
    %97 = vector.broadcast %cst_82 : f32 to vector<2x8x8xf32>
    %98 = arith.mulf %96, %97 : vector<2x8x8xf32>
    %99 = arith.addf %98, %10 : vector<2x8x8xf32>
    %cst_83 = arith.constant dense<0xFF800000> : vector<2x8xf32>
    %100 = vector.multi_reduction <maximumf>, %99, %cst_83 [2] : vector<2x8x8xf32> to vector<2x8xf32>
    %101 = vector.shape_cast %100 : vector<2x8xf32> to vector<2x8x1xf32>
    %102 = vector.broadcast %101 : vector<2x8x1xf32> to vector<2x8x8xf32>
    %103 = arith.subf %99, %102 : vector<2x8x8xf32>
    %104 = math.exp %103 : vector<2x8x8xf32>
    %cst_84 = arith.constant dense<0.000000e+00> : vector<2x8xf32>
    %105 = vector.multi_reduction <add>, %104, %cst_84 [2] : vector<2x8x8xf32> to vector<2x8xf32>
    %106 = vector.shape_cast %105 : vector<2x8xf32> to vector<2x8x1xf32>
    %107 = tpu.reciprocal %106 {approx = true} : vector<2x8x1xf32> -> vector<2x8x1xf32>
    %108 = vector.broadcast %107 : vector<2x8x1xf32> to vector<2x8x8xf32>
    %109 = arith.mulf %104, %108 : vector<2x8x8xf32>
    %110 = arith.truncf %109 : vector<2x8x8xf32> to vector<2x8x8xbf16>
    "tpu.trace_start"() <{level = 10 : i32, message = "bqk,bkd->bqd"}> : () -> ()
    %cst_85 = arith.constant dense<0.000000e+00> : vector<2x8x8xf32>
    %111 = tpu.matmul %110, %95, %cst_85 {dimension_numbers = #tpu.dot_dimension_numbers<[2], [1], [1], [2], [0, 0, 0, 1, 1, 2], [0], [0]>} : vector<2x8x8xbf16>, vector<2x8x8xbf16>, vector<2x8x8xf32> -> vector<2x8x8xf32>
    "tpu.trace_stop"() : () -> ()
    %112 = vector.shape_cast %111 : vector<2x8x8xf32> to vector<16x8xf32>
    %113 = arith.truncf %112 : vector<16x8xf32> to vector<16x8xbf16>
    %c0_86 = arith.constant 0 : index
    %c1_87 = arith.constant 1 : index
    %c0_88 = arith.constant 0 : index
    %c0_89 = arith.constant 0 : index
    %114 = vector.load %arg6[%c0_86, %c1_87, %c0_88, %c0_89] : memref<1x4x8x32xbf16, #tpu.memory_space<vmem>>, vector<1x1x8x32xbf16>
    %115 = vector.shape_cast %114 : vector<1x1x8x32xbf16> to vector<8x32xbf16>
    %cst_90 = arith.constant dense<0.000000e+00> : vector<16x32xf32>
    %116 = tpu.matmul %113, %115, %cst_90 {dimension_numbers = #tpu.dot_dimension_numbers<[1], [0], [0], [1], [0, 0, 1, 1], [], []>} : vector<16x8xbf16>, vector<8x32xbf16>, vector<16x32xf32> -> vector<16x32xf32>
    %117 = arith.addf %68, %116 : vector<16x32xf32>
    %c0_91 = arith.constant 0 : index
    %c0_92 = arith.constant 0 : index
    %c2_93 = arith.constant 2 : index
    %c0_94 = arith.constant 0 : index
    %c0_95 = arith.constant 0 : index
    %118 = vector.load %arg4[%c0_91, %c0_92, %c2_93, %c0_94, %c0_95] : memref<1x3x4x32x8xbf16, #tpu.memory_space<vmem>>, vector<1x1x1x32x8xbf16>
    %119 = vector.shape_cast %118 : vector<1x1x1x32x8xbf16> to vector<32x8xbf16>
    %cst_96 = arith.constant dense<0.000000e+00> : vector<16x8xf32>
    %120 = tpu.matmul %4, %119, %cst_96 {dimension_numbers = #tpu.dot_dimension_numbers<[1], [0], [0], [1], [0, 0, 1, 1], [], []>} : vector<16x32xbf16>, vector<32x8xbf16>, vector<16x8xf32> -> vector<16x8xf32>
    %c0_97 = arith.constant 0 : index
    %c0_98 = arith.constant 0 : index
    %c2_99 = arith.constant 2 : index
    %c0_100 = arith.constant 0 : index
    %c0_101 = arith.constant 0 : index
    %121 = vector.load %arg5[%c0_97, %c0_98, %c2_99, %c0_100, %c0_101] : memref<1x3x4x1x8xf32, #tpu.memory_space<vmem>>, vector<1x1x1x1x8xf32>
    %122 = vector.shape_cast %121 : vector<1x1x1x1x8xf32> to vector<1x8xf32>
    %123 = vector.broadcast %122 : vector<1x8xf32> to vector<16x8xf32>
    %124 = arith.addf %120, %123 : vector<16x8xf32>
    %c0_102 = arith.constant 0 : index
    %c1_103 = arith.constant 1 : index
    %c2_104 = arith.constant 2 : index
    %c0_105 = arith.constant 0 : index
    %c0_106 = arith.constant 0 : index
    %125 = vector.load %arg4[%c0_102, %c1_103, %c2_104, %c0_105, %c0_106] : memref<1x3x4x32x8xbf16, #tpu.memory_space<vmem>>, vector<1x1x1x32x8xbf16>
    %126 = vector.shape_cast %125 : vector<1x1x1x32x8xbf16> to vector<32x8xbf16>
    %cst_107 = arith.constant dense<0.000000e+00> : vector<16x8xf32>
    %127 = tpu.matmul %4, %126, %cst_107 {dimension_numbers = #tpu.dot_dimension_numbers<[1], [0], [0], [1], [0, 0, 1, 1], [], []>} : vector<16x32xbf16>, vector<32x8xbf16>, vector<16x8xf32> -> vector<16x8xf32>
    %c0_108 = arith.constant 0 : index
    %c1_109 = arith.constant 1 : index
    %c2_110 = arith.constant 2 : index
    %c0_111 = arith.constant 0 : index
    %c0_112 = arith.constant 0 : index
    %128 = vector.load %arg5[%c0_108, %c1_109, %c2_110, %c0_111, %c0_112] : memref<1x3x4x1x8xf32, #tpu.memory_space<vmem>>, vector<1x1x1x1x8xf32>
    %129 = vector.shape_cast %128 : vector<1x1x1x1x8xf32> to vector<1x8xf32>
    %130 = vector.broadcast %129 : vector<1x8xf32> to vector<16x8xf32>
    %131 = arith.addf %127, %130 : vector<16x8xf32>
    %c0_113 = arith.constant 0 : index
    %c2_114 = arith.constant 2 : index
    %c2_115 = arith.constant 2 : index
    %c0_116 = arith.constant 0 : index
    %c0_117 = arith.constant 0 : index
    %132 = vector.load %arg4[%c0_113, %c2_114, %c2_115, %c0_116, %c0_117] : memref<1x3x4x32x8xbf16, #tpu.memory_space<vmem>>, vector<1x1x1x32x8xbf16>
    %133 = vector.shape_cast %132 : vector<1x1x1x32x8xbf16> to vector<32x8xbf16>
    %cst_118 = arith.constant dense<0.000000e+00> : vector<16x8xf32>
    %134 = tpu.matmul %4, %133, %cst_118 {dimension_numbers = #tpu.dot_dimension_numbers<[1], [0], [0], [1], [0, 0, 1, 1], [], []>} : vector<16x32xbf16>, vector<32x8xbf16>, vector<16x8xf32> -> vector<16x8xf32>
    %c0_119 = arith.constant 0 : index
    %c2_120 = arith.constant 2 : index
    %c2_121 = arith.constant 2 : index
    %c0_122 = arith.constant 0 : index
    %c0_123 = arith.constant 0 : index
    %135 = vector.load %arg5[%c0_119, %c2_120, %c2_121, %c0_122, %c0_123] : memref<1x3x4x1x8xf32, #tpu.memory_space<vmem>>, vector<1x1x1x1x8xf32>
    %136 = vector.shape_cast %135 : vector<1x1x1x1x8xf32> to vector<1x8xf32>
    %137 = vector.broadcast %136 : vector<1x8xf32> to vector<16x8xf32>
    %138 = arith.addf %134, %137 : vector<16x8xf32>
    %139 = vector.shape_cast %124 : vector<16x8xf32> to vector<2x8x8xf32>
    %140 = arith.truncf %139 : vector<2x8x8xf32> to vector<2x8x8xbf16>
    %141 = vector.shape_cast %131 : vector<16x8xf32> to vector<2x8x8xf32>
    %142 = arith.truncf %141 : vector<2x8x8xf32> to vector<2x8x8xbf16>
    %143 = vector.shape_cast %138 : vector<16x8xf32> to vector<2x8x8xf32>
    %144 = arith.truncf %143 : vector<2x8x8xf32> to vector<2x8x8xbf16>
    "tpu.trace_start"() <{level = 10 : i32, message = "bqd,bkd->bqk"}> : () -> ()
    %cst_124 = arith.constant dense<0.000000e+00> : vector<2x8x8xf32>
    %145 = tpu.matmul %140, %142, %cst_124 {dimension_numbers = #tpu.dot_dimension_numbers<[2], [2], [1], [1], [0, 0, 0, 1, 1, 1], [0], [0]>} : vector<2x8x8xbf16>, vector<2x8x8xbf16>, vector<2x8x8xf32> -> vector<2x8x8xf32>
    "tpu.trace_stop"() : () -> ()
    %cst_125 = arith.constant 0.353553385 : f32
    %146 = vector.broadcast %cst_125 : f32 to vector<2x8x8xf32>
    %147 = arith.mulf %145, %146 : vector<2x8x8xf32>
    %148 = arith.addf %147, %10 : vector<2x8x8xf32>
    %cst_126 = arith.constant dense<0xFF800000> : vector<2x8xf32>
    %149 = vector.multi_reduction <maximumf>, %148, %cst_126 [2] : vector<2x8x8xf32> to vector<2x8xf32>
    %150 = vector.shape_cast %149 : vector<2x8xf32> to vector<2x8x1xf32>
    %151 = vector.broadcast %150 : vector<2x8x1xf32> to vector<2x8x8xf32>
    %152 = arith.subf %148, %151 : vector<2x8x8xf32>
    %153 = math.exp %152 : vector<2x8x8xf32>
    %cst_127 = arith.constant dense<0.000000e+00> : vector<2x8xf32>
    %154 = vector.multi_reduction <add>, %153, %cst_127 [2] : vector<2x8x8xf32> to vector<2x8xf32>
    %155 = vector.shape_cast %154 : vector<2x8xf32> to vector<2x8x1xf32>
    %156 = tpu.reciprocal %155 {approx = true} : vector<2x8x1xf32> -> vector<2x8x1xf32>
    %157 = vector.broadcast %156 : vector<2x8x1xf32> to vector<2x8x8xf32>
    %158 = arith.mulf %153, %157 : vector<2x8x8xf32>
    %159 = arith.truncf %158 : vector<2x8x8xf32> to vector<2x8x8xbf16>
    "tpu.trace_start"() <{level = 10 : i32, message = "bqk,bkd->bqd"}> : () -> ()
    %cst_128 = arith.constant dense<0.000000e+00> : vector<2x8x8xf32>
    %160 = tpu.matmul %159, %144, %cst_128 {dimension_numbers = #tpu.dot_dimension_numbers<[2], [1], [1], [2], [0, 0, 0, 1, 1, 2], [0], [0]>} : vector<2x8x8xbf16>, vector<2x8x8xbf16>, vector<2x8x8xf32> -> vector<2x8x8xf32>
    "tpu.trace_stop"() : () -> ()
    %161 = vector.shape_cast %160 : vector<2x8x8xf32> to vector<16x8xf32>
    %162 = arith.truncf %161 : vector<16x8xf32> to vector<16x8xbf16>
    %c0_129 = arith.constant 0 : index
    %c2_130 = arith.constant 2 : index
    %c0_131 = arith.constant 0 : index
    %c0_132 = arith.constant 0 : index
    %163 = vector.load %arg6[%c0_129, %c2_130, %c0_131, %c0_132] : memref<1x4x8x32xbf16, #tpu.memory_space<vmem>>, vector<1x1x8x32xbf16>
    %164 = vector.shape_cast %163 : vector<1x1x8x32xbf16> to vector<8x32xbf16>
    %cst_133 = arith.constant dense<0.000000e+00> : vector<16x32xf32>
    %165 = tpu.matmul %162, %164, %cst_133 {dimension_numbers = #tpu.dot_dimension_numbers<[1], [0], [0], [1], [0, 0, 1, 1], [], []>} : vector<16x8xbf16>, vector<8x32xbf16>, vector<16x32xf32> -> vector<16x32xf32>
    %166 = arith.addf %117, %165 : vector<16x32xf32>
    %c0_134 = arith.constant 0 : index
    %c0_135 = arith.constant 0 : index
    %c3 = arith.constant 3 : index
    %c0_136 = arith.constant 0 : index
    %c0_137 = arith.constant 0 : index
    %167 = vector.load %arg4[%c0_134, %c0_135, %c3, %c0_136, %c0_137] : memref<1x3x4x32x8xbf16, #tpu.memory_space<vmem>>, vector<1x1x1x32x8xbf16>
    %168 = vector.shape_cast %167 : vector<1x1x1x32x8xbf16> to vector<32x8xbf16>
    %cst_138 = arith.constant dense<0.000000e+00> : vector<16x8xf32>
    %169 = tpu.matmul %4, %168, %cst_138 {dimension_numbers = #tpu.dot_dimension_numbers<[1], [0], [0], [1], [0, 0, 1, 1], [], []>} : vector<16x32xbf16>, vector<32x8xbf16>, vector<16x8xf32> -> vector<16x8xf32>
    %c0_139 = arith.constant 0 : index
    %c0_140 = arith.constant 0 : index
    %c3_141 = arith.constant 3 : index
    %c0_142 = arith.constant 0 : index
    %c0_143 = arith.constant 0 : index
    %170 = vector.load %arg5[%c0_139, %c0_140, %c3_141, %c0_142, %c0_143] : memref<1x3x4x1x8xf32, #tpu.memory_space<vmem>>, vector<1x1x1x1x8xf32>
    %171 = vector.shape_cast %170 : vector<1x1x1x1x8xf32> to vector<1x8xf32>
    %172 = vector.broadcast %171 : vector<1x8xf32> to vector<16x8xf32>
    %173 = arith.addf %169, %172 : vector<16x8xf32>
    %c0_144 = arith.constant 0 : index
    %c1_145 = arith.constant 1 : index
    %c3_146 = arith.constant 3 : index
    %c0_147 = arith.constant 0 : index
    %c0_148 = arith.constant 0 : index
    %174 = vector.load %arg4[%c0_144, %c1_145, %c3_146, %c0_147, %c0_148] : memref<1x3x4x32x8xbf16, #tpu.memory_space<vmem>>, vector<1x1x1x32x8xbf16>
    %175 = vector.shape_cast %174 : vector<1x1x1x32x8xbf16> to vector<32x8xbf16>
    %cst_149 = arith.constant dense<0.000000e+00> : vector<16x8xf32>
    %176 = tpu.matmul %4, %175, %cst_149 {dimension_numbers = #tpu.dot_dimension_numbers<[1], [0], [0], [1], [0, 0, 1, 1], [], []>} : vector<16x32xbf16>, vector<32x8xbf16>, vector<16x8xf32> -> vector<16x8xf32>
    %c0_150 = arith.constant 0 : index
    %c1_151 = arith.constant 1 : index
    %c3_152 = arith.constant 3 : index
    %c0_153 = arith.constant 0 : index
    %c0_154 = arith.constant 0 : index
    %177 = vector.load %arg5[%c0_150, %c1_151, %c3_152, %c0_153, %c0_154] : memref<1x3x4x1x8xf32, #tpu.memory_space<vmem>>, vector<1x1x1x1x8xf32>
    %178 = vector.shape_cast %177 : vector<1x1x1x1x8xf32> to vector<1x8xf32>
    %179 = vector.broadcast %178 : vector<1x8xf32> to vector<16x8xf32>
    %180 = arith.addf %176, %179 : vector<16x8xf32>
    %c0_155 = arith.constant 0 : index
    %c2_156 = arith.constant 2 : index
    %c3_157 = arith.constant 3 : index
    %c0_158 = arith.constant 0 : index
    %c0_159 = arith.constant 0 : index
    %181 = vector.load %arg4[%c0_155, %c2_156, %c3_157, %c0_158, %c0_159] : memref<1x3x4x32x8xbf16, #tpu.memory_space<vmem>>, vector<1x1x1x32x8xbf16>
    %182 = vector.shape_cast %181 : vector<1x1x1x32x8xbf16> to vector<32x8xbf16>
    %cst_160 = arith.constant dense<0.000000e+00> : vector<16x8xf32>
    %183 = tpu.matmul %4, %182, %cst_160 {dimension_numbers = #tpu.dot_dimension_numbers<[1], [0], [0], [1], [0, 0, 1, 1], [], []>} : vector<16x32xbf16>, vector<32x8xbf16>, vector<16x8xf32> -> vector<16x8xf32>
    %c0_161 = arith.constant 0 : index
    %c2_162 = arith.constant 2 : index
    %c3_163 = arith.constant 3 : index
    %c0_164 = arith.constant 0 : index
    %c0_165 = arith.constant 0 : index
    %184 = vector.load %arg5[%c0_161, %c2_162, %c3_163, %c0_164, %c0_165] : memref<1x3x4x1x8xf32, #tpu.memory_space<vmem>>, vector<1x1x1x1x8xf32>
    %185 = vector.shape_cast %184 : vector<1x1x1x1x8xf32> to vector<1x8xf32>
    %186 = vector.broadcast %185 : vector<1x8xf32> to vector<16x8xf32>
    %187 = arith.addf %183, %186 : vector<16x8xf32>
    %188 = vector.shape_cast %173 : vector<16x8xf32> to vector<2x8x8xf32>
    %189 = arith.truncf %188 : vector<2x8x8xf32> to vector<2x8x8xbf16>
    %190 = vector.shape_cast %180 : vector<16x8xf32> to vector<2x8x8xf32>
    %191 = arith.truncf %190 : vector<2x8x8xf32> to vector<2x8x8xbf16>
    %192 = vector.shape_cast %187 : vector<16x8xf32> to vector<2x8x8xf32>
    %193 = arith.truncf %192 : vector<2x8x8xf32> to vector<2x8x8xbf16>
    "tpu.trace_start"() <{level = 10 : i32, message = "bqd,bkd->bqk"}> : () -> ()
    %cst_166 = arith.constant dense<0.000000e+00> : vector<2x8x8xf32>
    %194 = tpu.matmul %189, %191, %cst_166 {dimension_numbers = #tpu.dot_dimension_numbers<[2], [2], [1], [1], [0, 0, 0, 1, 1, 1], [0], [0]>} : vector<2x8x8xbf16>, vector<2x8x8xbf16>, vector<2x8x8xf32> -> vector<2x8x8xf32>
    "tpu.trace_stop"() : () -> ()
    %cst_167 = arith.constant 0.353553385 : f32
    %195 = vector.broadcast %cst_167 : f32 to vector<2x8x8xf32>
    %196 = arith.mulf %194, %195 : vector<2x8x8xf32>
    %197 = arith.addf %196, %10 : vector<2x8x8xf32>
    %cst_168 = arith.constant dense<0xFF800000> : vector<2x8xf32>
    %198 = vector.multi_reduction <maximumf>, %197, %cst_168 [2] : vector<2x8x8xf32> to vector<2x8xf32>
    %199 = vector.shape_cast %198 : vector<2x8xf32> to vector<2x8x1xf32>
    %200 = vector.broadcast %199 : vector<2x8x1xf32> to vector<2x8x8xf32>
    %201 = arith.subf %197, %200 : vector<2x8x8xf32>
    %202 = math.exp %201 : vector<2x8x8xf32>
    %cst_169 = arith.constant dense<0.000000e+00> : vector<2x8xf32>
    %203 = vector.multi_reduction <add>, %202, %cst_169 [2] : vector<2x8x8xf32> to vector<2x8xf32>
    %204 = vector.shape_cast %203 : vector<2x8xf32> to vector<2x8x1xf32>
    %205 = tpu.reciprocal %204 {approx = true} : vector<2x8x1xf32> -> vector<2x8x1xf32>
    %206 = vector.broadcast %205 : vector<2x8x1xf32> to vector<2x8x8xf32>
    %207 = arith.mulf %202, %206 : vector<2x8x8xf32>
    %208 = arith.truncf %207 : vector<2x8x8xf32> to vector<2x8x8xbf16>
    "tpu.trace_start"() <{level = 10 : i32, message = "bqk,bkd->bqd"}> : () -> ()
    %cst_170 = arith.constant dense<0.000000e+00> : vector<2x8x8xf32>
    %209 = tpu.matmul %208, %193, %cst_170 {dimension_numbers = #tpu.dot_dimension_numbers<[2], [1], [1], [2], [0, 0, 0, 1, 1, 2], [0], [0]>} : vector<2x8x8xbf16>, vector<2x8x8xbf16>, vector<2x8x8xf32> -> vector<2x8x8xf32>
    "tpu.trace_stop"() : () -> ()
    %210 = vector.shape_cast %209 : vector<2x8x8xf32> to vector<16x8xf32>
    %211 = arith.truncf %210 : vector<16x8xf32> to vector<16x8xbf16>
    %c0_171 = arith.constant 0 : index
    %c3_172 = arith.constant 3 : index
    %c0_173 = arith.constant 0 : index
    %c0_174 = arith.constant 0 : index
    %212 = vector.load %arg6[%c0_171, %c3_172, %c0_173, %c0_174] : memref<1x4x8x32xbf16, #tpu.memory_space<vmem>>, vector<1x1x8x32xbf16>
    %213 = vector.shape_cast %212 : vector<1x1x8x32xbf16> to vector<8x32xbf16>
    %cst_175 = arith.constant dense<0.000000e+00> : vector<16x32xf32>
    %214 = tpu.matmul %211, %213, %cst_175 {dimension_numbers = #tpu.dot_dimension_numbers<[1], [0], [0], [1], [0, 0, 1, 1], [], []>} : vector<16x8xbf16>, vector<8x32xbf16>, vector<16x32xf32> -> vector<16x32xf32>
    %215 = arith.addf %166, %214 : vector<16x32xf32>
    %216 = vector.broadcast %13 : vector<1x32xf32> to vector<16x32xf32>
    %217 = arith.addf %215, %216 : vector<16x32xf32>
    %218 = arith.addf %217, %3 : vector<16x32xf32>
    %cst_176 = arith.constant dense<0.000000e+00> : vector<16xf32>
    %219 = vector.multi_reduction <add>, %218, %cst_176 [1] : vector<16x32xf32> to vector<16xf32>
    %220 = vector.shape_cast %219 : vector<16xf32> to vector<16x1xf32>
    %cst_177 = arith.constant 3.200000e+01 : f32
    %221 = vector.broadcast %cst_177 : f32 to vector<16x1xf32>
    %222 = arith.divf %220, %221 : vector<16x1xf32>
    %223 = vector.broadcast %222 : vector<16x1xf32> to vector<16x32xf32>
    %224 = arith.subf %218, %223 : vector<16x32xf32>
    %225 = arith.mulf %224, %224 : vector<16x32xf32>
    %cst_178 = arith.constant dense<0.000000e+00> : vector<16xf32>
    %226 = vector.multi_reduction <add>, %225, %cst_178 [1] : vector<16x32xf32> to vector<16xf32>
    %227 = vector.shape_cast %226 : vector<16xf32> to vector<16x1xf32>
    %cst_179 = arith.constant 3.200000e+01 : f32
    %228 = vector.broadcast %cst_179 : f32 to vector<16x1xf32>
    %229 = arith.divf %227, %228 : vector<16x1xf32>
    %230 = vector.broadcast %222 : vector<16x1xf32> to vector<16x32xf32>
    %231 = arith.subf %218, %230 : vector<16x32xf32>
    %cst_180 = arith.constant 9.99999996E-13 : f32
    %232 = vector.broadcast %cst_180 : f32 to vector<16x1xf32>
    %233 = arith.addf %229, %232 : vector<16x1xf32>
    %234 = math.rsqrt %233 : vector<16x1xf32>
    %235 = vector.broadcast %234 : vector<16x1xf32> to vector<16x32xf32>
    %236 = arith.mulf %231, %235 : vector<16x32xf32>
    %237 = vector.broadcast %14 : vector<1x32xf32> to vector<16x32xf32>
    %238 = arith.mulf %236, %237 : vector<16x32xf32>
    %239 = vector.broadcast %15 : vector<1x32xf32> to vector<16x32xf32>
    %240 = arith.addf %238, %239 : vector<16x32xf32>
    %241 = arith.truncf %240 : vector<16x32xf32> to vector<16x32xbf16>
    %cst_181 = arith.constant 0.000000e+00 : f32
    %242 = vector.broadcast %cst_181 : f32 to vector<16x32xf32>
    %c0_182 = arith.constant 0 : index
    %c0_183 = arith.constant 0 : index
    %c0_184 = arith.constant 0 : index
    %243 = vector.load %arg7[%c0_182, %c0_183, %c0_184] : memref<1x32x3072xbf16, #tpu.memory_space<vmem>>, vector<1x32x512xbf16>
    %244 = vector.shape_cast %243 : vector<1x32x512xbf16> to vector<32x512xbf16>
    %cst_185 = arith.constant dense<0.000000e+00> : vector<16x512xf32>
    %245 = tpu.matmul %241, %244, %cst_185 {dimension_numbers = #tpu.dot_dimension_numbers<[1], [0], [0], [1], [0, 0, 1, 1], [], []>} : vector<16x32xbf16>, vector<32x512xbf16>, vector<16x512xf32> -> vector<16x512xf32>
    %c0_186 = arith.constant 0 : index
    %c0_187 = arith.constant 0 : index
    %c0_188 = arith.constant 0 : index
    %246 = vector.load %arg8[%c0_186, %c0_187, %c0_188] : memref<1x1x3072xf32, #tpu.memory_space<vmem>>, vector<1x1x512xf32>
    %247 = vector.shape_cast %246 : vector<1x1x512xf32> to vector<1x512xf32>
    %248 = vector.broadcast %247 : vector<1x512xf32> to vector<16x512xf32>
    %249 = arith.addf %245, %248 : vector<16x512xf32>
    %cst_189 = arith.constant 5.000000e-01 : f32
    %250 = vector.broadcast %cst_189 : f32 to vector<16x512xf32>
    %251 = arith.mulf %250, %249 : vector<16x512xf32>
    %cst_190 = arith.constant 0.707106769 : f32
    %252 = vector.broadcast %cst_190 : f32 to vector<16x512xf32>
    %253 = arith.mulf %249, %252 : vector<16x512xf32>
    %254 = math.absf %253 : vector<16x512xf32>
    %cst_191 = arith.constant 0.327591091 : f32
    %255 = vector.broadcast %cst_191 : f32 to vector<16x512xf32>
    %256 = arith.mulf %255, %254 : vector<16x512xf32>
    %cst_192 = arith.constant 1.000000e+00 : f32
    %257 = vector.broadcast %cst_192 : f32 to vector<16x512xf32>
    %258 = arith.addf %257, %256 : vector<16x512xf32>
    %cst_193 = arith.constant 1.000000e+00 : f32
    %259 = vector.broadcast %cst_193 : f32 to vector<16x512xf32>
    %260 = arith.divf %259, %258 : vector<16x512xf32>
    %cst_194 = arith.constant 1.06140542 : f32
    %261 = vector.broadcast %cst_194 : f32 to vector<16x512xf32>
    %262 = arith.mulf %261, %260 : vector<16x512xf32>
    %cst_195 = arith.constant -1.45315206 : f32
    %263 = vector.broadcast %cst_195 : f32 to vector<16x512xf32>
    %264 = arith.addf %262, %263 : vector<16x512xf32>
    %265 = arith.mulf %264, %260 : vector<16x512xf32>
    %cst_196 = arith.constant 1.42141378 : f32
    %266 = vector.broadcast %cst_196 : f32 to vector<16x512xf32>
    %267 = arith.addf %265, %266 : vector<16x512xf32>
    %268 = arith.mulf %267, %260 : vector<16x512xf32>
    %cst_197 = arith.constant -0.284496725 : f32
    %269 = vector.broadcast %cst_197 : f32 to vector<16x512xf32>
    %270 = arith.addf %268, %269 : vector<16x512xf32>
    %271 = arith.mulf %270, %260 : vector<16x512xf32>
    %cst_198 = arith.constant 0.254829586 : f32
    %272 = vector.broadcast %cst_198 : f32 to vector<16x512xf32>
    %273 = arith.addf %271, %272 : vector<16x512xf32>
    %274 = arith.mulf %273, %260 : vector<16x512xf32>
    %cst_199 = arith.constant 0.000000e+00 : f32
    %275 = vector.broadcast %cst_199 : f32 to vector<16x512xf32>
    %276 = arith.subf %275, %254 : vector<16x512xf32>
    %277 = arith.mulf %276, %254 : vector<16x512xf32>
    %278 = math.exp %277 : vector<16x512xf32>
    %279 = arith.mulf %274, %278 : vector<16x512xf32>
    %cst_200 = arith.constant 1.000000e+00 : f32
    %280 = vector.broadcast %cst_200 : f32 to vector<16x512xf32>
    %281 = arith.subf %280, %279 : vector<16x512xf32>
    %cst_201 = arith.constant 0.000000e+00 : f32
    %282 = vector.broadcast %cst_201 : f32 to vector<16x512xf32>
    %283 = arith.cmpf olt, %253, %282 : vector<16x512xf32>
    %cst_202 = arith.constant 0.000000e+00 : f32
    %284 = vector.broadcast %cst_202 : f32 to vector<16x512xf32>
    %285 = arith.subf %284, %281 : vector<16x512xf32>
    %286 = arith.select %283, %285, %281 : vector<16x512xi1>, vector<16x512xf32>
    %cst_203 = arith.constant 1.000000e+00 : f32
    %287 = vector.broadcast %cst_203 : f32 to vector<16x512xf32>
    %288 = arith.addf %287, %286 : vector<16x512xf32>
    %289 = arith.mulf %251, %288 : vector<16x512xf32>
    %290 = arith.truncf %289 : vector<16x512xf32> to vector<16x512xbf16>
    %c0_204 = arith.constant 0 : index
    %c0_205 = arith.constant 0 : index
    %c0_206 = arith.constant 0 : index
    %291 = vector.load %arg9[%c0_204, %c0_205, %c0_206] : memref<1x3072x32xbf16, #tpu.memory_space<vmem>>, vector<1x512x32xbf16>
    %292 = vector.shape_cast %291 : vector<1x512x32xbf16> to vector<512x32xbf16>
    %cst_207 = arith.constant dense<0.000000e+00> : vector<16x32xf32>
    %293 = tpu.matmul %290, %292, %cst_207 {dimension_numbers = #tpu.dot_dimension_numbers<[1], [0], [0], [1], [0, 0, 1, 1], [], []>} : vector<16x512xbf16>, vector<512x32xbf16>, vector<16x32xf32> -> vector<16x32xf32>
    %294 = arith.addf %242, %293 : vector<16x32xf32>
    %c0_208 = arith.constant 0 : index
    %c0_209 = arith.constant 0 : index
    %c512 = arith.constant 512 : index
    %295 = vector.load %arg7[%c0_208, %c0_209, %c512] : memref<1x32x3072xbf16, #tpu.memory_space<vmem>>, vector<1x32x512xbf16>
    %296 = vector.shape_cast %295 : vector<1x32x512xbf16> to vector<32x512xbf16>
    %cst_210 = arith.constant dense<0.000000e+00> : vector<16x512xf32>
    %297 = tpu.matmul %241, %296, %cst_210 {dimension_numbers = #tpu.dot_dimension_numbers<[1], [0], [0], [1], [0, 0, 1, 1], [], []>} : vector<16x32xbf16>, vector<32x512xbf16>, vector<16x512xf32> -> vector<16x512xf32>
    %c0_211 = arith.constant 0 : index
    %c0_212 = arith.constant 0 : index
    %c512_213 = arith.constant 512 : index
    %298 = vector.load %arg8[%c0_211, %c0_212, %c512_213] : memref<1x1x3072xf32, #tpu.memory_space<vmem>>, vector<1x1x512xf32>
    %299 = vector.shape_cast %298 : vector<1x1x512xf32> to vector<1x512xf32>
    %300 = vector.broadcast %299 : vector<1x512xf32> to vector<16x512xf32>
    %301 = arith.addf %297, %300 : vector<16x512xf32>
    %cst_214 = arith.constant 5.000000e-01 : f32
    %302 = vector.broadcast %cst_214 : f32 to vector<16x512xf32>
    %303 = arith.mulf %302, %301 : vector<16x512xf32>
    %cst_215 = arith.constant 0.707106769 : f32
    %304 = vector.broadcast %cst_215 : f32 to vector<16x512xf32>
    %305 = arith.mulf %301, %304 : vector<16x512xf32>
    %306 = math.absf %305 : vector<16x512xf32>
    %cst_216 = arith.constant 0.327591091 : f32
    %307 = vector.broadcast %cst_216 : f32 to vector<16x512xf32>
    %308 = arith.mulf %307, %306 : vector<16x512xf32>
    %cst_217 = arith.constant 1.000000e+00 : f32
    %309 = vector.broadcast %cst_217 : f32 to vector<16x512xf32>
    %310 = arith.addf %309, %308 : vector<16x512xf32>
    %cst_218 = arith.constant 1.000000e+00 : f32
    %311 = vector.broadcast %cst_218 : f32 to vector<16x512xf32>
    %312 = arith.divf %311, %310 : vector<16x512xf32>
    %cst_219 = arith.constant 1.06140542 : f32
    %313 = vector.broadcast %cst_219 : f32 to vector<16x512xf32>
    %314 = arith.mulf %313, %312 : vector<16x512xf32>
    %cst_220 = arith.constant -1.45315206 : f32
    %315 = vector.broadcast %cst_220 : f32 to vector<16x512xf32>
    %316 = arith.addf %314, %315 : vector<16x512xf32>
    %317 = arith.mulf %316, %312 : vector<16x512xf32>
    %cst_221 = arith.constant 1.42141378 : f32
    %318 = vector.broadcast %cst_221 : f32 to vector<16x512xf32>
    %319 = arith.addf %317, %318 : vector<16x512xf32>
    %320 = arith.mulf %319, %312 : vector<16x512xf32>
    %cst_222 = arith.constant -0.284496725 : f32
    %321 = vector.broadcast %cst_222 : f32 to vector<16x512xf32>
    %322 = arith.addf %320, %321 : vector<16x512xf32>
    %323 = arith.mulf %322, %312 : vector<16x512xf32>
    %cst_223 = arith.constant 0.254829586 : f32
    %324 = vector.broadcast %cst_223 : f32 to vector<16x512xf32>
    %325 = arith.addf %323, %324 : vector<16x512xf32>
    %326 = arith.mulf %325, %312 : vector<16x512xf32>
    %cst_224 = arith.constant 0.000000e+00 : f32
    %327 = vector.broadcast %cst_224 : f32 to vector<16x512xf32>
    %328 = arith.subf %327, %306 : vector<16x512xf32>
    %329 = arith.mulf %328, %306 : vector<16x512xf32>
    %330 = math.exp %329 : vector<16x512xf32>
    %331 = arith.mulf %326, %330 : vector<16x512xf32>
    %cst_225 = arith.constant 1.000000e+00 : f32
    %332 = vector.broadcast %cst_225 : f32 to vector<16x512xf32>
    %333 = arith.subf %332, %331 : vector<16x512xf32>
    %cst_226 = arith.constant 0.000000e+00 : f32
    %334 = vector.broadcast %cst_226 : f32 to vector<16x512xf32>
    %335 = arith.cmpf olt, %305, %334 : vector<16x512xf32>
    %cst_227 = arith.constant 0.000000e+00 : f32
    %336 = vector.broadcast %cst_227 : f32 to vector<16x512xf32>
    %337 = arith.subf %336, %333 : vector<16x512xf32>
    %338 = arith.select %335, %337, %333 : vector<16x512xi1>, vector<16x512xf32>
    %cst_228 = arith.constant 1.000000e+00 : f32
    %339 = vector.broadcast %cst_228 : f32 to vector<16x512xf32>
    %340 = arith.addf %339, %338 : vector<16x512xf32>
    %341 = arith.mulf %303, %340 : vector<16x512xf32>
    %342 = arith.truncf %341 : vector<16x512xf32> to vector<16x512xbf16>
    %c0_229 = arith.constant 0 : index
    %c512_230 = arith.constant 512 : index
    %c0_231 = arith.constant 0 : index
    %343 = vector.load %arg9[%c0_229, %c512_230, %c0_231] : memref<1x3072x32xbf16, #tpu.memory_space<vmem>>, vector<1x512x32xbf16>
    %344 = vector.shape_cast %343 : vector<1x512x32xbf16> to vector<512x32xbf16>
    %cst_232 = arith.constant dense<0.000000e+00> : vector<16x32xf32>
    %345 = tpu.matmul %342, %344, %cst_232 {dimension_numbers = #tpu.dot_dimension_numbers<[1], [0], [0], [1], [0, 0, 1, 1], [], []>} : vector<16x512xbf16>, vector<512x32xbf16>, vector<16x32xf32> -> vector<16x32xf32>
    %346 = arith.addf %294, %345 : vector<16x32xf32>
    %c0_233 = arith.constant 0 : index
    %c0_234 = arith.constant 0 : index
    %c1024 = arith.constant 1024 : index
    %347 = vector.load %arg7[%c0_233, %c0_234, %c1024] : memref<1x32x3072xbf16, #tpu.memory_space<vmem>>, vector<1x32x512xbf16>
    %348 = vector.shape_cast %347 : vector<1x32x512xbf16> to vector<32x512xbf16>
    %cst_235 = arith.constant dense<0.000000e+00> : vector<16x512xf32>
    %349 = tpu.matmul %241, %348, %cst_235 {dimension_numbers = #tpu.dot_dimension_numbers<[1], [0], [0], [1], [0, 0, 1, 1], [], []>} : vector<16x32xbf16>, vector<32x512xbf16>, vector<16x512xf32> -> vector<16x512xf32>
    %c0_236 = arith.constant 0 : index
    %c0_237 = arith.constant 0 : index
    %c1024_238 = arith.constant 1024 : index
    %350 = vector.load %arg8[%c0_236, %c0_237, %c1024_238] : memref<1x1x3072xf32, #tpu.memory_space<vmem>>, vector<1x1x512xf32>
    %351 = vector.shape_cast %350 : vector<1x1x512xf32> to vector<1x512xf32>
    %352 = vector.broadcast %351 : vector<1x512xf32> to vector<16x512xf32>
    %353 = arith.addf %349, %352 : vector<16x512xf32>
    %cst_239 = arith.constant 5.000000e-01 : f32
    %354 = vector.broadcast %cst_239 : f32 to vector<16x512xf32>
    %355 = arith.mulf %354, %353 : vector<16x512xf32>
    %cst_240 = arith.constant 0.707106769 : f32
    %356 = vector.broadcast %cst_240 : f32 to vector<16x512xf32>
    %357 = arith.mulf %353, %356 : vector<16x512xf32>
    %358 = math.absf %357 : vector<16x512xf32>
    %cst_241 = arith.constant 0.327591091 : f32
    %359 = vector.broadcast %cst_241 : f32 to vector<16x512xf32>
    %360 = arith.mulf %359, %358 : vector<16x512xf32>
    %cst_242 = arith.constant 1.000000e+00 : f32
    %361 = vector.broadcast %cst_242 : f32 to vector<16x512xf32>
    %362 = arith.addf %361, %360 : vector<16x512xf32>
    %cst_243 = arith.constant 1.000000e+00 : f32
    %363 = vector.broadcast %cst_243 : f32 to vector<16x512xf32>
    %364 = arith.divf %363, %362 : vector<16x512xf32>
    %cst_244 = arith.constant 1.06140542 : f32
    %365 = vector.broadcast %cst_244 : f32 to vector<16x512xf32>
    %366 = arith.mulf %365, %364 : vector<16x512xf32>
    %cst_245 = arith.constant -1.45315206 : f32
    %367 = vector.broadcast %cst_245 : f32 to vector<16x512xf32>
    %368 = arith.addf %366, %367 : vector<16x512xf32>
    %369 = arith.mulf %368, %364 : vector<16x512xf32>
    %cst_246 = arith.constant 1.42141378 : f32
    %370 = vector.broadcast %cst_246 : f32 to vector<16x512xf32>
    %371 = arith.addf %369, %370 : vector<16x512xf32>
    %372 = arith.mulf %371, %364 : vector<16x512xf32>
    %cst_247 = arith.constant -0.284496725 : f32
    %373 = vector.broadcast %cst_247 : f32 to vector<16x512xf32>
    %374 = arith.addf %372, %373 : vector<16x512xf32>
    %375 = arith.mulf %374, %364 : vector<16x512xf32>
    %cst_248 = arith.constant 0.254829586 : f32
    %376 = vector.broadcast %cst_248 : f32 to vector<16x512xf32>
    %377 = arith.addf %375, %376 : vector<16x512xf32>
    %378 = arith.mulf %377, %364 : vector<16x512xf32>
    %cst_249 = arith.constant 0.000000e+00 : f32
    %379 = vector.broadcast %cst_249 : f32 to vector<16x512xf32>
    %380 = arith.subf %379, %358 : vector<16x512xf32>
    %381 = arith.mulf %380, %358 : vector<16x512xf32>
    %382 = math.exp %381 : vector<16x512xf32>
    %383 = arith.mulf %378, %382 : vector<16x512xf32>
    %cst_250 = arith.constant 1.000000e+00 : f32
    %384 = vector.broadcast %cst_250 : f32 to vector<16x512xf32>
    %385 = arith.subf %384, %383 : vector<16x512xf32>
    %cst_251 = arith.constant 0.000000e+00 : f32
    %386 = vector.broadcast %cst_251 : f32 to vector<16x512xf32>
    %387 = arith.cmpf olt, %357, %386 : vector<16x512xf32>
    %cst_252 = arith.constant 0.000000e+00 : f32
    %388 = vector.broadcast %cst_252 : f32 to vector<16x512xf32>
    %389 = arith.subf %388, %385 : vector<16x512xf32>
    %390 = arith.select %387, %389, %385 : vector<16x512xi1>, vector<16x512xf32>
    %cst_253 = arith.constant 1.000000e+00 : f32
    %391 = vector.broadcast %cst_253 : f32 to vector<16x512xf32>
    %392 = arith.addf %391, %390 : vector<16x512xf32>
    %393 = arith.mulf %355, %392 : vector<16x512xf32>
    %394 = arith.truncf %393 : vector<16x512xf32> to vector<16x512xbf16>
    %c0_254 = arith.constant 0 : index
    %c1024_255 = arith.constant 1024 : index
    %c0_256 = arith.constant 0 : index
    %395 = vector.load %arg9[%c0_254, %c1024_255, %c0_256] : memref<1x3072x32xbf16, #tpu.memory_space<vmem>>, vector<1x512x32xbf16>
    %396 = vector.shape_cast %395 : vector<1x512x32xbf16> to vector<512x32xbf16>
    %cst_257 = arith.constant dense<0.000000e+00> : vector<16x32xf32>
    %397 = tpu.matmul %394, %396, %cst_257 {dimension_numbers = #tpu.dot_dimension_numbers<[1], [0], [0], [1], [0, 0, 1, 1], [], []>} : vector<16x512xbf16>, vector<512x32xbf16>, vector<16x32xf32> -> vector<16x32xf32>
    %398 = arith.addf %346, %397 : vector<16x32xf32>
    %c0_258 = arith.constant 0 : index
    %c0_259 = arith.constant 0 : index
    %c1536 = arith.constant 1536 : index
    %399 = vector.load %arg7[%c0_258, %c0_259, %c1536] : memref<1x32x3072xbf16, #tpu.memory_space<vmem>>, vector<1x32x512xbf16>
    %400 = vector.shape_cast %399 : vector<1x32x512xbf16> to vector<32x512xbf16>
    %cst_260 = arith.constant dense<0.000000e+00> : vector<16x512xf32>
    %401 = tpu.matmul %241, %400, %cst_260 {dimension_numbers = #tpu.dot_dimension_numbers<[1], [0], [0], [1], [0, 0, 1, 1], [], []>} : vector<16x32xbf16>, vector<32x512xbf16>, vector<16x512xf32> -> vector<16x512xf32>
    %c0_261 = arith.constant 0 : index
    %c0_262 = arith.constant 0 : index
    %c1536_263 = arith.constant 1536 : index
    %402 = vector.load %arg8[%c0_261, %c0_262, %c1536_263] : memref<1x1x3072xf32, #tpu.memory_space<vmem>>, vector<1x1x512xf32>
    %403 = vector.shape_cast %402 : vector<1x1x512xf32> to vector<1x512xf32>
    %404 = vector.broadcast %403 : vector<1x512xf32> to vector<16x512xf32>
    %405 = arith.addf %401, %404 : vector<16x512xf32>
    %cst_264 = arith.constant 5.000000e-01 : f32
    %406 = vector.broadcast %cst_264 : f32 to vector<16x512xf32>
    %407 = arith.mulf %406, %405 : vector<16x512xf32>
    %cst_265 = arith.constant 0.707106769 : f32
    %408 = vector.broadcast %cst_265 : f32 to vector<16x512xf32>
    %409 = arith.mulf %405, %408 : vector<16x512xf32>
    %410 = math.absf %409 : vector<16x512xf32>
    %cst_266 = arith.constant 0.327591091 : f32
    %411 = vector.broadcast %cst_266 : f32 to vector<16x512xf32>
    %412 = arith.mulf %411, %410 : vector<16x512xf32>
    %cst_267 = arith.constant 1.000000e+00 : f32
    %413 = vector.broadcast %cst_267 : f32 to vector<16x512xf32>
    %414 = arith.addf %413, %412 : vector<16x512xf32>
    %cst_268 = arith.constant 1.000000e+00 : f32
    %415 = vector.broadcast %cst_268 : f32 to vector<16x512xf32>
    %416 = arith.divf %415, %414 : vector<16x512xf32>
    %cst_269 = arith.constant 1.06140542 : f32
    %417 = vector.broadcast %cst_269 : f32 to vector<16x512xf32>
    %418 = arith.mulf %417, %416 : vector<16x512xf32>
    %cst_270 = arith.constant -1.45315206 : f32
    %419 = vector.broadcast %cst_270 : f32 to vector<16x512xf32>
    %420 = arith.addf %418, %419 : vector<16x512xf32>
    %421 = arith.mulf %420, %416 : vector<16x512xf32>
    %cst_271 = arith.constant 1.42141378 : f32
    %422 = vector.broadcast %cst_271 : f32 to vector<16x512xf32>
    %423 = arith.addf %421, %422 : vector<16x512xf32>
    %424 = arith.mulf %423, %416 : vector<16x512xf32>
    %cst_272 = arith.constant -0.284496725 : f32
    %425 = vector.broadcast %cst_272 : f32 to vector<16x512xf32>
    %426 = arith.addf %424, %425 : vector<16x512xf32>
    %427 = arith.mulf %426, %416 : vector<16x512xf32>
    %cst_273 = arith.constant 0.254829586 : f32
    %428 = vector.broadcast %cst_273 : f32 to vector<16x512xf32>
    %429 = arith.addf %427, %428 : vector<16x512xf32>
    %430 = arith.mulf %429, %416 : vector<16x512xf32>
    %cst_274 = arith.constant 0.000000e+00 : f32
    %431 = vector.broadcast %cst_274 : f32 to vector<16x512xf32>
    %432 = arith.subf %431, %410 : vector<16x512xf32>
    %433 = arith.mulf %432, %410 : vector<16x512xf32>
    %434 = math.exp %433 : vector<16x512xf32>
    %435 = arith.mulf %430, %434 : vector<16x512xf32>
    %cst_275 = arith.constant 1.000000e+00 : f32
    %436 = vector.broadcast %cst_275 : f32 to vector<16x512xf32>
    %437 = arith.subf %436, %435 : vector<16x512xf32>
    %cst_276 = arith.constant 0.000000e+00 : f32
    %438 = vector.broadcast %cst_276 : f32 to vector<16x512xf32>
    %439 = arith.cmpf olt, %409, %438 : vector<16x512xf32>
    %cst_277 = arith.constant 0.000000e+00 : f32
    %440 = vector.broadcast %cst_277 : f32 to vector<16x512xf32>
    %441 = arith.subf %440, %437 : vector<16x512xf32>
    %442 = arith.select %439, %441, %437 : vector<16x512xi1>, vector<16x512xf32>
    %cst_278 = arith.constant 1.000000e+00 : f32
    %443 = vector.broadcast %cst_278 : f32 to vector<16x512xf32>
    %444 = arith.addf %443, %442 : vector<16x512xf32>
    %445 = arith.mulf %407, %444 : vector<16x512xf32>
    %446 = arith.truncf %445 : vector<16x512xf32> to vector<16x512xbf16>
    %c0_279 = arith.constant 0 : index
    %c1536_280 = arith.constant 1536 : index
    %c0_281 = arith.constant 0 : index
    %447 = vector.load %arg9[%c0_279, %c1536_280, %c0_281] : memref<1x3072x32xbf16, #tpu.memory_space<vmem>>, vector<1x512x32xbf16>
    %448 = vector.shape_cast %447 : vector<1x512x32xbf16> to vector<512x32xbf16>
    %cst_282 = arith.constant dense<0.000000e+00> : vector<16x32xf32>
    %449 = tpu.matmul %446, %448, %cst_282 {dimension_numbers = #tpu.dot_dimension_numbers<[1], [0], [0], [1], [0, 0, 1, 1], [], []>} : vector<16x512xbf16>, vector<512x32xbf16>, vector<16x32xf32> -> vector<16x32xf32>
    %450 = arith.addf %398, %449 : vector<16x32xf32>
    %c0_283 = arith.constant 0 : index
    %c0_284 = arith.constant 0 : index
    %c2048 = arith.constant 2048 : index
    %451 = vector.load %arg7[%c0_283, %c0_284, %c2048] : memref<1x32x3072xbf16, #tpu.memory_space<vmem>>, vector<1x32x512xbf16>
    %452 = vector.shape_cast %451 : vector<1x32x512xbf16> to vector<32x512xbf16>
    %cst_285 = arith.constant dense<0.000000e+00> : vector<16x512xf32>
    %453 = tpu.matmul %241, %452, %cst_285 {dimension_numbers = #tpu.dot_dimension_numbers<[1], [0], [0], [1], [0, 0, 1, 1], [], []>} : vector<16x32xbf16>, vector<32x512xbf16>, vector<16x512xf32> -> vector<16x512xf32>
    %c0_286 = arith.constant 0 : index
    %c0_287 = arith.constant 0 : index
    %c2048_288 = arith.constant 2048 : index
    %454 = vector.load %arg8[%c0_286, %c0_287, %c2048_288] : memref<1x1x3072xf32, #tpu.memory_space<vmem>>, vector<1x1x512xf32>
    %455 = vector.shape_cast %454 : vector<1x1x512xf32> to vector<1x512xf32>
    %456 = vector.broadcast %455 : vector<1x512xf32> to vector<16x512xf32>
    %457 = arith.addf %453, %456 : vector<16x512xf32>
    %cst_289 = arith.constant 5.000000e-01 : f32
    %458 = vector.broadcast %cst_289 : f32 to vector<16x512xf32>
    %459 = arith.mulf %458, %457 : vector<16x512xf32>
    %cst_290 = arith.constant 0.707106769 : f32
    %460 = vector.broadcast %cst_290 : f32 to vector<16x512xf32>
    %461 = arith.mulf %457, %460 : vector<16x512xf32>
    %462 = math.absf %461 : vector<16x512xf32>
    %cst_291 = arith.constant 0.327591091 : f32
    %463 = vector.broadcast %cst_291 : f32 to vector<16x512xf32>
    %464 = arith.mulf %463, %462 : vector<16x512xf32>
    %cst_292 = arith.constant 1.000000e+00 : f32
    %465 = vector.broadcast %cst_292 : f32 to vector<16x512xf32>
    %466 = arith.addf %465, %464 : vector<16x512xf32>
    %cst_293 = arith.constant 1.000000e+00 : f32
    %467 = vector.broadcast %cst_293 : f32 to vector<16x512xf32>
    %468 = arith.divf %467, %466 : vector<16x512xf32>
    %cst_294 = arith.constant 1.06140542 : f32
    %469 = vector.broadcast %cst_294 : f32 to vector<16x512xf32>
    %470 = arith.mulf %469, %468 : vector<16x512xf32>
    %cst_295 = arith.constant -1.45315206 : f32
    %471 = vector.broadcast %cst_295 : f32 to vector<16x512xf32>
    %472 = arith.addf %470, %471 : vector<16x512xf32>
    %473 = arith.mulf %472, %468 : vector<16x512xf32>
    %cst_296 = arith.constant 1.42141378 : f32
    %474 = vector.broadcast %cst_296 : f32 to vector<16x512xf32>
    %475 = arith.addf %473, %474 : vector<16x512xf32>
    %476 = arith.mulf %475, %468 : vector<16x512xf32>
    %cst_297 = arith.constant -0.284496725 : f32
    %477 = vector.broadcast %cst_297 : f32 to vector<16x512xf32>
    %478 = arith.addf %476, %477 : vector<16x512xf32>
    %479 = arith.mulf %478, %468 : vector<16x512xf32>
    %cst_298 = arith.constant 0.254829586 : f32
    %480 = vector.broadcast %cst_298 : f32 to vector<16x512xf32>
    %481 = arith.addf %479, %480 : vector<16x512xf32>
    %482 = arith.mulf %481, %468 : vector<16x512xf32>
    %cst_299 = arith.constant 0.000000e+00 : f32
    %483 = vector.broadcast %cst_299 : f32 to vector<16x512xf32>
    %484 = arith.subf %483, %462 : vector<16x512xf32>
    %485 = arith.mulf %484, %462 : vector<16x512xf32>
    %486 = math.exp %485 : vector<16x512xf32>
    %487 = arith.mulf %482, %486 : vector<16x512xf32>
    %cst_300 = arith.constant 1.000000e+00 : f32
    %488 = vector.broadcast %cst_300 : f32 to vector<16x512xf32>
    %489 = arith.subf %488, %487 : vector<16x512xf32>
    %cst_301 = arith.constant 0.000000e+00 : f32
    %490 = vector.broadcast %cst_301 : f32 to vector<16x512xf32>
    %491 = arith.cmpf olt, %461, %490 : vector<16x512xf32>
    %cst_302 = arith.constant 0.000000e+00 : f32
    %492 = vector.broadcast %cst_302 : f32 to vector<16x512xf32>
    %493 = arith.subf %492, %489 : vector<16x512xf32>
    %494 = arith.select %491, %493, %489 : vector<16x512xi1>, vector<16x512xf32>
    %cst_303 = arith.constant 1.000000e+00 : f32
    %495 = vector.broadcast %cst_303 : f32 to vector<16x512xf32>
    %496 = arith.addf %495, %494 : vector<16x512xf32>
    %497 = arith.mulf %459, %496 : vector<16x512xf32>
    %498 = arith.truncf %497 : vector<16x512xf32> to vector<16x512xbf16>
    %c0_304 = arith.constant 0 : index
    %c2048_305 = arith.constant 2048 : index
    %c0_306 = arith.constant 0 : index
    %499 = vector.load %arg9[%c0_304, %c2048_305, %c0_306] : memref<1x3072x32xbf16, #tpu.memory_space<vmem>>, vector<1x512x32xbf16>
    %500 = vector.shape_cast %499 : vector<1x512x32xbf16> to vector<512x32xbf16>
    %cst_307 = arith.constant dense<0.000000e+00> : vector<16x32xf32>
    %501 = tpu.matmul %498, %500, %cst_307 {dimension_numbers = #tpu.dot_dimension_numbers<[1], [0], [0], [1], [0, 0, 1, 1], [], []>} : vector<16x512xbf16>, vector<512x32xbf16>, vector<16x32xf32> -> vector<16x32xf32>
    %502 = arith.addf %450, %501 : vector<16x32xf32>
    %c0_308 = arith.constant 0 : index
    %c0_309 = arith.constant 0 : index
    %c2560 = arith.constant 2560 : index
    %503 = vector.load %arg7[%c0_308, %c0_309, %c2560] : memref<1x32x3072xbf16, #tpu.memory_space<vmem>>, vector<1x32x512xbf16>
    %504 = vector.shape_cast %503 : vector<1x32x512xbf16> to vector<32x512xbf16>
    %cst_310 = arith.constant dense<0.000000e+00> : vector<16x512xf32>
    %505 = tpu.matmul %241, %504, %cst_310 {dimension_numbers = #tpu.dot_dimension_numbers<[1], [0], [0], [1], [0, 0, 1, 1], [], []>} : vector<16x32xbf16>, vector<32x512xbf16>, vector<16x512xf32> -> vector<16x512xf32>
    %c0_311 = arith.constant 0 : index
    %c0_312 = arith.constant 0 : index
    %c2560_313 = arith.constant 2560 : index
    %506 = vector.load %arg8[%c0_311, %c0_312, %c2560_313] : memref<1x1x3072xf32, #tpu.memory_space<vmem>>, vector<1x1x512xf32>
    %507 = vector.shape_cast %506 : vector<1x1x512xf32> to vector<1x512xf32>
    %508 = vector.broadcast %507 : vector<1x512xf32> to vector<16x512xf32>
    %509 = arith.addf %505, %508 : vector<16x512xf32>
    %cst_314 = arith.constant 5.000000e-01 : f32
    %510 = vector.broadcast %cst_314 : f32 to vector<16x512xf32>
    %511 = arith.mulf %510, %509 : vector<16x512xf32>
    %cst_315 = arith.constant 0.707106769 : f32
    %512 = vector.broadcast %cst_315 : f32 to vector<16x512xf32>
    %513 = arith.mulf %509, %512 : vector<16x512xf32>
    %514 = math.absf %513 : vector<16x512xf32>
    %cst_316 = arith.constant 0.327591091 : f32
    %515 = vector.broadcast %cst_316 : f32 to vector<16x512xf32>
    %516 = arith.mulf %515, %514 : vector<16x512xf32>
    %cst_317 = arith.constant 1.000000e+00 : f32
    %517 = vector.broadcast %cst_317 : f32 to vector<16x512xf32>
    %518 = arith.addf %517, %516 : vector<16x512xf32>
    %cst_318 = arith.constant 1.000000e+00 : f32
    %519 = vector.broadcast %cst_318 : f32 to vector<16x512xf32>
    %520 = arith.divf %519, %518 : vector<16x512xf32>
    %cst_319 = arith.constant 1.06140542 : f32
    %521 = vector.broadcast %cst_319 : f32 to vector<16x512xf32>
    %522 = arith.mulf %521, %520 : vector<16x512xf32>
    %cst_320 = arith.constant -1.45315206 : f32
    %523 = vector.broadcast %cst_320 : f32 to vector<16x512xf32>
    %524 = arith.addf %522, %523 : vector<16x512xf32>
    %525 = arith.mulf %524, %520 : vector<16x512xf32>
    %cst_321 = arith.constant 1.42141378 : f32
    %526 = vector.broadcast %cst_321 : f32 to vector<16x512xf32>
    %527 = arith.addf %525, %526 : vector<16x512xf32>
    %528 = arith.mulf %527, %520 : vector<16x512xf32>
    %cst_322 = arith.constant -0.284496725 : f32
    %529 = vector.broadcast %cst_322 : f32 to vector<16x512xf32>
    %530 = arith.addf %528, %529 : vector<16x512xf32>
    %531 = arith.mulf %530, %520 : vector<16x512xf32>
    %cst_323 = arith.constant 0.254829586 : f32
    %532 = vector.broadcast %cst_323 : f32 to vector<16x512xf32>
    %533 = arith.addf %531, %532 : vector<16x512xf32>
    %534 = arith.mulf %533, %520 : vector<16x512xf32>
    %cst_324 = arith.constant 0.000000e+00 : f32
    %535 = vector.broadcast %cst_324 : f32 to vector<16x512xf32>
    %536 = arith.subf %535, %514 : vector<16x512xf32>
    %537 = arith.mulf %536, %514 : vector<16x512xf32>
    %538 = math.exp %537 : vector<16x512xf32>
    %539 = arith.mulf %534, %538 : vector<16x512xf32>
    %cst_325 = arith.constant 1.000000e+00 : f32
    %540 = vector.broadcast %cst_325 : f32 to vector<16x512xf32>
    %541 = arith.subf %540, %539 : vector<16x512xf32>
    %cst_326 = arith.constant 0.000000e+00 : f32
    %542 = vector.broadcast %cst_326 : f32 to vector<16x512xf32>
    %543 = arith.cmpf olt, %513, %542 : vector<16x512xf32>
    %cst_327 = arith.constant 0.000000e+00 : f32
    %544 = vector.broadcast %cst_327 : f32 to vector<16x512xf32>
    %545 = arith.subf %544, %541 : vector<16x512xf32>
    %546 = arith.select %543, %545, %541 : vector<16x512xi1>, vector<16x512xf32>
    %cst_328 = arith.constant 1.000000e+00 : f32
    %547 = vector.broadcast %cst_328 : f32 to vector<16x512xf32>
    %548 = arith.addf %547, %546 : vector<16x512xf32>
    %549 = arith.mulf %511, %548 : vector<16x512xf32>
    %550 = arith.truncf %549 : vector<16x512xf32> to vector<16x512xbf16>
    %c0_329 = arith.constant 0 : index
    %c2560_330 = arith.constant 2560 : index
    %c0_331 = arith.constant 0 : index
    %551 = vector.load %arg9[%c0_329, %c2560_330, %c0_331] : memref<1x3072x32xbf16, #tpu.memory_space<vmem>>, vector<1x512x32xbf16>
    %552 = vector.shape_cast %551 : vector<1x512x32xbf16> to vector<512x32xbf16>
    %cst_332 = arith.constant dense<0.000000e+00> : vector<16x32xf32>
    %553 = tpu.matmul %550, %552, %cst_332 {dimension_numbers = #tpu.dot_dimension_numbers<[1], [0], [0], [1], [0, 0, 1, 1], [], []>} : vector<16x512xbf16>, vector<512x32xbf16>, vector<16x32xf32> -> vector<16x32xf32>
    %554 = arith.addf %502, %553 : vector<16x32xf32>
    %555 = vector.broadcast %16 : vector<1x32xf32> to vector<16x32xf32>
    %556 = arith.addf %554, %555 : vector<16x32xf32>
    %557 = arith.addf %556, %240 : vector<16x32xf32>
    %cst_333 = arith.constant dense<0.000000e+00> : vector<16xf32>
    %558 = vector.multi_reduction <add>, %557, %cst_333 [1] : vector<16x32xf32> to vector<16xf32>
    %559 = vector.shape_cast %558 : vector<16xf32> to vector<16x1xf32>
    %cst_334 = arith.constant 3.200000e+01 : f32
    %560 = vector.broadcast %cst_334 : f32 to vector<16x1xf32>
    %561 = arith.divf %559, %560 : vector<16x1xf32>
    %562 = vector.broadcast %561 : vector<16x1xf32> to vector<16x32xf32>
    %563 = arith.subf %557, %562 : vector<16x32xf32>
    %564 = arith.mulf %563, %563 : vector<16x32xf32>
    %cst_335 = arith.constant dense<0.000000e+00> : vector<16xf32>
    %565 = vector.multi_reduction <add>, %564, %cst_335 [1] : vector<16x32xf32> to vector<16xf32>
    %566 = vector.shape_cast %565 : vector<16xf32> to vector<16x1xf32>
    %cst_336 = arith.constant 3.200000e+01 : f32
    %567 = vector.broadcast %cst_336 : f32 to vector<16x1xf32>
    %568 = arith.divf %566, %567 : vector<16x1xf32>
    %569 = vector.broadcast %561 : vector<16x1xf32> to vector<16x32xf32>
    %570 = arith.subf %557, %569 : vector<16x32xf32>
    %cst_337 = arith.constant 9.99999996E-13 : f32
    %571 = vector.broadcast %cst_337 : f32 to vector<16x1xf32>
    %572 = arith.addf %568, %571 : vector<16x1xf32>
    %573 = math.rsqrt %572 : vector<16x1xf32>
    %574 = vector.broadcast %573 : vector<16x1xf32> to vector<16x32xf32>
    %575 = arith.mulf %570, %574 : vector<16x32xf32>
    %576 = vector.broadcast %17 : vector<1x32xf32> to vector<16x32xf32>
    %577 = arith.mulf %575, %576 : vector<16x32xf32>
    %578 = vector.broadcast %18 : vector<1x32xf32> to vector<16x32xf32>
    %579 = arith.addf %577, %578 : vector<16x32xf32>
    %c0_338 = arith.constant 0 : index
    %c0_339 = arith.constant 0 : index
    %580 = vector.load %arg12[%c0_338, %c0_339] : memref<16x32xf32, #tpu.memory_space<vmem>>, vector<16x32xf32>
    tpu.vector_store %arg12[%c0_338, %c0_339], %579 {strides = array<i32>} : memref<16x32xf32, #tpu.memory_space<vmem>>, vector<16x32xf32>,
    %c3_i32 = arith.constant 3 : i32
    %581 = arith.cmpi eq, %arg0, %c3_i32 : i32
    %582 = arith.extui %581 : i1 to i32
    %c0_i32_340 = arith.constant 0 : i32
    %583 = arith.cmpi ne, %582, %c0_i32_340 : i32
    scf.if %583 {
      %584 = arith.truncf %579 : vector<16x32xf32> to vector<16x32xbf16>
      %c0_341 = arith.constant 0 : index
      %c0_342 = arith.constant 0 : index
      %585 = vector.load %arg2[%c0_341, %c0_342] : memref<32x128xbf16, #tpu.memory_space<vmem>>, vector<32x128xbf16>
      %cst_343 = arith.constant dense<0.000000e+00> : vector<16x128xf32>
      %586 = tpu.matmul %584, %585, %cst_343 {dimension_numbers = #tpu.dot_dimension_numbers<[1], [0], [0], [1], [0, 0, 1, 1], [], []>} : vector<16x32xbf16>, vector<32x128xbf16>, vector<16x128xf32> -> vector<16x128xf32>
      %c0_344 = arith.constant 0 : index
      %c0_345 = arith.constant 0 : index
      %587 = vector.load %arg3[%c0_344, %c0_345] : memref<1x128xf32, #tpu.memory_space<vmem>>, vector<1x128xf32>
      %588 = vector.broadcast %587 : vector<1x128xf32> to vector<16x128xf32>
      %589 = arith.addf %586, %588 : vector<16x128xf32>
      %c0_346 = arith.constant 0 : index
      %c0_347 = arith.constant 0 : index
      %590 = vector.load %arg11[%c0_346, %c0_347] : memref<16x128xf32, #tpu.memory_space<vmem>>, vector<16x128xf32>
      tpu.vector_store %arg11[%c0_346, %c0_347], %589 {strides = array<i32>} : memref<16x128xf32, #tpu.memory_space<vmem>>, vector<16x128xf32>,
    } else {
    }
    return
  }
  func.func @transform_0(%arg0: i32) -> (i32, i32) {
    %c0_i32 = arith.constant 0 : i32
    %c0_i32_0 = arith.constant 0 : i32
    %c0_i32_1 = arith.constant 0 : i32
    return %c0_i32, %c0_i32_0 : i32, i32
  }
  func.func @transform_1(%arg0: i32) -> (i32, i32) {
    %c0_i32 = arith.constant 0 : i32
    %c0_i32_0 = arith.constant 0 : i32
    %c0_i32_1 = arith.constant 0 : i32
    return %c0_i32, %c0_i32_0 : i32, i32
  }
  func.func @transform_2(%arg0: i32) -> (i32, i32) {
    %c0_i32 = arith.constant 0 : i32
    %c0_i32_0 = arith.constant 0 : i32
    %c0_i32_1 = arith.constant 0 : i32
    return %c0_i32, %c0_i32_0 : i32, i32
  }
  func.func @transform_3(%arg0: i32) -> (i32, i32, i32, i32, i32) {
    %c0_i32 = arith.constant 0 : i32
    %c0_i32_0 = arith.constant 0 : i32
    %c0_i32_1 = arith.constant 0 : i32
    %c0_i32_2 = arith.constant 0 : i32
    %c0_i32_3 = arith.constant 0 : i32
    return %arg0, %c0_i32, %c0_i32_0, %c0_i32_1, %c0_i32_2 : i32, i32, i32, i32, i32
  }
  func.func @transform_4(%arg0: i32) -> (i32, i32, i32, i32, i32) {
    %c0_i32 = arith.constant 0 : i32
    %c0_i32_0 = arith.constant 0 : i32
    %c0_i32_1 = arith.constant 0 : i32
    %c0_i32_2 = arith.constant 0 : i32
    %c0_i32_3 = arith.constant 0 : i32
    return %arg0, %c0_i32, %c0_i32_0, %c0_i32_1, %c0_i32_2 : i32, i32, i32, i32, i32
  }
  func.func @transform_5(%arg0: i32) -> (i32, i32, i32, i32) {
    %c0_i32 = arith.constant 0 : i32
    %c0_i32_0 = arith.constant 0 : i32
    %c0_i32_1 = arith.constant 0 : i32
    %c0_i32_2 = arith.constant 0 : i32
    return %arg0, %c0_i32, %c0_i32_0, %c0_i32_1 : i32, i32, i32, i32
  }
  func.func @transform_6(%arg0: i32) -> (i32, i32, i32) {
    %c0_i32 = arith.constant 0 : i32
    %c0_i32_0 = arith.constant 0 : i32
    %c0_i32_1 = arith.constant 0 : i32
    return %arg0, %c0_i32, %c0_i32_0 : i32, i32, i32
  }
  func.func @transform_7(%arg0: i32) -> (i32, i32, i32) {
    %c0_i32 = arith.constant 0 : i32
    %c0_i32_0 = arith.constant 0 : i32
    %c0_i32_1 = arith.constant 0 : i32
    return %arg0, %c0_i32, %c0_i32_0 : i32, i32, i32
  }
  func.func @transform_8(%arg0: i32) -> (i32, i32, i32) {
    %c0_i32 = arith.constant 0 : i32
    %c0_i32_0 = arith.constant 0 : i32
    %c0_i32_1 = arith.constant 0 : i32
    return %arg0, %c0_i32, %c0_i32_0 : i32, i32, i32
  }
  func.func @transform_9(%arg0: i32) -> (i32, i32, i32) {
    %c0_i32 = arith.constant 0 : i32
    %c0_i32_0 = arith.constant 0 : i32
    %c0_i32_1 = arith.constant 0 : i32
    return %arg0, %c0_i32, %c0_i32_0 : i32, i32, i32
  }
  func.func @transform_10(%arg0: i32) -> (i32, i32) {
    %c0_i32 = arith.constant 0 : i32
    %c0_i32_0 = arith.constant 0 : i32
    %c0_i32_1 = arith.constant 0 : i32
    return %c0_i32, %c0_i32_0 : i32, i32
  }
}

</mosaic_0001>

<bundles_post_ra>
// kernel: bert_sequence_forward.1
= control target key start
LH: loop header
LB: loop body
LE: loop exit
PB: predicated region body
PF: predicated region fallthrough
CT: control target
= control target key end

     0   :  { %s8417_s13 = smov 0   ;;  %s10107_s0 = inlined_call_operand.vmem [shape: f32[16,32], index: 0, kind: input, shape index: {}]   ;;  %s10108_s1 = inlined_call_operand.vmem [shape: bf16[32,128], index: 1, kind: input, shape index: {}]   ;;  %s10109_s2 = inlined_call_operand.vmem [shape: f32[1,128], index: 2, kind: input, shape index: {}]   ;;  %s10110_s3 = inlined_call_operand.vmem [shape: bf16[4,3,4,32,8], index: 3, kind: input, shape index: {}]   ;;  %s10111_s4 = inlined_call_operand.vmem [shape: f32[4,3,4,1,8], index: 4, kind: input, shape index: {}]   ;;  %s10112_s5 = inlined_call_operand.vmem [shape: bf16[4,4,8,32], index: 5, kind: input, shape index: {}]   ;;  %s10113_s6 = inlined_call_operand.vmem [shape: bf16[4,32,3072], index: 6, kind: input, shape index: {}]   ;;  %s10114_s7 = inlined_call_operand.vmem [shape: f32[4,1,3072], index: 7, kind: input, shape index: {}]   ;;  %s10115_s8 = inlined_call_operand.vmem [shape: bf16[4,3072,32], index: 8, kind: input, shape index: {}]   ;;  %s10116_s9 = inlined_call_operand.vmem [shape: f32[4,8,32], index: 9, kind: input, shape index: {}]   ;;  %s10117_s10 = inlined_call_operand.vmem [shape: f32[16,128], index: 10, kind: output, shape index: {}]  }
   0x1   :  { %10147 = sst [smem:[#allocation30_spill]] %s10110_s3 }
   0x2   :  { %10148 = sst [smem:[#allocation31_spill]] %s10112_s5 }
   0x3 LB: > { %s8423_s14 = sadd.s32 4294967295, %s8354_s13   ;;  %p6915_p0 = scmp.ge.s32.totalorder %s8354_s13, 1  ;;  %s8354_s13 = sphi %s8417_s13, %s20_s13  }
   0x4   : > { %p364_p1 = scmp.lt.s32.totalorder %s8354_s13, 5 }
   0x6   : > { %p365_p2 = pnand %p6915_p0, %p364_p1 }
   0x8   : > { %368 = sbr.rel (%p365_p2) target bundleno = 6167 (0x1817), region = 60 }
   0xd   : > { %p424_p3 = scmp.lt.s32.totalorder %s8423_s14, 3  ;;  %s10149_s5 = sld [smem:[#allocation31_spill]] }
   0xe   : > { %s10150_s3 = sld [smem:[#allocation30_spill]]  ;;  %p6922_p4 = scmp.ne.s32.totalorder %s8423_s14, 0 }
   0xf   : > { %s425_s15 = scalar_select %p424_p3, %s8423_s14, 3 }
  0x11   : > { %s7876_s16 = smul.u32 192, %s425_s15  ;;  %s7308_s17 = sshll.u32 %s425_s15, 4 }
  0x12   : > { %s7877_s18 = smul.u32 12, %s425_s15 }
  0x13   : > { %s8432_s21 = scalar_lea.vmem %s10149_s5, %s7308_s17  ;;  %s7878_s25 = smul.u32 384, %s425_s15 }
  0x14   : > { %s8437_s24 = scalar_lea.vmem %s10150_s3, %s7876_s16  ;;  %s8442_s28 = scalar_lea.vmem %s10111_s4, %s7877_s18 }
  0x15   : > { %s7879_s29 = smul.u32 24, %s425_s15  ;;  %s8447_s12 = scalar_lea.vmem %s10113_s6, %s7878_s25 }
  0x16   : > { %s7880_s19 = smul.u32 1536, %s425_s15  ;;  %s6921_s16 = sshll.u32 %s425_s15, 3 }
  0x17   : > { %s8452_s5 = scalar_lea.vmem %s10114_s7, %s7879_s29  ;;  %s8462_s27 = scalar_lea.vmem %s10116_s9, %s6921_s16 }
  0x18   : > { %s8457_s3 = scalar_lea.vmem %s10115_s8, %s7880_s19  ;;  %460 = sbr.rel (%p6922_p4) target bundleno = 31 (0x1f), region = 64 }
  0x1d   : > { %v461_v0 = vld [vmem:[%s10107_s0] sm:$0xff]  ;;  %vm463_vm0 = vcmask 261120   ;;  %v462_v1 = vld [vmem:[%s10107_s0 + $0x8] sm:$0xff] }
  0x1e   : > { %464 = vst.msk [vmem:[#allocation2] sm:$0xff] %vm463_vm0, %v461_v0  ;;  %465 = vst.msk [vmem:[#allocation2 + $0x8] sm:$0xff] %vm463_vm0, %v462_v1 }
  0x1f PF: > { %v7895_v2 = vld [vmem:[%s8437_s24 + $0x48] sm:$0xff]   ;;  %v8356_v3 = vmov 0.0   ;;  %v7897_v5 = vld [vmem:[%s8437_s24 + $0x40] sm:$0xff]   ;;  %vm8357_vm1 = vmmov 0   ;;  %vm499_vm2 = vcmask 261120   ;;  %vm682_vm3 = vcmask 64512  }
  0x20   : > { %7660 = vmatprep.subr.bf16.mxu1 %v8356_v3  ;;  %7652 = vmatprep.subr.bf16.mxu0 %v8356_v3  ;;  %v7896_v4 = vld [vmem:[%s8437_s24 + $0x8] sm:$0xff]   ;;  %v7898_v6 = vld [vmem:[%s8437_s24] sm:$0xff]   ;;  %vm806_vm4 = vcmask 1043456   ;;  %v469_v43 = vlaneseq  ;;  %v8358_v54 = vmov -1e+09   ;;  %p7301_p5 = scmp.ne.s32.totalorder %s8423_s14, 3 }
  0x21   : > { %7661 = vmatpush3.bf16.msra.mxu1 %v7895_v2  ;;  %7664 = vmatprep.mubr.msk.bf16.mxu1 %vm8357_vm1, %v8356_v3  ;;  %v7899_v10 = vld [vmem:[%s8437_s24 + $0x88] sm:$0xff]   ;;  %v7900_v11 = vld [vmem:[%s8437_s24 + $0x80] sm:$0xff]  }
  0x22   : > { %7653 = vmatpush3.bf16.msra.mxu0 %v7896_v4  ;;  %7662 = vmatprep.subr.bf16.mxu1 %v8356_v3  ;;  %v6932_v12 = vld [vmem:[%s8442_s28 + $0x4] ss:$0 sm:$0xff]  ;;  %v6923_v16 = vld [vmem:[%s8442_s28] ss:$0 sm:$0xff]  ;;  %v6941_v32 = vld [vmem:[%s8442_s28 + $0x8] ss:$0 sm:$0xff] }
  0x23   : > { %7654 = vmatprep.subr.bf16.mxu0 %v8356_v3  ;;  %7656 = vmatprep.mubr.msk.bf16.mxu0 %vm8357_vm1, %v8356_v3  ;;  %v8520_v44 = vshrl.u32 %v469_v43, 7  ;;  %v472_v45 = vand.u32 127, %v469_v43 }
  0x25   : > { %v466_v7 = vld [vmem:[#allocation2] sm:$0xff]  ;;  %v467_v8 = vld [vmem:[#allocation2 + $0x8] sm:$0xff]  ;;  %7663 = vmatpush3.bf16.msra.mxu1 %v7897_v5  ;;  %10151 = vst [vmem:[#allocation3_spill] sm:$0xff] %v8520_v44  ;;  %vm473_vm5 = vcmp.le.s32.totalorder %v472_v45, %v8520_v44 }
  0x26   : > { %v8483_v9 = vpack.c.bf16 %v467_v8, %v466_v7  ;;  %7655 = vmatpush3.bf16.msra.mxu0 %v7898_v6  ;;  %7676 = vmatprep.subr.bf16.mxu1 %v8356_v3  ;;  %v8523_v55 = vsel %vm473_vm5, 0.0, %v8358_v54  ;;  %v6972_v54 = vld [vmem:[%s8442_s28 + $0x9] ss:$0 sm:$0xff] }
  0x27   : > { %7668 = vmatprep.subr.bf16.mxu0 %v8356_v3 }
  0x28   : > { %7665 = vmatmul.mubr.msk.bf16.vlgmr.msra.gmra.mxu1 %vm499_vm2, %v8483_v9 }
  0x29   : > { %7657 = vmatmul.mubr.msk.bf16.vlgmr.msra.gmra.mxu0 %vm499_vm2, %v8483_v9  ;;  %7678 = vmatprep.mubr.msk.bf16.mxu1 %vm8357_vm1, %v8356_v3 }
  0x2a   : > { %7669 = vmatpush3.bf16.msra.mxu0 %v7899_v10  ;;  %7672 = vmatprep.mubr.msk.bf16.mxu0 %vm8357_vm1, %v8356_v3 }
  0x2b   : > { %7670 = vmatprep.subr.bf16.mxu0 %v8356_v3 }
  0x2e   : > { %7671 = vmatpush3.bf16.msra.mxu0 %v7900_v11 }
  0x2f   : > { %7682 = vmatprep.subr.bf16.mxu0 %v8356_v3 }
  0x31   : > { %7673 = vmatmul.mubr.msk.bf16.vlgmr.msra.gmra.mxu0 %vm499_vm2, %v8483_v9 }
  0x32   : > { %7684 = vmatprep.mubr.msk.bf16.mxu0 %vm8357_vm1, %v8356_v3 }
  0xe8   : > { %v603_v13 = vpop.f32.mrf.mxu1 }
  0xe9   : > { %v604_v14 = vadd.f32 %v6932_v12, %v603_v13  ;;  %v537_v15 = vpop.f32.mrf.mxu0 }
  0xea   : > { %v7666_v17 = vpop.f32.mrf.mxu1  ;;  %v538_v22 = vadd.f32 %v6923_v16, %v537_v15 }
  0xeb   : > { %v678_v18 = vpack.c.bf16 %v604_v14, %v604_v14  ;;  %v7658_v19 = vpop.f32.mrf.mxu0  ;;  %v7901_v14 = vld [vmem:[%s8437_s24 + $0x58] sm:$0xff]  }
  0xec   : > { %v606_v20 = vpop.f32.mrf.mxu1  ;;  %v676_v28 = vpack.c.bf16 %v538_v22, %v538_v22  ;;  %v7903_v19 = vld [vmem:[%s8437_s24 + $0x50] sm:$0xff]   ;;  %v7905_v22 = vld [vmem:[%s8437_s24 + $0x98] sm:$0xff]  }
  0xed   : > { %v687_v21 = vsel %vm682_vm3, %v678_v18, 0  ;;  %v607_v23 = vadd.f32 %v6932_v12, %v606_v20  ;;  %v540_v24 = vpop.f32.mrf.mxu0  ;;  %v7902_v18 = vld [vmem:[%s8437_s24 + $0x18] sm:$0xff]  }
  0xee   : > { %v7667_v25 = vpop.f32.mrf.mxu1  ;;  %7677 = vmatpush3.bf16.xpose.msra.mxu1 %v687_v21  ;;  %v541_v30 = vadd.f32 %v6923_v16, %v540_v24  ;;  %v7904_v21 = vld [vmem:[%s8437_s24 + $0x10] sm:$0xff]  }
  0xef   : > { %v679_v26 = vpack.c.bf16 %v607_v23, %v607_v23  ;;  %v7659_v27 = vpop.f32.mrf.mxu0  ;;  %7688 = vmatprep.subr.bf16.mxu1 %v8356_v3  ;;  %v7906_v23 = vld [vmem:[%s8437_s24 + $0x90] sm:$0xff]  }
  0xf0   : > { %v677_v31 = vpack.c.bf16 %v541_v30, %v541_v30 }
  0xf1   : > { %v733_v29 = vsel %vm682_vm3, %v679_v26, 0  ;;  %v669_v33 = vpop.f32.mrf.mxu0 }
  0xf2   : > { %7683 = vmatpush3.bf16.xpose.msra.mxu0 %v733_v29  ;;  %v670_v34 = vadd.f32 %v6941_v32, %v669_v33 }
  0xf3   : > { %7694 = vmatprep.subr.bf16.mxu0 %v8356_v3  ;;  %v7674_v35 = vpop.f32.mrf.mxu0 }
  0xf4   : > { %v680_v36 = vpack.c.bf16 %v670_v34, %v670_v34 }
  0xf5   : > { %7679 = vmatmul.mubr.msk.bf16.vlgmr.msra.gmra.mxu1 %vm682_vm3, %v676_v28  ;;  %v672_v37 = vpop.f32.mrf.mxu0 }
  0xf6   : > { %7690 = vmatprep.mubr.msk.bf16.mxu1 %vm8357_vm1, %v8356_v3  ;;  %v808_v38 = vsel %vm806_vm4, %v680_v36, 0  ;;  %v673_v39 = vadd.f32 %v6941_v32, %v672_v37  ;;  %v6954_v37 = vld [vmem:[%s8442_s28 + $0x1] ss:$0 sm:$0xff] }
  0xf7   : > { %v7675_v40 = vpop.f32.mrf.mxu0  ;;  %7689 = vmatpush3.bf16.msra.mxu1 %v808_v38 }
  0xf8   : > { %v681_v41 = vpack.c.bf16 %v673_v39, %v673_v39  ;;  %7700 = vmatprep.subr.bf16.mxu1 %v8356_v3 }
  0xf9   : > { %7685 = vmatmul.mubr.msk.bf16.vlgmr.msra.gmra.mxu0 %vm682_vm3, %v677_v31  ;;  %v6963_v31 = vld [vmem:[%s8442_s28 + $0x5] ss:$0 sm:$0xff] }
  0xfa   : > { %7696 = vmatprep.mubr.msk.bf16.mxu0 %vm8357_vm1, %v8356_v3  ;;  %v854_v42 = vsel %vm806_vm4, %v681_v41, 0 }
  0xfb   : > { %7695 = vmatpush3.bf16.msra.mxu0 %v854_v42 }
  0xfc   : > { %7708 = vmatprep.subr.bf16.mxu0 %v8356_v3 }
 0x1b5   : > { %v723_v46 = vpop.f32.mrf.mxu1 }
 0x1b6   : > { %v775_v50 = vmul.f32 0.35355338, %v723_v46 }
 0x1b7   : > { %v7680_v47 = vpop.f32.mrf.mxu1 }
 0x1b8   : > { %v777_v59 = vadd.f32 %v775_v50, %v8523_v55 }
 0x1b9   : > { %v726_v48 = vpop.f32.mrf.mxu1  ;;  %v769_v49 = vpop.f32.mrf.mxu0 }
 0x1ba   : > { %v776_v51 = vmul.f32 0.35355338, %v769_v49  ;;  %v779_v61 = vsel %vm682_vm3, %v777_v59, -inf }
 0x1bb   : > { %v7681_v52 = vpop.f32.mrf.mxu1  ;;  %v7686_v53 = vpop.f32.mrf.mxu0 }
 0x1bc   : > { %v778_v56 = vadd.f32 %v776_v51, %v8523_v55 }
 0x1bd   : > { %v772_v57 = vpop.f32.mrf.mxu0 }
 0x1be   : > { %v782_v58 = vsel %vm682_vm3, %v778_v56, -inf }
 0x1bf   : > { %783 = vmax.xlane.f32.xlu0 %v782_v58  ;;  %v7687_v60 = vpop.f32.mrf.mxu0 }
 0x1c3   : > { %780 = vmax.xlane.f32.xlu0 %v779_v61 }
 0x248   : > { %v784_v62 = vpop.xlane.xlu0 %783 }
 0x249   : > { %v786_v63 = vsub.f32 %v778_v56, %v784_v62 }
 0x24b   : > { %v789_v0 = vmul.f32 1.442695, %v786_v63 }
 0x24c   : > { %v781_v1 = vpop.xlane.xlu0 %780 }
 0x24d   : > { %8111 = vpow2.f32 %v789_v0  ;;  %v785_v2 = vsub.f32 %v777_v59, %v781_v1 }
 0x24f   : > { %v787_v4 = vmul.f32 1.442695, %v785_v2 }
 0x251   : > { %8113 = vpow2.f32 %v787_v4 }
 0x25a   : > { %v8112_v5 = vpop.eup %8111 }
 0x25b   : > { %v794_v6 = vsel %vm682_vm3, %v8112_v5, 0.0 }
 0x25c   : > { %795 = vadd.xlane.f32.xlu1 %v794_v6 }
 0x25e   : > { %v8114_v7 = vpop.eup %8113 }
 0x25f   : > { %v791_v8 = vsel %vm682_vm3, %v8114_v7, 0.0 }
 0x260   : > { %792 = vadd.xlane.f32.xlu1 %v791_v8 }
 0x2e5   : > { %v796_v10 = vpop.xlane.xlu1 %795 }
 0x2e6   : > { %8115 = vrcp.f32 %v796_v10 }
 0x2e9   : > { %v793_v11 = vpop.xlane.xlu1 %792 }
 0x2ea   : > { %8117 = vrcp.f32 %v793_v11 }
 0x2f3   : > { %v8116_v12 = vpop.eup %8115 }
 0x2f4   : > { %v800_v13 = vmul.f32 %v8116_v12, %v8112_v5 }
 0x2f6   : > { %v802_v15 = vpack.c.bf16 %v800_v13, %v800_v13 }
 0x2f7   : > { %v8118_v16 = vpop.eup %8117 }
 0x2f8   : > { %7697 = vmatmul.mubr.msk.bf16.vlgmr.msra.gmra.mxu0 %vm682_vm3, %v802_v15  ;;  %v799_v17 = vmul.f32 %v8118_v16, %v8114_v7 }
 0x2f9   : > { %7709 = vmatpush3.bf16.msra.mxu0 %v7901_v14  ;;  %7712 = vmatprep.mubr.msk.bf16.mxu0 %vm8357_vm1, %v8356_v3 }
 0x2fa   : > { %v801_v20 = vpack.c.bf16 %v799_v17, %v799_v17  ;;  %7710 = vmatprep.subr.bf16.mxu0 %v8356_v3 }
 0x2fc   : > { %7691 = vmatmul.mubr.msk.bf16.vlgmr.msra.gmra.mxu1 %vm682_vm3, %v801_v20 }
 0x2fd   : > { %7701 = vmatpush3.bf16.msra.mxu1 %v7902_v18  ;;  %7711 = vmatpush3.bf16.msra.mxu0 %v7903_v19 }
 0x2fe   : > { %7702 = vmatprep.subr.bf16.mxu1 %v8356_v3  ;;  %7704 = vmatprep.mubr.msk.bf16.mxu1 %vm8357_vm1, %v8356_v3 }
 0x2ff   : > { %7724 = vmatprep.subr.bf16.mxu0 %v8356_v3 }
 0x300   : > { %7713 = vmatmul.mubr.msk.bf16.vlgmr.msra.gmra.mxu0 %vm499_vm2, %v8483_v9 }
 0x301   : > { %7703 = vmatpush3.bf16.msra.mxu1 %v7904_v21  ;;  %7726 = vmatprep.mubr.msk.bf16.mxu0 %vm8357_vm1, %v8356_v3 }
 0x302   : > { %7716 = vmatprep.subr.bf16.mxu1 %v8356_v3 }
 0x304   : > { %7705 = vmatmul.mubr.msk.bf16.vlgmr.msra.gmra.mxu1 %vm499_vm2, %v8483_v9 }
 0x305   : > { %7720 = vmatprep.mubr.msk.bf16.mxu1 %vm8357_vm1, %v8356_v3  ;;  %7717 = vmatpush3.bf16.msra.mxu1 %v7905_v22 }
 0x306   : > { %7718 = vmatprep.subr.bf16.mxu1 %v8356_v3 }
 0x309   : > { %7719 = vmatpush3.bf16.msra.mxu1 %v7906_v23 }
 0x30a   : > { %7730 = vmatprep.subr.bf16.mxu1 %v8356_v3 }
 0x30c   : > { %7721 = vmatmul.mubr.msk.bf16.vlgmr.msra.gmra.mxu1 %vm499_vm2, %v8483_v9 }
 0x30d   : > { %7732 = vmatprep.mubr.msk.bf16.mxu1 %vm8357_vm1, %v8356_v3 }
 0x3b8   : > { %v8561_v24 = vpop.f32.mrf.mxu0 }
 0x3ba   : > { %v7698_v25 = vpop.f32.mrf.mxu0 }
 0x3bc   : > { %v8563_v26 = vpop.f32.mrf.mxu1  ;;  %v893_v27 = vpop.f32.mrf.mxu0 }
 0x3bd   : > { %v896_v28 = vpack.c.bf16 %v8561_v24, %v8563_v26  ;;  %v6980_v24 = vld [vmem:[%s8432_s21 + $0x4] sm:$0xf] }
 0x3be   : > { %v7692_v29 = vpop.f32.mrf.mxu1  ;;  %v7699_v30 = vpop.f32.mrf.mxu0  ;;  %v1321_v26 = vsel %vm806_vm4, %v6980_v24, 0 }
 0x3c0   : > { %v847_v32 = vpop.f32.mrf.mxu1  ;;  %v1023_v33 = vpop.f32.mrf.mxu0 }
 0x3c1   : > { %v1024_v34 = vadd.f32 %v6963_v31, %v1023_v33 }
 0x3c2   : > { %v7693_v35 = vpop.f32.mrf.mxu1  ;;  %v7714_v36 = vpop.f32.mrf.mxu0 }
 0x3c3   : > { %v1098_v38 = vpack.c.bf16 %v1024_v34, %v1024_v34 }
 0x3c4   : > { %v957_v39 = vpop.f32.mrf.mxu1  ;;  %v1026_v40 = vpop.f32.mrf.mxu0 }
 0x3c5   : > { %v1106_v41 = vsel %vm682_vm3, %v1098_v38, 0  ;;  %v958_v42 = vadd.f32 %v6954_v37, %v957_v39  ;;  %v1027_v43 = vadd.f32 %v6963_v31, %v1026_v40 }
 0x3c6   : > { %v7706_v45 = vpop.f32.mrf.mxu1  ;;  %v7715_v46 = vpop.f32.mrf.mxu0  ;;  %7725 = vmatpush3.bf16.xpose.msra.mxu0 %v1106_v41  ;;  %v7907_v41 = vld [vmem:[%s8437_s24 + $0x68] sm:$0xff]  }
 0x3c7   : > { %v1099_v47 = vpack.c.bf16 %v1027_v43, %v1027_v43  ;;  %7736 = vmatprep.subr.bf16.mxu0 %v8356_v3  ;;  %v1096_v49 = vpack.c.bf16 %v958_v42, %v958_v42  ;;  %v7908_v42 = vld [vmem:[%s8437_s24 + $0x60] sm:$0xff]  }
 0x3c8   : > { %v960_v48 = vpop.f32.mrf.mxu1 }
 0x3c9   : > { %v1152_v50 = vsel %vm682_vm3, %v1099_v47, 0  ;;  %v961_v52 = vadd.f32 %v6954_v37, %v960_v48  ;;  %v897_v37 = vld [vmem:[%s8432_s21] sm:$0xf]  ;;  %v7909_v47 = vld [vmem:[%s8437_s24 + $0x28] sm:$0xff]  }
 0x3ca   : > { %v7707_v51 = vpop.f32.mrf.mxu1  ;;  %7731 = vmatpush3.bf16.xpose.msra.mxu1 %v1152_v50  ;;  %v1368_v40 = vsel %vm806_vm4, %v897_v37, 0 }
 0x3cb   : > { %7742 = vmatprep.subr.bf16.mxu1 %v8356_v3  ;;  %v1097_v53 = vpack.c.bf16 %v961_v52, %v961_v52  ;;  %v7910_v52 = vld [vmem:[%s8437_s24 + $0x20] sm:$0xff]  }
 0x3cc   : > { %v1089_v56 = vpop.f32.mrf.mxu1 }
 0x3cd   : > { %7727 = vmatmul.mubr.msk.bf16.vlgmr.msra.gmra.mxu0 %vm682_vm3, %v1096_v49  ;;  %v1090_v57 = vadd.f32 %v6972_v54, %v1089_v56  ;;  %v7911_v56 = vld [vmem:[%s8437_s24 + $0xa8] sm:$0xff]  }
 0x3ce   : > { %7738 = vmatprep.mubr.msk.bf16.mxu0 %vm8357_vm1, %v8356_v3  ;;  %v7722_v58 = vpop.f32.mrf.mxu1 }
 0x3cf   : > { %v1100_v59 = vpack.c.bf16 %v1090_v57, %v1090_v57 }
 0x3d0   : > { %v1092_v60 = vpop.f32.mrf.mxu1 }
 0x3d1   : > { %7733 = vmatmul.mubr.msk.bf16.vlgmr.msra.gmra.mxu1 %vm682_vm3, %v1097_v53  ;;  %v1226_v61 = vsel %vm806_vm4, %v1100_v59, 0  ;;  %v1093_v62 = vadd.f32 %v6972_v54, %v1092_v60  ;;  %v6997_v60 = vld [vmem:[%s8442_s28 + $0x6] ss:$0 sm:$0xff] }
 0x3d2   : > { %7744 = vmatprep.mubr.msk.bf16.mxu1 %vm8357_vm1, %v8356_v3  ;;  %v7723_v63 = vpop.f32.mrf.mxu1  ;;  %7737 = vmatpush3.bf16.msra.mxu0 %v1226_v61 }
 0x3d3   : > { %v1101_v0 = vpack.c.bf16 %v1093_v62, %v1093_v62  ;;  %7748 = vmatprep.subr.bf16.mxu0 %v8356_v3 }
 0x3d5   : > { %v1272_v1 = vsel %vm806_vm4, %v1101_v0, 0 }
 0x3d6   : > { %7743 = vmatpush3.bf16.msra.mxu1 %v1272_v1 }
 0x3d7   : > { %7754 = vmatprep.subr.bf16.mxu1 %v8356_v3 }
 0x48d   : > { %v1142_v2 = vpop.f32.mrf.mxu0 }
 0x48e   : > { %v1194_v4 = vmul.f32 0.35355338, %v1142_v2 }
 0x48f   : > { %v7728_v5 = vpop.f32.mrf.mxu0 }
 0x490   : > { %v1196_v6 = vadd.f32 %v1194_v4, %v8523_v55 }
 0x491   : > { %v1145_v7 = vpop.f32.mrf.mxu0  ;;  %v1188_v8 = vpop.f32.mrf.mxu1 }
 0x492   : > { %v1195_v10 = vmul.f32 0.35355338, %v1188_v8  ;;  %v1198_v11 = vsel %vm682_vm3, %v1196_v6, -inf  ;;  %v7912_v7 = vld [vmem:[%s8437_s24 + $0xa0] sm:$0xff]  }
 0x493   : > { %v7734_v12 = vpop.f32.mrf.mxu1  ;;  %1199 = vmax.xlane.f32.xlu0 %v1198_v11  ;;  %v7729_v13 = vpop.f32.mrf.mxu0 }
 0x494   : > { %v1197_v14 = vadd.f32 %v1195_v10, %v8523_v55 }
 0x495   : > { %v1191_v15 = vpop.f32.mrf.mxu1 }
 0x496   : > { %v1201_v16 = vsel %vm682_vm3, %v1197_v14, -inf }
 0x497   : > { %1202 = vmax.xlane.f32.xlu1 %v1201_v16  ;;  %v7735_v17 = vpop.f32.mrf.mxu1 }
 0x51c   : > { %v1200_v18 = vpop.xlane.xlu0 %1199 }
 0x51d   : > { %v1204_v19 = vsub.f32 %v1196_v6, %v1200_v18 }
 0x51f   : > { %v1206_v20 = vmul.f32 1.442695, %v1204_v19 }
 0x520   : > { %v1203_v21 = vpop.xlane.xlu1 %1202 }
 0x521   : > { %8119 = vpow2.f32 %v1206_v20  ;;  %v1205_v22 = vsub.f32 %v1197_v14, %v1203_v21  ;;  %v6988_v14 = vld [vmem:[%s8442_s28 + $0x2] ss:$0 sm:$0xff] }
 0x523   : > { %v1208_v23 = vmul.f32 1.442695, %v1205_v22 }
 0x525   : > { %8121 = vpow2.f32 %v1208_v23  ;;  %v7006_v23 = vld [vmem:[%s8442_s28 + $0xa] ss:$0 sm:$0xff] }
 0x52e   : > { %v8120_v25 = vpop.eup %8119 }
 0x52f   : > { %v1210_v27 = vsel %vm682_vm3, %v8120_v25, 0.0 }
 0x530   : > { %1211 = vadd.xlane.f32.xlu0 %v1210_v27 }
 0x532   : > { %v8122_v29 = vpop.eup %8121 }
 0x533   : > { %v1213_v30 = vsel %vm682_vm3, %v8122_v29, 0.0 }
 0x534   : > { %1214 = vadd.xlane.f32.xlu1 %v1213_v30 }
 0x5b9   : > { %v1212_v31 = vpop.xlane.xlu0 %1211 }
 0x5ba   : > { %8123 = vrcp.f32 %v1212_v31 }
 0x5bd   : > { %v1215_v32 = vpop.xlane.xlu1 %1214 }
 0x5be   : > { %8125 = vrcp.f32 %v1215_v32 }
 0x5c7   : > { %v8124_v33 = vpop.eup %8123 }
 0x5c8   : > { %v1218_v34 = vmul.f32 %v8124_v33, %v8120_v25 }
 0x5ca   : > { %v1220_v35 = vpack.c.bf16 %v1218_v34, %v1218_v34 }
 0x5cb   : > { %v8126_v36 = vpop.eup %8125 }
 0x5cc   : > { %7739 = vmatmul.mubr.msk.bf16.vlgmr.msra.gmra.mxu0 %vm682_vm3, %v1220_v35  ;;  %v1219_v38 = vmul.f32 %v8126_v36, %v8122_v29 }
 0x5cd   : > { %7750 = vmatprep.mubr.msk.bf16.mxu0 %vm8357_vm1, %v8356_v3  ;;  %7749 = vmatpush3.bf16.msra.mxu0 %v1321_v26 }
 0x5ce   : > { %v1221_v39 = vpack.c.bf16 %v1219_v38, %v1219_v38  ;;  %7760 = vmatprep.subr.bf16.mxu0 %v8356_v3 }
 0x5d0   : > { %7745 = vmatmul.mubr.msk.bf16.vlgmr.msra.gmra.mxu1 %vm682_vm3, %v1221_v39 }
 0x5d1   : > { %7755 = vmatpush3.bf16.msra.mxu1 %v1368_v40  ;;  %7756 = vmatprep.mubr.msk.bf16.mxu1 %vm8357_vm1, %v8356_v3 }
 0x5d2   : > { %7768 = vmatprep.subr.bf16.mxu1 %v8356_v3 }
 0x5d8   : > { %7757 = vmatmul.mubr.msk.bf16.vlgmr.msra.gmra.mxu1 %vm682_vm3, %v896_v28 }
 0x5d9   : > { %7769 = vmatpush3.bf16.msra.mxu1 %v7907_v41  ;;  %7772 = vmatprep.mubr.msk.bf16.mxu1 %vm8357_vm1, %v8356_v3 }
 0x5da   : > { %7770 = vmatprep.subr.bf16.mxu1 %v8356_v3 }
 0x5dd   : > { %7771 = vmatpush3.bf16.msra.mxu1 %v7908_v42 }
 0x5de   : > { %7784 = vmatprep.subr.bf16.mxu1 %v8356_v3 }
 0x5e0   : > { %7773 = vmatmul.mubr.msk.bf16.vlgmr.msra.gmra.mxu1 %vm499_vm2, %v8483_v9 }
 0x5e1   : > { %7786 = vmatprep.mubr.msk.bf16.mxu1 %vm8357_vm1, %v8356_v3 }
 0x68c   : > { %v1262_v28 = vpop.f32.mrf.mxu0 }
 0x68e   : > { %v7740_v43 = vpop.f32.mrf.mxu0 }
 0x690   : > { %v1265_v45 = vpop.f32.mrf.mxu0  ;;  %v1308_v46 = vpop.f32.mrf.mxu1 }
 0x691   : > { %v1314_v48 = vpack.c.bf16 %v1308_v46, %v1262_v28 }
 0x692   : > { %v7741_v49 = vpop.f32.mrf.mxu0  ;;  %v7746_v50 = vpop.f32.mrf.mxu1 }
 0x693   : > { %7751 = vmatmul.mubr.msk.bf16.vlgmr.msra.gmra.mxu0 %vm682_vm3, %v1314_v48 }
 0x694   : > { %v1311_v51 = vpop.f32.mrf.mxu1  ;;  %7761 = vmatpush3.bf16.msra.mxu0 %v7909_v47  ;;  %7764 = vmatprep.mubr.msk.bf16.mxu0 %vm8357_vm1, %v8356_v3 }
 0x695   : > { %7762 = vmatprep.subr.bf16.mxu0 %v8356_v3 }
 0x696   : > { %v7747_v53 = vpop.f32.mrf.mxu1 }
 0x698   : > { %v8622_v54 = vpop.f32.mrf.mxu1  ;;  %7763 = vmatpush3.bf16.msra.mxu0 %v7910_v52 }
 0x699   : > { %7776 = vmatprep.subr.bf16.mxu0 %v8356_v3 }
 0x69a   : > { %v7758_v57 = vpop.f32.mrf.mxu1 }
 0x69b   : > { %7765 = vmatmul.mubr.msk.bf16.vlgmr.msra.gmra.mxu0 %vm499_vm2, %v8483_v9 }
 0x69c   : > { %v8628_v58 = vpop.f32.mrf.mxu1  ;;  %7777 = vmatpush3.bf16.msra.mxu0 %v7911_v56  ;;  %7780 = vmatprep.mubr.msk.bf16.mxu0 %vm8357_vm1, %v8356_v3 }
 0x69d   : > { %7778 = vmatprep.subr.bf16.mxu0 %v8356_v3 }
 0x69e   : > { %v7759_v59 = vpop.f32.mrf.mxu1 }
 0x6a0   : > { %v1536_v61 = vpop.f32.mrf.mxu1  ;;  %7779 = vmatpush3.bf16.msra.mxu0 %v7912_v7  ;;  %v7014_v7 = vld [vmem:[%s8432_s21 + $0x8] sm:$0xf] }
 0x6a1   : > { %v1537_v62 = vadd.f32 %v6997_v60, %v1536_v61  ;;  %7790 = vmatprep.subr.bf16.mxu0 %v8356_v3 }
 0x6a2   : > { %v7774_v63 = vpop.f32.mrf.mxu1 }
 0x6a3   : > { %v1611_v0 = vpack.c.bf16 %v1537_v62, %v1537_v62  ;;  %7781 = vmatmul.mubr.msk.bf16.vlgmr.msra.gmra.mxu0 %vm499_vm2, %v8483_v9 }
 0x6a4   : > { %v1539_v1 = vpop.f32.mrf.mxu1  ;;  %7792 = vmatprep.mubr.msk.bf16.mxu0 %vm8357_vm1, %v8356_v3 }
 0x6a5   : > { %v1619_v2 = vsel %vm682_vm3, %v1611_v0, 0  ;;  %v1540_v5 = vadd.f32 %v6997_v60, %v1539_v1 }
 0x6a6   : > { %v7775_v4 = vpop.f32.mrf.mxu1  ;;  %7785 = vmatpush3.bf16.xpose.msra.mxu1 %v1619_v2 }
 0x6a7   : > { %7796 = vmatprep.subr.bf16.mxu1 %v8356_v3  ;;  %v1612_v6 = vpack.c.bf16 %v1540_v5, %v1540_v5 }
 0x6a9   : > { %v1665_v8 = vsel %vm682_vm3, %v1612_v6, 0 }
 0x6aa   : > { %7791 = vmatpush3.bf16.xpose.msra.mxu0 %v1665_v8  ;;  %v1834_v8 = vsel %vm806_vm4, %v7014_v7, 0 }
 0x6ab   : > { %7802 = vmatprep.subr.bf16.mxu0 %v8356_v3 }
 0x753   : > { %v8644_v10 = vpop.f32.mrf.mxu0 }
 0x755   : > { %v7752_v11 = vpop.f32.mrf.mxu0 }
 0x756   : > { %v7914_v11 = vld [vmem:[%s8437_s24 + $0x38] sm:$0xff]  }
 0x757   : > { %v8646_v12 = vpop.f32.mrf.mxu0 }
 0x759   : > { %v7753_v13 = vpop.f32.mrf.mxu0 }
 0x75a   : > { %v7916_v13 = vld [vmem:[%s8437_s24 + $0x30] sm:$0xff]  }
 0x75b   : > { %v1470_v15 = vpop.f32.mrf.mxu0 }
 0x75c   : > { %v1471_v16 = vadd.f32 %v6988_v14, %v1470_v15 }
 0x75d   : > { %v7766_v17 = vpop.f32.mrf.mxu0 }
 0x75e   : > { %v1609_v18 = vpack.c.bf16 %v1471_v16, %v1471_v16 }
 0x75f   : > { %v1473_v19 = vpop.f32.mrf.mxu0 }
 0x760   : > { %v1474_v20 = vadd.f32 %v6988_v14, %v1473_v19  ;;  %7787 = vmatmul.mubr.msk.bf16.vlgmr.msra.gmra.mxu1 %vm682_vm3, %v1609_v18  ;;  %v7913_v18 = vld [vmem:[%s8437_s24 + $0x78] sm:$0xff]  }
 0x761   : > { %v7767_v21 = vpop.f32.mrf.mxu0  ;;  %7798 = vmatprep.mubr.msk.bf16.mxu1 %vm8357_vm1, %v8356_v3 }
 0x762   : > { %v1610_v22 = vpack.c.bf16 %v1474_v20, %v1474_v20 }
 0x763   : > { %v1602_v25 = vpop.f32.mrf.mxu0 }
 0x764   : > { %7793 = vmatmul.mubr.msk.bf16.vlgmr.msra.gmra.mxu0 %vm682_vm3, %v1610_v22  ;;  %v1603_v27 = vadd.f32 %v7006_v23, %v1602_v25 }
 0x765   : > { %7804 = vmatprep.mubr.msk.bf16.mxu0 %vm8357_vm1, %v8356_v3  ;;  %v7782_v29 = vpop.f32.mrf.mxu0 }
 0x766   : > { %v1613_v30 = vpack.c.bf16 %v1603_v27, %v1603_v27  ;;  %v7917_v27 = vld [vmem:[%s8437_s24 + $0xb8] sm:$0xff]   ;;  %v7918_v29 = vld [vmem:[%s8437_s24 + $0xb0] sm:$0xff]  }
 0x767   : > { %v1605_v31 = vpop.f32.mrf.mxu0 }
 0x768   : > { %v1739_v32 = vsel %vm806_vm4, %v1613_v30, 0  ;;  %v1606_v33 = vadd.f32 %v7006_v23, %v1605_v31  ;;  %v7915_v23 = vld [vmem:[%s8437_s24 + $0x70] sm:$0xff]  }
 0x769   : > { %v7783_v34 = vpop.f32.mrf.mxu0  ;;  %7797 = vmatpush3.bf16.msra.mxu1 %v1739_v32 }
 0x76a   : > { %v1614_v35 = vpack.c.bf16 %v1606_v33, %v1606_v33  ;;  %7808 = vmatprep.subr.bf16.mxu1 %v8356_v3  ;;  %v1405_v34 = vadd.f32 %v8622_v54, %v8644_v10 }
 0x76c   : > { %v1785_v36 = vsel %vm806_vm4, %v1614_v35, 0 }
 0x76d   : > { %7803 = vmatpush3.bf16.msra.mxu0 %v1785_v36 }
 0x76e   : > { %7814 = vmatprep.subr.bf16.mxu0 %v8356_v3 }
 0x820   : > { %v1655_v37 = vpop.f32.mrf.mxu1 }
 0x821   : > { %v1707_v38 = vmul.f32 0.35355338, %v1655_v37 }
 0x822   : > { %v7788_v39 = vpop.f32.mrf.mxu1 }
 0x823   : > { %v1709_v40 = vadd.f32 %v1707_v38, %v8523_v55  ;;  %v1408_v38 = vadd.f32 %v8628_v58, %v8646_v12 }
 0x824   : > { %v1658_v41 = vpop.f32.mrf.mxu1  ;;  %v1701_v42 = vpop.f32.mrf.mxu0 }
 0x825   : > { %v1708_v24 = vmul.f32 0.35355338, %v1701_v42  ;;  %v1711_v26 = vsel %vm682_vm3, %v1709_v40, -inf  ;;  %v7030_v41 = vld [vmem:[%s8442_s28 + $0x7] ss:$0 sm:$0xff] }
 0x826   : > { %1712 = vmax.xlane.f32.xlu0 %v1711_v26  ;;  %v7789_v28 = vpop.f32.mrf.mxu1  ;;  %v7794_v43 = vpop.f32.mrf.mxu0  ;;  %v7021_v26 = vld [vmem:[%s8442_s28 + $0x3] ss:$0 sm:$0xff] }
 0x827   : > { %v1710_v45 = vadd.f32 %v1708_v24, %v8523_v55 }
 0x828   : > { %v1704_v46 = vpop.f32.mrf.mxu0 }
 0x829   : > { %v1714_v47 = vsel %vm682_vm3, %v1710_v45, -inf }
 0x82a   : > { %1715 = vmax.xlane.f32.xlu1 %v1714_v47  ;;  %v7795_v48 = vpop.f32.mrf.mxu0 }
 0x8af   : > { %v1713_v49 = vpop.xlane.xlu0 %1712 }
 0x8b0   : > { %v1717_v50 = vsub.f32 %v1709_v40, %v1713_v49 }
 0x8b2   : > { %v1719_v51 = vmul.f32 1.442695, %v1717_v50 }
 0x8b3   : > { %v1716_v52 = vpop.xlane.xlu1 %1715 }
 0x8b4   : > { %8127 = vpow2.f32 %v1719_v51  ;;  %v1718_v53 = vsub.f32 %v1710_v45, %v1716_v52  ;;  %v7039_v51 = vld [vmem:[%s8442_s28 + $0xb] ss:$0 sm:$0xff] }
 0x8b6   : > { %v1721_v56 = vmul.f32 1.442695, %v1718_v53 }
 0x8b8   : > { %8129 = vpow2.f32 %v1721_v56 }
 0x8c1   : > { %v8128_v57 = vpop.eup %8127 }
 0x8c2   : > { %v1723_v59 = vsel %vm682_vm3, %v8128_v57, 0.0 }
 0x8c3   : > { %1724 = vadd.xlane.f32.xlu0 %v1723_v59 }
 0x8c5   : > { %v8130_v60 = vpop.eup %8129 }
 0x8c6   : > { %v1726_v61 = vsel %vm682_vm3, %v8130_v60, 0.0 }
 0x8c7   : > { %1727 = vadd.xlane.f32.xlu1 %v1726_v61 }
 0x94c   : > { %v1725_v62 = vpop.xlane.xlu0 %1724 }
 0x94d   : > { %8131 = vrcp.f32 %v1725_v62 }
 0x950   : > { %v1728_v63 = vpop.xlane.xlu1 %1727 }
 0x951   : > { %8133 = vrcp.f32 %v1728_v63 }
 0x95a   : > { %v8132_v0 = vpop.eup %8131 }
 0x95b   : > { %v1731_v1 = vmul.f32 %v8132_v0, %v8128_v57 }
 0x95d   : > { %v1733_v2 = vpack.c.bf16 %v1731_v1, %v1731_v1 }
 0x95e   : > { %v8134_v4 = vpop.eup %8133 }
 0x95f   : > { %7799 = vmatmul.mubr.msk.bf16.vlgmr.msra.gmra.mxu1 %vm682_vm3, %v1733_v2  ;;  %v1732_v5 = vmul.f32 %v8134_v4, %v8130_v60 }
 0x960   : > { %7810 = vmatprep.mubr.msk.bf16.mxu1 %vm8357_vm1, %v8356_v3  ;;  %7809 = vmatpush3.bf16.msra.mxu1 %v1834_v8 }
 0x961   : > { %v1734_v6 = vpack.c.bf16 %v1732_v5, %v1732_v5  ;;  %7822 = vmatprep.subr.bf16.mxu1 %v8356_v3 }
 0x963   : > { %7805 = vmatmul.mubr.msk.bf16.vlgmr.msra.gmra.mxu0 %vm682_vm3, %v1734_v6 }
 0x964   : > { %7818 = vmatprep.mubr.msk.bf16.mxu0 %vm8357_vm1, %v8356_v3  ;;  %7815 = vmatpush3.bf16.msra.mxu0 %v7914_v11 }
 0x965   : > { %7816 = vmatprep.subr.bf16.mxu0 %v8356_v3 }
 0x968   : > { %7817 = vmatpush3.bf16.msra.mxu0 %v7916_v13 }
 0x969   : > { %7830 = vmatprep.subr.bf16.mxu0 %v8356_v3 }
 0x96b   : > { %7819 = vmatmul.mubr.msk.bf16.vlgmr.msra.gmra.mxu0 %vm499_vm2, %v8483_v9 }
 0x96c   : > { %7834 = vmatprep.mubr.msk.bf16.mxu0 %vm8357_vm1, %v8356_v3  ;;  %7831 = vmatpush3.bf16.msra.mxu0 %v7917_v27 }
 0x96d   : > { %7832 = vmatprep.subr.bf16.mxu0 %v8356_v3 }
 0x970   : > { %7833 = vmatpush3.bf16.msra.mxu0 %v7918_v29 }
 0x971   : > { %7844 = vmatprep.subr.bf16.mxu0 %v8356_v3 }
 0x973   : > { %7835 = vmatmul.mubr.msk.bf16.vlgmr.msra.gmra.mxu0 %vm499_vm2, %v8483_v9 }
 0x974   : > { %7846 = vmatprep.mubr.msk.bf16.mxu0 %vm8357_vm1, %v8356_v3 }
 0xa1f   : > { %v1775_v14 = vpop.f32.mrf.mxu1 }
 0xa21   : > { %v7800_v15 = vpop.f32.mrf.mxu1 }
 0xa23   : > { %v1778_v16 = vpop.f32.mrf.mxu1  ;;  %v1821_v17 = vpop.f32.mrf.mxu0 }
 0xa24   : > { %v1827_v19 = vpack.c.bf16 %v1821_v17, %v1775_v14 }
 0xa25   : > { %v7801_v20 = vpop.f32.mrf.mxu1  ;;  %v7806_v21 = vpop.f32.mrf.mxu0 }
 0xa26   : > { %7811 = vmatmul.mubr.msk.bf16.vlgmr.msra.gmra.mxu1 %vm682_vm3, %v1827_v19 }
 0xa27   : > { %v1824_v22 = vpop.f32.mrf.mxu0  ;;  %7823 = vmatpush3.bf16.msra.mxu1 %v7913_v18  ;;  %7826 = vmatprep.mubr.msk.bf16.mxu1 %vm8357_vm1, %v8356_v3 }
 0xa28   : > { %7824 = vmatprep.subr.bf16.mxu1 %v8356_v3 }
 0xa29   : > { %v7807_v25 = vpop.f32.mrf.mxu0 }
 0xa2b   : > { %7825 = vmatpush3.bf16.msra.mxu1 %v7915_v23  ;;  %v1938_v30 = vpop.f32.mrf.mxu0 }
 0xa2c   : > { %7838 = vmatprep.subr.bf16.mxu1 %v8356_v3  ;;  %v1939_v10 = vadd.f32 %v7021_v26, %v1938_v30 }
 0xa2d   : > { %v7820_v31 = vpop.f32.mrf.mxu0 }
 0xa2e   : > { %7827 = vmatmul.mubr.msk.bf16.vlgmr.msra.gmra.mxu1 %vm499_vm2, %v8483_v9  ;;  %v2077_v58 = vpack.c.bf16 %v1939_v10, %v1939_v10 }
 0xa2f   : > { %7840 = vmatprep.mubr.msk.bf16.mxu1 %vm8357_vm1, %v8356_v3  ;;  %v1941_v32 = vpop.f32.mrf.mxu0 }
 0xa30   : > { %v1942_v49 = vadd.f32 %v7021_v26, %v1941_v32 }
 0xa31   : > { %v7821_v33 = vpop.f32.mrf.mxu0 }
 0xa32   : > { %v2078_v50 = vpack.c.bf16 %v1942_v49, %v1942_v49 }
 0xa33   : > { %v2070_v52 = vpop.f32.mrf.mxu0 }
 0xa34   : > { %v2071_v53 = vadd.f32 %v7039_v51, %v2070_v52 }
 0xa35   : > { %v7836_v56 = vpop.f32.mrf.mxu0 }
 0xa36   : > { %v2081_v57 = vpack.c.bf16 %v2071_v53, %v2071_v53  ;;  %v8343_v53 = vld [vmem:[#allocation2] sm:$0xff] }
 0xa37   : > { %v2073_v59 = vpop.f32.mrf.mxu0 }
 0xa38   : > { %v2207_v60 = vsel %vm806_vm4, %v2081_v57, 0  ;;  %v2074_v61 = vadd.f32 %v7039_v51, %v2073_v59 }
 0xa39   : > { %v7837_v62 = vpop.f32.mrf.mxu0 }
 0xa3a   : > { %v2082_v63 = vpack.c.bf16 %v2074_v61, %v2074_v61  ;;  %v8344_v61 = vld [vmem:[#allocation2 + $0x8] sm:$0xff] }
 0xa3c   : > { %v2253_v0 = vsel %vm806_vm4, %v2082_v63, 0 }
 0xae6   : > { %v1870_v35 = vpop.f32.mrf.mxu1 }
 0xae7   : > { %v8704_v36 = vadd.f32 %v1870_v35, %v1405_v34 }
 0xae8   : > { %v7812_v37 = vpop.f32.mrf.mxu1 }
 0xaea   : > { %v1873_v39 = vpop.f32.mrf.mxu1 }
 0xaeb   : > { %v8708_v40 = vadd.f32 %v1873_v39, %v1408_v38 }
 0xaec   : > { %v7813_v9 = vpop.f32.mrf.mxu1 }
 0xaed   : > { %v7047_v9 = vld [vmem:[%s8432_s21 + $0xc] sm:$0xf] }
 0xaee   : > { %v2004_v42 = vpop.f32.mrf.mxu1 }
 0xaef   : > { %v2005_v24 = vadd.f32 %v7030_v41, %v2004_v42 }
 0xaf0   : > { %v7828_v28 = vpop.f32.mrf.mxu1 }
 0xaf1   : > { %v2079_v43 = vpack.c.bf16 %v2005_v24, %v2005_v24 }
 0xaf2   : > { %v2007_v45 = vpop.f32.mrf.mxu1 }
 0xaf3   : > { %v2087_v54 = vsel %vm682_vm3, %v2079_v43, 0  ;;  %v2008_v46 = vadd.f32 %v7030_v41, %v2007_v45  ;;  %v2302_v41 = vsel %vm806_vm4, %v7047_v9, 0 }
 0xaf4   : > { %v7829_v47 = vpop.f32.mrf.mxu1  ;;  %7839 = vmatpush3.bf16.xpose.msra.mxu1 %v2087_v54 }
 0xaf5   : > { %v2080_v48 = vpack.c.bf16 %v2008_v46, %v2008_v46  ;;  %7850 = vmatprep.subr.bf16.mxu1 %v8356_v3  ;;  %v8743_v47 = vld [vmem:[%s8462_s27] sm:$0xff] }
 0xaf7   : > { %v2133_v12 = vsel %vm682_vm3, %v2080_v48, 0 }
 0xaf8   : > { %7845 = vmatpush3.bf16.xpose.msra.mxu0 %v2133_v12 }
 0xaf9   : > { %7856 = vmatprep.subr.bf16.mxu0 %v8356_v3 }
 0xafb   : > { %7841 = vmatmul.mubr.msk.bf16.vlgmr.msra.gmra.mxu1 %vm682_vm3, %v2077_v58 }
 0xafc   : > { %7852 = vmatprep.mubr.msk.bf16.mxu1 %vm8357_vm1, %v8356_v3  ;;  %7851 = vmatpush3.bf16.msra.mxu1 %v2207_v60 }
 0xafd   : > { %7862 = vmatprep.subr.bf16.mxu1 %v8356_v3 }
 0xaff   : > { %7847 = vmatmul.mubr.msk.bf16.vlgmr.msra.gmra.mxu0 %vm682_vm3, %v2078_v50 }
 0xb00   : > { %7858 = vmatprep.mubr.msk.bf16.mxu0 %vm8357_vm1, %v8356_v3  ;;  %7857 = vmatpush3.bf16.msra.mxu0 %v2253_v0 }
 0xbbb   : > { %v2123_v1 = vpop.f32.mrf.mxu1 }
 0xbbc   : > { %v2175_v2 = vmul.f32 0.35355338, %v2123_v1 }
 0xbbd   : > { %v7842_v4 = vpop.f32.mrf.mxu1 }
 0xbbe   : > { %v2177_v5 = vadd.f32 %v2175_v2, %v8523_v55 }
 0xbbf   : > { %v2126_v6 = vpop.f32.mrf.mxu1  ;;  %v2169_v7 = vpop.f32.mrf.mxu0 }
 0xbc0   : > { %v2176_v8 = vmul.f32 0.35355338, %v2169_v7  ;;  %v2179_v11 = vsel %vm682_vm3, %v2177_v5, -inf }
 0xbc1   : > { %2180 = vmax.xlane.f32.xlu0 %v2179_v11  ;;  %v7843_v13 = vpop.f32.mrf.mxu1  ;;  %v7848_v14 = vpop.f32.mrf.mxu0  ;;  %v2399_v11 = vld [vmem:[%s8447_s12 + $0xc0] sm:$0xff] }
 0xbc2   : > { %v2178_v15 = vadd.f32 %v2176_v8, %v8523_v55  ;;  %v2401_v13 = vld [vmem:[%s8447_s12 + $0x120] sm:$0xff]  ;;  %v2400_v14 = vld [vmem:[%s8447_s12 + $0xc8] sm:$0xff] }
 0xbc3   : > { %v2172_v16 = vpop.f32.mrf.mxu0 }
 0xbc4   : > { %v2182_v17 = vsel %vm682_vm3, %v2178_v15, -inf  ;;  %v2402_v16 = vld [vmem:[%s8447_s12 + $0x128] sm:$0xff] }
 0xbc5   : > { %2183 = vmax.xlane.f32.xlu1 %v2182_v17  ;;  %v7849_v18 = vpop.f32.mrf.mxu0  ;;  %v7053_v17 = vcombine.low %v2399_v11, %v2401_v13 }
 0xbc6   : > { %v7055_v18 = vcombine.low %v2400_v14, %v2402_v16 }
 0xc4a   : > { %v2181_v19 = vpop.xlane.xlu0 %2180 }
 0xc4b   : > { %v2185_v20 = vsub.f32 %v2177_v5, %v2181_v19  ;;  %v7056_v19 = vcombine.high %v2400_v14, %v2402_v16  ;;  %v7931_v14 = vld [vmem:[%s8457_s3 + $0x160] sm:$0xff]  }
 0xc4c   : > { %v7933_v16 = vld [vmem:[%s8457_s3 + $0x120] sm:$0xff]  }
 0xc4d   : > { %v2187_v21 = vmul.f32 1.442695, %v2185_v20  ;;  %v2395_v20 = vld [vmem:[%s8447_s12] sm:$0xff] }
 0xc4e   : > { %v2184_v22 = vpop.xlane.xlu1 %2183 }
 0xc4f   : > { %8135 = vpow2.f32 %v2187_v21  ;;  %v2186_v23 = vsub.f32 %v2178_v15, %v2184_v22  ;;  %v7054_v15 = vcombine.high %v2399_v11, %v2401_v13  ;;  %v2397_v21 = vld [vmem:[%s8447_s12 + $0x60] sm:$0xff]  ;;  %v2396_v22 = vld [vmem:[%s8447_s12 + $0x8] sm:$0xff] }
 0xc50   : > { %v7929_v11 = vld [vmem:[%s8457_s3 + $0x128] sm:$0xff]  }
 0xc51   : > { %v2189_v25 = vmul.f32 1.442695, %v2186_v23  ;;  %2480 = vmatprep.subr.bf16.mxu0 %v7054_v15  ;;  %v7050_v23 = vcombine.high %v2395_v20, %v2397_v21  ;;  %v7930_v13 = vld [vmem:[%s8457_s3 + $0x1a8] sm:$0xff]   ;;  %v7932_v15 = vld [vmem:[%s8457_s3 + $0x1e0] sm:$0xff]  }
 0xc53   : > { %8137 = vpow2.f32 %v2189_v25  ;;  %v2398_v25 = vld [vmem:[%s8447_s12 + $0x68] sm:$0xff] }
 0xc5c   : > { %v8136_v27 = vpop.eup %8135 }
 0xc5d   : > { %v2191_v29 = vsel %vm682_vm3, %v8136_v27, 0.0 }
 0xc5e   : > { %2192 = vadd.xlane.f32.xlu0 %v2191_v29  ;;  %v7051_v29 = vcombine.low %v2396_v22, %v2398_v25 }
 0xc60   : > { %v8138_v30 = vpop.eup %8137 }
 0xc61   : > { %v2194_v55 = vsel %vm682_vm3, %v8138_v30, 0.0 }
 0xc62   : > { %2195 = vadd.xlane.f32.xlu1 %v2194_v55  ;;  %v2842_v55 = vld [vmem:[%s8447_s12 + $0xd0] sm:$0xff] }
 0xce7   : > { %v2193_v31 = vpop.xlane.xlu0 %2192 }
 0xce8   : > { %8139 = vrcp.f32 %v2193_v31  ;;  %v2844_v31 = vld [vmem:[%s8447_s12 + $0x130] sm:$0xff] }
 0xceb   : > { %v2196_v32 = vpop.xlane.xlu1 %2195 }
 0xcec   : > { %8141 = vrcp.f32 %v2196_v32  ;;  %v2843_v32 = vld [vmem:[%s8447_s12 + $0xd8] sm:$0xff] }
 0xcf5   : > { %v8140_v33 = vpop.eup %8139 }
 0xcf6   : > { %v2199_v34 = vmul.f32 %v8140_v33, %v8136_v27  ;;  %v7049_v27 = vcombine.low %v2395_v20, %v2397_v21  ;;  %v7064_v33 = vcombine.high %v2842_v55, %v2844_v31  ;;  %v7937_v20 = vld [vmem:[%s8457_s3 + $0x118] sm:$0xff]  }
 0xcf7   : > { %v7938_v21 = vld [vmem:[%s8457_s3 + $0x198] sm:$0xff]  }
 0xcf8   : > { %v2201_v35 = vpack.c.bf16 %v2199_v34, %v2199_v34  ;;  %v2845_v34 = vld [vmem:[%s8447_s12 + $0x138] sm:$0xff] }
 0xcf9   : > { %v8142_v37 = vpop.eup %8141 }
 0xcfa   : > { %7853 = vmatmul.mubr.msk.bf16.vlgmr.msra.gmra.mxu1 %vm682_vm3, %v2201_v35  ;;  %v2200_v38 = vmul.f32 %v8142_v37, %v8138_v30  ;;  %v7052_v30 = vcombine.high %v2396_v22, %v2398_v25  ;;  %v10118_v35 = vmov 0   ;;  %v7063_v37 = vcombine.low %v2842_v55, %v2844_v31  ;;  %v7939_v22 = vld [vmem:[%s8457_s3 + $0x150] sm:$0xff]   ;;  %v7945_v55 = vld [vmem:[%s8457_s3 + $0x108] sm:$0xff]  }
 0xcfb   : > { %7864 = vmatprep.mubr.msk.bf16.mxu1 %vm8357_vm1, %v8356_v3  ;;  %7863 = vmatpush3.bf16.msra.mxu1 %v2302_v41  ;;  %v8740_v3 = vsub.s32 0, %v8520_v44  ;;  %v7941_v25 = vld [vmem:[%s8457_s3 + $0x110] sm:$0xff]   ;;  %v7946_v31 = vld [vmem:[%s8457_s3 + $0x188] sm:$0xff]  }
 0xcfc   : > { %v2202_v39 = vpack.c.bf16 %v2200_v38, %v2200_v38  ;;  %2523 = vmatprep.subr.bf16.mxu1 %v7056_v19  ;;  %v7065_v38 = vcombine.low %v2843_v32, %v2845_v34  ;;  %v7936_v19 = vld [vmem:[%s8457_s3 + $0x1d8] sm:$0xff]  }
 0xcfd   : > { %10152 = vst [vmem:[#allocation4_spill] sm:$0xff] %v8740_v3  ;;  %v2350_v48 = vrot.slane %v8743_v47, %v8740_v3 }
 0xcfe   : > { %7859 = vmatmul.mubr.msk.bf16.vlgmr.msra.gmra.mxu0 %vm682_vm3, %v2202_v39  ;;  %v7066_v39 = vcombine.high %v2843_v32, %v2845_v34  ;;  %v7948_v34 = vld [vmem:[%s8457_s3 + $0x1c0] sm:$0xff]  }
 0xcff   : > { %2481 = vmatpush1.bf16.msra.mxu0 %v7053_v17  ;;  %2500 = vmatprep.mubr.bf16.mxu0 %v10118_v35  ;;  %v7934_v17 = vld [vmem:[%s8457_s3 + $0x1a0] sm:$0xff]  }
 0xd00   : > { %2482 = vmatprep.subr.bf16.mxu0 %v7050_v23  ;;  %v7940_v23 = vld [vmem:[%s8457_s3 + $0x1d0] sm:$0xff]  }
 0xd03   : > { %2483 = vmatpush1.bf16.msra.mxu0 %v7049_v27  ;;  %v7942_v27 = vld [vmem:[%s8457_s3 + $0x190] sm:$0xff]  }
 0xd04   : > { %2920 = vmatprep.subr.bf16.mxu0 %v7064_v33  ;;  %v7947_v33 = vld [vmem:[%s8457_s3 + $0x140] sm:$0xff]  }
 0xdba   : > { %v2243_v42 = vpop.f32.mrf.mxu1 }
 0xdbc   : > { %v7854_v24 = vpop.f32.mrf.mxu1 }
 0xdbe   : > { %v2246_v26 = vpop.f32.mrf.mxu1  ;;  %v2289_v28 = vpop.f32.mrf.mxu0 }
 0xdbf   : > { %v2295_v43 = vpack.c.bf16 %v2289_v28, %v2243_v42 }
 0xdc0   : > { %v7855_v45 = vpop.f32.mrf.mxu1  ;;  %v7860_v54 = vpop.f32.mrf.mxu0 }
 0xdc1   : > { %7865 = vmatmul.mubr.msk.bf16.vlgmr.msra.gmra.mxu1 %vm682_vm3, %v2295_v43  ;;  %v8768_v43 = vsub.s32 1, %v8520_v44 }
 0xdc2   : > { %v2292_v10 = vpop.f32.mrf.mxu0  ;;  %2524 = vmatpush1.bf16.msra.mxu1 %v7055_v18  ;;  %2543 = vmatprep.mubr.bf16.mxu1 %v10118_v35  ;;  %v7935_v18 = vld [vmem:[%s8457_s3 + $0x158] sm:$0xff]  }
 0xdc3   : > { %2525 = vmatprep.subr.bf16.mxu1 %v7052_v30  ;;  %10153 = vst [vmem:[#allocation5_spill] sm:$0xff] %v8768_v43  ;;  %v2385_v54 = vrot.slane %v8743_v47, %v8768_v43  ;;  %v8773_v10 = vsub.s32 2, %v8520_v44  ;;  %v7944_v30 = vld [vmem:[%s8457_s3 + $0x1c8] sm:$0xff]  }
 0xdc4   : > { %v7861_v46 = vpop.f32.mrf.mxu0 }
 0xdc5   : > { %10154 = vst [vmem:[#allocation6_spill] sm:$0xff] %v8773_v10 }
 0xdc6   : > { %2526 = vmatpush1.bf16.msra.mxu1 %v7051_v29  ;;  %v7943_v29 = vld [vmem:[%s8457_s3 + $0x148] sm:$0xff]  }
 0xdc7   : > { %2963 = vmatprep.subr.bf16.mxu1 %v7066_v39 }
 0xe81   : > { %v2338_v58 = vpop.f32.mrf.mxu1 }
 0xe82   : > { %v2345_v12 = vadd.f32 %v2338_v58, %v8704_v36  ;;  %v2391_v58 = vrot.slane %v8743_v47, %v8773_v10 }
 0xe83   : > { %v7866_v49 = vpop.f32.mrf.mxu1 }
 0xe84   : > { %v2351_v50 = vadd.f32 %v2350_v48, %v2345_v12 }
 0xe85   : > { %v2341_v51 = vpop.f32.mrf.mxu1 }
 0xe86   : > { %v2346_v52 = vadd.f32 %v2341_v51, %v8708_v40  ;;  %v2353_v56 = vadd.f32 %v8343_v53, %v2351_v50  ;;  %v2838_v51 = vld [vmem:[%s8447_s12 + $0x10] sm:$0xff]  ;;  %v2839_v53 = vld [vmem:[%s8447_s12 + $0x18] sm:$0xff] }
 0xe87   : > { %v7867_v57 = vpop.f32.mrf.mxu1 }
 0xe88   : > { %v2352_v59 = vadd.f32 %v2350_v48, %v2346_v52  ;;  %v2355_v60 = vsel %vm499_vm2, %v2353_v56, 0.0  ;;  %v2840_v52 = vld [vmem:[%s8447_s12 + $0x70] sm:$0xff] }
 0xe89   : > { %2356 = vadd.xlane.f32.xlu0 %v2355_v60  ;;  %v7059_v47 = vcombine.low %v2838_v51, %v2840_v52 }
 0xe8a   : > { %v2354_v62 = vadd.f32 %v8344_v61, %v2352_v59  ;;  %v7060_v61 = vcombine.high %v2838_v51, %v2840_v52 }
 0xe8c   : > { %v2358_v63 = vsel %vm499_vm2, %v2354_v62, 0.0 }
 0xe8d   : > { %2359 = vadd.xlane.f32.xlu1 %v2358_v63 }
 0xf12   : > { %v2357_v36 = vpop.xlane.xlu0 %2356 }
 0xf13   : > { %v2362_v0 = vmul.f32 0.03125, %v2357_v36  ;;  %v7919_v36 = vld [vmem:[%s8457_s3 + $0x178] sm:$0xff]  }
 0xf15   : > { %v2364_v1 = vsub.f32 %v2353_v56, %v2362_v0  ;;  %v2841_v56 = vld [vmem:[%s8447_s12 + $0x78] sm:$0xff] }
 0xf16   : > { %v2360_v40 = vpop.xlane.xlu1 %2359  ;;  %v7061_v63 = vcombine.low %v2839_v53, %v2841_v56  ;;  %v7920_v0 = vld [vmem:[%s8457_s3 + $0x1f8] sm:$0xff]  }
 0xf17   : > { %v2363_v2 = vmul.f32 0.03125, %v2360_v40  ;;  %v2366_v4 = vmul.f32 %v2364_v1, %v2364_v1  ;;  %v7922_v40 = vld [vmem:[%s8457_s3 + $0x1b8] sm:$0xff]  }
 0xf19   : > { %v2365_v5 = vsub.f32 %v2354_v62, %v2363_v2  ;;  %v2368_v6 = vsel %vm499_vm2, %v2366_v4, 0.0  ;;  %v7062_v62 = vcombine.high %v2839_v53, %v2841_v56  ;;  %v7923_v2 = vld [vmem:[%s8457_s3 + $0x170] sm:$0xff]  }
 0xf1a   : > { %2369 = vadd.xlane.f32.xlu0 %v2368_v6  ;;  %v7924_v4 = vld [vmem:[%s8457_s3 + $0x1f0] sm:$0xff]  }
 0xf1b   : > { %v2367_v7 = vmul.f32 %v2365_v5, %v2365_v5  ;;  %v7926_v6 = vld [vmem:[%s8457_s3 + $0x1b0] sm:$0xff]  }
 0xf1d   : > { %v2371_v8 = vsel %vm499_vm2, %v2367_v7, 0.0  ;;  %v7927_v7 = vld [vmem:[%s8457_s3 + $0x168] sm:$0xff]  }
 0xf1e   : > { %2372 = vadd.xlane.f32.xlu1 %v2371_v8  ;;  %v7928_v8 = vld [vmem:[%s8457_s3 + $0x1e8] sm:$0xff]  }
 0xfa3   : > { %v2370_v9 = vpop.xlane.xlu0 %2369 }
 0xfa4   : > { %v2374_v41 = vmul.f32 0.03125, %v2370_v9 }
 0xfa6   : > { %v2376_v42 = vadd.f32 1e-12, %v2374_v41  ;;  %v8833_v41 = vsub.s32 3, %v8520_v44 }
 0xfa7   : > { %v2373_v24 = vpop.xlane.xlu1 %2372 }
 0xfa8   : > { %8143 = vrsqrt.f32 %v2376_v42  ;;  %v2375_v26 = vmul.f32 0.03125, %v2373_v24  ;;  %10158 = vst [vmem:[#allocation10_spill] sm:$0xff] %v8833_v41  ;;  %v7950_v24 = vld [vmem:[%s8457_s3 + $0x180] sm:$0xff]  }
 0xfaa   : > { %v2377_v28 = vadd.f32 1e-12, %v2375_v26  ;;  %v7951_v26 = vld [vmem:[%s8457_s3 + $0x78] sm:$0xff]  }
 0xfac   : > { %8145 = vrsqrt.f32 %v2377_v28  ;;  %v7952_v28 = vld [vmem:[%s8457_s3 + $0xf8] sm:$0xff]  }
 0xfb5   : > { %v8144_v45 = vpop.eup %8143 }
 0xfb6   : > { %v2380_v46 = vmul.f32 %v8144_v45, %v2364_v1  ;;  %v7921_v1 = vld [vmem:[%s8457_s3 + $0x138] sm:$0xff]  }
 0xfb8   : > { %v2386_v12 = vmul.f32 %v2385_v54, %v2380_v46 }
 0xfb9   : > { %v8146_v48 = vpop.eup %8145 }
 0xfba   : > { %v2381_v49 = vmul.f32 %v8146_v48, %v2365_v5  ;;  %v8781_v57 = vadd.f32 %v2391_v58, %v2386_v12  ;;  %v7925_v5 = vld [vmem:[%s8457_s3 + $0x130] sm:$0xff]  }
 0xfbc   : > { %v2387_v50 = vmul.f32 %v2385_v54, %v2381_v49  ;;  %10155 = vst [vmem:[#allocation7_spill] sm:$0xff] %v8781_v57 }
 0xfbe   : > { %v8783_v59 = vadd.f32 %v2391_v58, %v2387_v50 }
 0xfc0   : > { %10156 = vst [vmem:[#allocation8_spill] sm:$0xff] %v8783_v59  ;;  %v8787_v60 = vpack.c.bf16 %v8783_v59, %v8781_v57 }
 0xfc2   : > { %10157 = vst [vmem:[#allocation9_spill] sm:$0xff] %v8787_v60  ;;  %7057 = vmatmul.mubr.msk.bf16.vlgmr.msra.gmra.mxu0 %vm499_vm2, %v8787_v60  ;;  %7058 = vmatmul.mubr.msk.bf16.vlgmr.msra.gmra.mxu1 %vm499_vm2, %v8787_v60 }
 0xfc3   : > { %2921 = vmatpush1.bf16.msra.mxu0 %v7063_v37  ;;  %2964 = vmatpush1.bf16.msra.mxu1 %v7065_v38  ;;  %v7949_v37 = vld [vmem:[%s8457_s3 + $0x100] sm:$0xff]  }
 0xfc4   : > { %2922 = vmatprep.subr.bf16.mxu0 %v7060_v61  ;;  %2965 = vmatprep.subr.bf16.mxu1 %v7062_v62  ;;  %v2403_v38 = vld [vmem:[%s8452_s5] sm:$0xf] }
 0xfc5   : > { %2940 = vmatprep.mubr.bf16.mxu0 %v10118_v35  ;;  %2983 = vmatprep.mubr.bf16.mxu1 %v10118_v35  ;;  %v2412_v39 = vrot.slane %v2403_v38, %v8768_v43  ;;  %v2408_v45 = vrot.slane %v2403_v38, %v8740_v3  ;;  %v2416_v46 = vrot.slane %v2403_v38, %v8773_v10 }
 0xfc6   : > { %v2420_v48 = vrot.slane %v2403_v38, %v8833_v41 }
 0xfc7   : > { %2923 = vmatpush1.bf16.msra.mxu0 %v7059_v47  ;;  %2966 = vmatpush1.bf16.msra.mxu1 %v7061_v63 }
 0xfc8   : > { %7385 = vmatprep.subr.bf16.mxu0 %v7919_v36  ;;  %7407 = vmatprep.subr.bf16.mxu1 %v7920_v0 }
 0xfca   : > { %7067 = vmatmul.mubr.msk.bf16.vlgmr.msra.gmra.mxu0 %vm499_vm2, %v8787_v60  ;;  %7068 = vmatmul.mubr.msk.bf16.vlgmr.msra.gmra.mxu1 %vm499_vm2, %v8787_v60 }
 0xfcb   : > { %7386 = vmatpush3.bf16.msra.mxu0 %v7921_v1  ;;  %7408 = vmatpush3.bf16.msra.mxu1 %v7922_v40 }
 0xfcc   : > { %7387 = vmatprep.subr.bf16.mxu0 %v7923_v2  ;;  %7409 = vmatprep.subr.bf16.mxu1 %v7924_v4 }
 0xfcf   : > { %7388 = vmatpush3.bf16.msra.mxu0 %v7925_v5  ;;  %7410 = vmatpush3.bf16.msra.mxu1 %v7926_v6 }
 0xfd0   : > { %7389 = vmatprep.subr.bf16.mxu0 %v7927_v7  ;;  %7411 = vmatprep.subr.bf16.mxu1 %v7928_v8 }
 0xfd3   : > { %7390 = vmatpush3.bf16.msra.mxu0 %v7929_v11  ;;  %7412 = vmatpush3.bf16.msra.mxu1 %v7930_v13 }
 0xfd4   : > { %7391 = vmatprep.subr.bf16.mxu0 %v7931_v14  ;;  %7413 = vmatprep.subr.bf16.mxu1 %v7932_v15  ;;  %v2846_v15 = vld [vmem:[%s8452_s5 + $0x4] sm:$0xf] }
 0xfd7   : > { %7392 = vmatpush3.bf16.msra.mxu0 %v7933_v16  ;;  %7414 = vmatpush3.bf16.msra.mxu1 %v7934_v17 }
 0xfd8   : > { %7393 = vmatprep.subr.bf16.mxu0 %v7935_v18  ;;  %7415 = vmatprep.subr.bf16.mxu1 %v7936_v19 }
 0xfdb   : > { %7394 = vmatpush3.bf16.msra.mxu0 %v7937_v20  ;;  %7416 = vmatpush3.bf16.msra.mxu1 %v7938_v21  ;;  %v8891_v21 = vrot.slane %v2846_v15, %v8740_v3 }
 0xfdc   : > { %7395 = vmatprep.subr.bf16.mxu0 %v7939_v22  ;;  %7417 = vmatprep.subr.bf16.mxu1 %v7940_v23 }
 0xfdf   : > { %7396 = vmatpush3.bf16.msra.mxu0 %v7941_v25  ;;  %7418 = vmatpush3.bf16.msra.mxu1 %v7942_v27 }
 0xfe0   : > { %7397 = vmatprep.subr.bf16.mxu0 %v7943_v29  ;;  %7419 = vmatprep.subr.bf16.mxu1 %v7944_v30  ;;  %v8902_v29 = vrot.slane %v2846_v15, %v8773_v10 }
 0xfe3   : > { %7398 = vmatpush3.bf16.msra.mxu0 %v7945_v55  ;;  %7420 = vmatpush3.bf16.msra.mxu1 %v7946_v31 }
 0xfe4   : > { %7399 = vmatprep.subr.bf16.mxu0 %v7947_v33  ;;  %7421 = vmatprep.subr.bf16.mxu1 %v7948_v34 }
 0xfe7   : > { %7400 = vmatpush3.bf16.msra.mxu0 %v7949_v37  ;;  %7422 = vmatpush3.bf16.msra.mxu1 %v7950_v24 }
 0xfe8   : > { %7429 = vmatprep.subr.bf16.mxu0 %v7951_v26  ;;  %7451 = vmatprep.subr.bf16.mxu1 %v7952_v28 }
0x1082   : > { %v2502_v32 = vpop.f32.mrf.mxu0  ;;  %v2545_v42 = vpop.f32.mrf.mxu1 }
0x1083   : > { %v8843_v12 = vadd.f32 %v2502_v32, %v2408_v45  ;;  %v8848_v50 = vadd.f32 %v2545_v42, %v2416_v46 }
0x1084   : > { %v2504_v9 = vpop.f32.mrf.mxu0  ;;  %v2547_v58 = vpop.f32.mrf.mxu1 }
0x1085   : > { %v8839_v54 = vadd.f32 %v2504_v9, %v2412_v39  ;;  %10159 = vst [vmem:[#allocation11_spill] sm:$0xff] %v8843_v12  ;;  %10160 = vst [vmem:[#allocation12_spill] sm:$0xff] %v8848_v50  ;;  %v8850_v51 = vadd.f32 %v2547_v58, %v2420_v48  ;;  %v8853_v52 = vmul.f32 0.70710677, %v8843_v12  ;;  %v8859_v56 = vmul.f32 0.70710677, %v8848_v50 }
0x1086   : > { %v2506_v62 = vpop.f32.mrf.mxu0  ;;  %v2549_v6 = vpop.f32.mrf.mxu1 }
0x1087   : > { %v8846_v49 = vmul.f32 0.70710677, %v8839_v54  ;;  %10161 = vst [vmem:[#allocation13_spill] sm:$0xff] %v8853_v52  ;;  %10162 = vst [vmem:[#allocation14_spill] sm:$0xff] %v8859_v56  ;;  %v8862_v61 = vmul.f32 0.70710677, %v8850_v51  ;;  %v8872_v40 = vadd.f32 %v2506_v62, %v2408_v45  ;;  %v8881_v14 = vadd.f32 %v2549_v6, %v2416_v46 }
0x1088   : > { %v2570_v47 = vand.u32 2147483647, %v8853_v52  ;;  %v8867_v36 = vand.u32 2147483647, %v8859_v56  ;;  %v2508_v1 = vpop.f32.mrf.mxu0  ;;  %v2551_v19 = vpop.f32.mrf.mxu1  ;;  %v8965_v57 = vmul.f32 0.5, %v8839_v54 }
0x1089   : > { %v8856_v53 = vand.u32 2147483647, %v8846_v49  ;;  %v8870_v0 = vand.u32 2147483647, %v8862_v61  ;;  %10163 = vst [vmem:[#allocation15_spill] sm:$0xff] %v8872_v40  ;;  %v8875_v7 = vadd.f32 %v2508_v1, %v2412_v39  ;;  %10165 = vst [vmem:[#allocation17_spill] sm:$0xff] %v8881_v14  ;;  %v8899_v27 = vadd.f32 %v2551_v19, %v2420_v48 }
0x108a   : > { %v2578_v2 = vmul.f32 0.3275911, %v2570_v47  ;;  %v2580_v5 = vmul.f32 0.3275911, %v8867_v36  ;;  %v8879_v11 = vmul.f32 0.70710677, %v8872_v40  ;;  %v2942_v23 = vpop.f32.mrf.mxu0  ;;  %v2985_v31 = vpop.f32.mrf.mxu1 }
0x108b   : > { %v2579_v63 = vmul.f32 0.3275911, %v8856_v53  ;;  %v2581_v8 = vmul.f32 0.3275911, %v8870_v0  ;;  %v8885_v17 = vmul.f32 0.70710677, %v8875_v7  ;;  %v8906_v55 = vadd.f32 %v2942_v23, %v8891_v21 }
0x108c   : > { %10164 = vst [vmem:[#allocation16_spill] sm:$0xff] %v8879_v11  ;;  %v2586_v13 = vadd.f32 1.0, %v2578_v2  ;;  %v2588_v16 = vadd.f32 1.0, %v2580_v5  ;;  %v8888_v20 = vand.u32 2147483647, %v8879_v11  ;;  %v8916_v37 = vadd.f32 %v2985_v31, %v8902_v29 }
0x108d   : > { %v2587_v4 = vadd.f32 1.0, %v2579_v63  ;;  %v2589_v18 = vadd.f32 1.0, %v2581_v8  ;;  %v8894_v22 = vmul.f32 0.70710677, %v8881_v14  ;;  %v8897_v25 = vand.u32 2147483647, %v8885_v17 }
0x108e   : > { %v2582_v30 = vmul.f32 0.3275911, %v8888_v20  ;;  %v8913_v34 = vmul.f32 0.70710677, %v8899_v27  ;;  %10167 = vst [vmem:[#allocation19_spill] sm:$0xff] %v8916_v37  ;;  %v2682_v45 = vsub.f32 0.0, %v2570_v47 }
0x108f   : > { %8147 = vrcp.f32 %v2587_v4  ;;  %10166 = vst [vmem:[#allocation18_spill] sm:$0xff] %v8894_v22  ;;  %v8909_v32 = vand.u32 2147483647, %v8894_v22  ;;  %v2583_v33 = vmul.f32 0.3275911, %v8897_v25  ;;  %v2683_v63 = vsub.f32 0.0, %v8856_v53 }
0x1090   : > { %8149 = vrcp.f32 %v2586_v13  ;;  %v2590_v38 = vadd.f32 1.0, %v2582_v30  ;;  %v8919_v39 = vmul.f32 0.70710677, %v8906_v55  ;;  %v8925_v26 = vand.u32 2147483647, %v8913_v34 }
0x1091   : > { %8151 = vrcp.f32 %v2588_v16  ;;  %v2584_v9 = vmul.f32 0.3275911, %v8909_v32  ;;  %v2591_v24 = vadd.f32 1.0, %v2583_v33  ;;  %v8928_v28 = vmul.f32 0.70710677, %v8916_v37 }
0x1092   : > { %8153 = vrcp.f32 %v2589_v18  ;;  %v8931_v46 = vand.u32 2147483647, %v8919_v39  ;;  %v2585_v1 = vmul.f32 0.3275911, %v8925_v26  ;;  %v2690_v6 = vmul.f32 %v2682_v45, %v2570_v47 }
0x1093   : > { %8155 = vrcp.f32 %v2590_v38  ;;  %v2592_v58 = vadd.f32 1.0, %v2584_v9  ;;  %v8941_v4 = vand.u32 2147483647, %v8928_v28  ;;  %v2685_v18 = vsub.f32 0.0, %v8870_v0 }
0x1094   : > { %8157 = vrcp.f32 %v2591_v24  ;;  %v3018_v8 = vmul.f32 0.3275911, %v8931_v46  ;;  %v2691_v23 = vmul.f32 %v2683_v63, %v8856_v53  ;;  %v2593_v30 = vadd.f32 1.0, %v2585_v1  ;;  %v2944_v1 = vpop.f32.mrf.mxu0 }
0x1095   : > { %8159 = vrcp.f32 %v2592_v58  ;;  %v2684_v31 = vsub.f32 0.0, %v8867_v36  ;;  %v3020_v38 = vmul.f32 0.3275911, %v8941_v4  ;;  %v2686_v47 = vsub.f32 0.0, %v8888_v20 }
0x1096   : > { %v3026_v9 = vadd.f32 1.0, %v3018_v8  ;;  %v8955_v24 = vrot.slane %v2846_v15, %v8768_v43  ;;  %v8958_v45 = vrot.slane %v2846_v15, %v8833_v41  ;;  %v2698_v58 = vmul.f32 1.442695, %v2690_v6 }
0x1097   : > { %v2693_v63 = vmul.f32 %v2685_v18, %v8870_v0  ;;  %v2700_v44 = vmul.f32 1.442695, %v2691_v23  ;;  %v2688_v59 = vsub.f32 0.0, %v8909_v32  ;;  %8161 = vrcp.f32 %v2593_v30 }
0x1098   : > { %v2692_v8 = vmul.f32 %v2684_v31, %v8867_v36  ;;  %v3028_v15 = vadd.f32 1.0, %v3020_v38  ;;  %v2687_v6 = vsub.f32 0.0, %v8897_v25  ;;  %8163 = vrcp.f32 %v3026_v9 }
0x1099   : > { %v8970_v0 = vadd.f32 %v2944_v1, %v8955_v24  ;;  %8165 = vpow2.f32 %v2698_v58  ;;  %v8976_v36 = vmul.f32 0.5, %v8850_v51  ;;  %v2704_v23 = vmul.f32 1.442695, %v2693_v63 }
0x109a   : > { %8167 = vpow2.f32 %v2700_v44  ;;  %v8982_v31 = vmul.f32 1.442695, %v2692_v8  ;;  %v2689_v38 = vsub.f32 0.0, %v8925_v26  ;;  %v2695_v51 = vmul.f32 %v2687_v6, %v8897_v25 }
0x109b   : > { %10171 = vst [vmem:[#allocation23_spill] sm:$0xff] %v8976_v36  ;;  %8169 = vrcp.f32 %v3028_v15  ;;  %v3122_v15 = vsub.f32 0.0, %v8931_v46  ;;  %v3124_v36 = vsub.f32 0.0, %v8941_v4  ;;  %vm2731_vm6 = vcmp.lt.f32.partialorder %v8846_v49, 0.0 }
0x109c   : > { %v8922_v42 = vpop.eup %8147  ;;  %8171 = vpow2.f32 %v2704_v23  ;;  %v2697_v8 = vmul.f32 %v2689_v38, %v8925_v26  ;;  %v9014_v38 = vmul.f32 0.5, %v8906_v55  ;;  %vm2733_vm7 = vcmp.lt.f32.partialorder %v8862_v61, 0.0 }
0x109d   : > { %v2611_v48 = vmul.f32 1.0614054, %v8922_v42  ;;  %v8934_v62 = vpop.eup %8149  ;;  %vm2735_vm8 = vcmp.lt.f32.partialorder %v8885_v17, 0.0  ;;  %vm3170_vm9 = vcmp.lt.f32.partialorder %v8919_v39, 0.0  ;;  %vm2737_vm10 = vcmp.lt.f32.partialorder %v8913_v34, 0.0 }
0x109e   : > { %10168 = vst [vmem:[#allocation20_spill] sm:$0xff] %v8934_v62  ;;  %v8938_v2 = vpop.eup %8151  ;;  %v2610_v13 = vmul.f32 1.0614054, %v8934_v62  ;;  %vm3172_vm11 = vcmp.lt.f32.partialorder %v8928_v28, 0.0 }
0x109f   : > { %10169 = vst [vmem:[#allocation21_spill] sm:$0xff] %v8938_v2  ;;  %v8943_v5 = vpop.eup %8153  ;;  %v2619_v16 = vadd.f32 -1.4531521, %v2611_v48  ;;  %v2612_v19 = vmul.f32 1.0614054, %v8938_v2 }
0x10a0   : > { %v2613_v33 = vmul.f32 1.0614054, %v8943_v5  ;;  %v2618_v48 = vadd.f32 -1.4531521, %v2610_v13  ;;  %v2694_v13 = vmul.f32 %v2686_v47, %v8888_v20  ;;  %v2696_v20 = vmul.f32 %v2688_v59, %v8909_v32 }
0x10a1   : > { %v2627_v53 = vmul.f32 %v8922_v42, %v2619_v16  ;;  %v2620_v35 = vadd.f32 -1.4531521, %v2612_v19  ;;  %v8972_v16 = vpop.eup %8155  ;;  %v8993_v32 = vmul.f32 0.5, %v8875_v7 }
0x10a2   : > { %v2621_v10 = vadd.f32 -1.4531521, %v2613_v33  ;;  %10170 = vst [vmem:[#allocation22_spill] sm:$0xff] %v8972_v16  ;;  %v2626_v18 = vmul.f32 %v8934_v62, %v2618_v48  ;;  %v8980_v30 = vpop.eup %8157  ;;  %v2614_v47 = vmul.f32 1.0614054, %v8972_v16  ;;  %v8996_v48 = vmul.f32 0.5, %v8899_v27 }
0x10a3   : > { %v2635_v19 = vadd.f32 1.4214138, %v2627_v53  ;;  %v2628_v54 = vmul.f32 %v8938_v2, %v2620_v35  ;;  %v2706_v9 = vmul.f32 1.442695, %v2694_v13  ;;  %v8989_v35 = vmul.f32 0.70710677, %v8970_v0  ;;  %v8998_v58 = vpop.eup %8159 }
0x10a4   : > { %v2629_v33 = vmul.f32 %v8943_v5, %v2621_v10  ;;  %v2634_v44 = vadd.f32 1.4214138, %v2626_v18  ;;  %10172 = vst [vmem:[#allocation24_spill] sm:$0xff] %v8996_v48  ;;  %v2987_v10 = vpop.f32.mrf.mxu1  ;;  %v2710_v63 = vmul.f32 1.442695, %v2696_v20  ;;  %v2946_v20 = vpop.f32.mrf.mxu0 }
0x10a5   : > { %v2643_v59 = vmul.f32 %v8922_v42, %v2635_v19  ;;  %v2636_v53 = vadd.f32 1.4214138, %v2628_v54  ;;  %v2615_v25 = vmul.f32 1.0614054, %v8980_v30  ;;  %v9004_v13 = vand.u32 2147483647, %v8989_v35 }
0x10a6   : > { %v2637_v1 = vadd.f32 1.4214138, %v2629_v33  ;;  %v2622_v7 = vadd.f32 -1.4531521, %v2614_v47  ;;  %8173 = vpow2.f32 %v2706_v9  ;;  %v2708_v27 = vmul.f32 1.442695, %v2695_v51  ;;  %v9016_v47 = vpop.eup %8161 }
0x10a7   : > { %v9007_v6 = vadd.f32 %v2987_v10, %v8958_v45  ;;  %v2642_v18 = vmul.f32 %v8934_v62, %v2634_v44  ;;  %v2651_v19 = vadd.f32 -0.28449672, %v2643_v59  ;;  %v2616_v54 = vmul.f32 1.0614054, %v8998_v58 }
0x10a8   : > { %v3019_v23 = vmul.f32 0.3275911, %v9004_v13  ;;  %v2644_v26 = vmul.f32 %v8938_v2, %v2636_v53  ;;  %8175 = vpow2.f32 %v2710_v63  ;;  %v2623_v33 = vadd.f32 -1.4531521, %v2615_v25  ;;  %v9027_v63 = vpop.eup %8163 }
0x10a9   : > { %v2645_v9 = vmul.f32 %v8943_v5, %v2637_v1  ;;  %v2712_v51 = vmul.f32 1.442695, %v2697_v8  ;;  %v3130_v44 = vmul.f32 %v3122_v15, %v8931_v46  ;;  %v2630_v10 = vmul.f32 %v8972_v16, %v2622_v7  ;;  %v2989_v1 = vpop.f32.mrf.mxu1  ;;  %v9030_v8 = vpop.eup %8165 }
0x10aa   : > { %v3027_v59 = vadd.f32 1.0, %v3019_v23  ;;  %8177 = vpow2.f32 %v2708_v27  ;;  %v9022_v41 = vmul.f32 0.70710677, %v9007_v6  ;;  %v9025_v53 = vadd.f32 %v2946_v20, %v8891_v21  ;;  %10173 = vst [vmem:[#allocation25_spill] sm:$0xff] %v9030_v8  ;;  %v2948_v21 = vpop.f32.mrf.mxu0  ;;  %v8168_v23 = vpop.eup %8167 }
0x10ab   : > { %v2650_v55 = vadd.f32 -0.28449672, %v2642_v18  ;;  %v2659_v25 = vmul.f32 %v8922_v42, %v2651_v19  ;;  %v2624_v43 = vadd.f32 -1.4531521, %v2616_v54  ;;  %v9032_v46 = vadd.f32 -0.28449672, %v2644_v26  ;;  %v9042_v54 = vpop.eup %8169 }
0x10ac   : > { %8179 = vrcp.f32 %v3027_v59  ;;  %v2631_v15 = vmul.f32 %v8980_v30, %v2623_v33  ;;  %v2617_v7 = vmul.f32 1.0614054, %v9016_v47  ;;  %v9037_v27 = vand.u32 2147483647, %v9022_v41  ;;  %v8172_v12 = vpop.eup %8171 }
0x10ad   : > { %10174 = vst [vmem:[#allocation26_spill] sm:$0xff] %v9032_v46  ;;  %v2653_v20 = vadd.f32 -0.28449672, %v2645_v9  ;;  %8181 = vpow2.f32 %v2712_v51  ;;  %v3138_v18 = vmul.f32 1.442695, %v3130_v44  ;;  %v9047_v3 = vadd.f32 %v2989_v1, %v8902_v29 }
0x10ae   : > { %v9040_v19 = vmul.f32 0.70710677, %v9025_v53  ;;  %v2638_v59 = vadd.f32 1.4214138, %v2630_v10  ;;  %v3050_v26 = vmul.f32 1.0614054, %v9027_v63  ;;  %v2632_v50 = vmul.f32 %v8998_v58, %v2624_v43 }
0x10af   : > { %v3021_v33 = vmul.f32 0.3275911, %v9037_v27  ;;  %v2667_v60 = vadd.f32 0.2548296, %v2659_v25  ;;  %v9054_v51 = vadd.f32 %v2948_v21, %v8955_v24  ;;  %v2639_v44 = vadd.f32 1.4214138, %v2631_v15 }
0x10b0   : > { %v9051_v9 = vand.u32 2147483647, %v9040_v19  ;;  %v2625_v14 = vadd.f32 -1.4531521, %v2617_v7  ;;  %v9057_v10 = vmul.f32 0.5, %v8970_v0  ;;  %v2661_v22 = vmul.f32 %v8943_v5, %v2653_v20  ;;  %v2991_v0 = vpop.f32.mrf.mxu1 }
0x10b1   : > { %v3029_v56 = vadd.f32 1.0, %v3021_v33  ;;  %v3052_v29 = vmul.f32 1.0614054, %v9042_v54  ;;  %v9063_v43 = vmul.f32 0.70710677, %v9047_v3  ;;  %v2646_v1 = vmul.f32 %v8972_v16, %v2638_v59 }
0x10b2   : > { %v3022_v25 = vmul.f32 0.3275911, %v9051_v9  ;;  %v3058_v24 = vadd.f32 -1.4531521, %v3050_v26  ;;  %v9067_v15 = vmul.f32 0.70710677, %v9054_v51  ;;  %v2675_v21 = vmul.f32 %v8922_v42, %v2667_v60 }
0x10b3   : > { %8183 = vrcp.f32 %v3029_v56  ;;  %v9069_v7 = vpop.eup %8173  ;;  %v2640_v20 = vadd.f32 1.4214138, %v2632_v50  ;;  %v9073_v40 = vand.u32 2147483647, %v9063_v43  ;;  %v9076_v52 = vmul.f32 %v8934_v62, %v2650_v55 }
0x10b4   : > { %10175 = vst [vmem:[#allocation27_spill] sm:$0xff] %v9069_v7  ;;  %v3030_v33 = vadd.f32 1.0, %v3022_v25  ;;  %v2647_v59 = vmul.f32 %v8980_v30, %v2639_v44  ;;  %v2633_v56 = vmul.f32 %v9016_v47, %v2625_v14  ;;  %v9081_v26 = vand.u32 2147483647, %v9067_v15 }
0x10b5   : > { %10176 = vst [vmem:[#allocation28_spill] sm:$0xff] %v9076_v52  ;;  %v9083_v11 = vpop.eup %8175  ;;  %v2669_v8 = vadd.f32 0.2548296, %v2661_v22  ;;  %v3060_v7 = vadd.f32 -1.4531521, %v3052_v29  ;;  %v9086_v60 = vadd.f32 %v2991_v0, %v8958_v45  ;;  %v3066_v50 = vmul.f32 %v9027_v63, %v3058_v24 }
0x10b6   : > { %10177 = vst [vmem:[#allocation29_spill] sm:$0xff] %v9083_v11  ;;  %8185 = vrcp.f32 %v3030_v33  ;;  %v3123_v42 = vsub.f32 0.0, %v9004_v13  ;;  %v3024_v55 = vmul.f32 0.3275911, %v9073_v40  ;;  %v3023_v44 = vmul.f32 0.3275911, %v9081_v26 }
0x10b7   : > { %v9092_v14 = vpop.eup %8177  ;;  %v9094_v25 = vmul.f32 %v8168_v23, %v2675_v21  ;;  %v2654_v62 = vadd.f32 -0.28449672, %v2646_v1  ;;  %v2648_v22 = vmul.f32 %v8998_v58, %v2640_v20  ;;  %8187 = vpow2.f32 %v3138_v18 }
0x10b8   : > { %v2655_v45 = vadd.f32 -0.28449672, %v2647_v59  ;;  %v2641_v0 = vadd.f32 1.4214138, %v2633_v56  ;;  %v3032_v33 = vadd.f32 1.0, %v3024_v55  ;;  %v3031_v24 = vadd.f32 1.0, %v3023_v44 }
0x10b9   : > { %v9097_v29 = vpop.eup %8179  ;;  %v2677_v11 = vmul.f32 %v8943_v5, %v2669_v8  ;;  %v9103_v46 = vmul.f32 0.70710677, %v9086_v60  ;;  %v3074_v1 = vadd.f32 1.4214138, %v3066_v50  ;;  %v3068_v18 = vmul.f32 %v9042_v54, %v3060_v7 }
0x10ba   : > { %v3051_v2 = vmul.f32 1.0614054, %v9097_v29  ;;  %v9105_v23 = vpop.eup %8181  ;;  %v3131_v21 = vmul.f32 %v3123_v42, %v9004_v13  ;;  %8189 = vrcp.f32 %v3032_v33  ;;  %v3126_v59 = vsub.f32 0.0, %v9051_v9 }
0x10bb   : > { %8191 = vrcp.f32 %v3031_v24  ;;  %v9111_v5 = vand.u32 2147483647, %v9103_v46  ;;  %v2662_v56 = vmul.f32 %v8972_v16, %v2654_v62  ;;  %v9115_v55 = vadd.f32 -0.28449672, %v2648_v22 }
0x10bc   : > { %v3059_v20 = vadd.f32 -1.4531521, %v3051_v2  ;;  %v2663_v50 = vmul.f32 %v8980_v30, %v2655_v45  ;;  %v2649_v7 = vmul.f32 %v9016_v47, %v2641_v0  ;;  %v3125_v2 = vsub.f32 0.0, %v9037_v27 }
0x10bd   : > { %v3025_v42 = vmul.f32 0.3275911, %v9111_v5  ;;  %v9122_v44 = vmul.f32 %v8172_v12, %v2677_v11  ;;  %v3082_v33 = vmul.f32 %v9027_v63, %v3074_v1  ;;  %v3076_v24 = vadd.f32 1.4214138, %v3068_v18 }
0x10be   : > { %v3067_v13 = vmul.f32 %v9097_v29, %v3059_v20  ;;  %v3132_v8 = vmul.f32 %v3124_v36, %v8941_v4  ;;  %v3140_v16 = vmul.f32 1.442695, %v3131_v21  ;;  %v3134_v45 = vmul.f32 %v3126_v59, %v9051_v9 }
0x10bf   : > { %v3033_v0 = vadd.f32 1.0, %v3025_v42  ;;  %v2671_v48 = vadd.f32 0.2548296, %v2663_v50  ;;  %v3128_v52 = vsub.f32 0.0, %v9073_v40  ;;  %v3127_v12 = vsub.f32 0.0, %v9081_v26 }
0x10c0   : > { %v9126_v62 = vpop.eup %8183  ;;  %v3075_v22 = vadd.f32 1.4214138, %v3067_v13  ;;  %v2657_v11 = vadd.f32 -0.28449672, %v2649_v7  ;;  %v3133_v18 = vmul.f32 %v3125_v2, %v9037_v27  ;;  %v3090_v36 = vadd.f32 -0.28449672, %v3082_v33 }
0x10c1   : > { %v3053_v20 = vmul.f32 1.0614054, %v9126_v62  ;;  %8193 = vrcp.f32 %v3033_v0  ;;  %v3084_v21 = vmul.f32 %v9042_v54, %v3076_v24  ;;  %v3142_v9 = vmul.f32 1.442695, %v3132_v8 }
0x10c2   : > { %v3083_v1 = vmul.f32 %v9097_v29, %v3075_v22  ;;  %8195 = vpow2.f32 %v3140_v16  ;;  %v3146_v42 = vmul.f32 1.442695, %v3134_v45  ;;  %v9140_v7 = vadd.f32 0.2548296, %v2662_v56 }
0x10c3   : > { %v9134_v4 = vpop.eup %8185  ;;  %v3061_v59 = vadd.f32 -1.4531521, %v3053_v20  ;;  %v3136_v27 = vmul.f32 %v3128_v52, %v9073_v40  ;;  %v3135_v2 = vmul.f32 %v3127_v12, %v9081_v26  ;;  %v2679_v33 = vmul.f32 %v8980_v30, %v2671_v48 }
0x10c4   : > { %v3091_v50 = vadd.f32 -0.28449672, %v3083_v1  ;;  %v3054_v13 = vmul.f32 1.0614054, %v9134_v4  ;;  %v9138_v37 = vpop.eup %8187  ;;  %v3144_v24 = vmul.f32 1.442695, %v3133_v18  ;;  %v3098_v16 = vmul.f32 %v9027_v63, %v3090_v36 }
0x10c5   : > { %v3069_v22 = vmul.f32 %v9126_v62, %v3061_v59  ;;  %8197 = vpow2.f32 %v3142_v9  ;;  %v3129_v20 = vsub.f32 0.0, %v9111_v5  ;;  %v2665_v1 = vmul.f32 %v9016_v47, %v2657_v11 }
0x10c6   : > { %v3099_v8 = vmul.f32 %v9097_v29, %v3091_v50  ;;  %v3062_v0 = vadd.f32 -1.4531521, %v3054_v13  ;;  %v3092_v59 = vadd.f32 -0.28449672, %v3084_v21  ;;  %8199 = vpow2.f32 %v3146_v42 }
0x10c7   : > { %v3077_v45 = vadd.f32 1.4214138, %v3069_v22  ;;  %v9149_v56 = vpop.eup %8189  ;;  %v3150_v26 = vmul.f32 1.442695, %v3136_v27  ;;  %v3148_v12 = vmul.f32 1.442695, %v3135_v2  ;;  %8201 = vpow2.f32 %v3144_v24 }
0x10c8   : > { %v3070_v52 = vmul.f32 %v9134_v4, %v3062_v0  ;;  %v9153_v40 = vpop.eup %8191  ;;  %v3056_v48 = vmul.f32 1.0614054, %v9149_v56  ;;  %v3107_v18 = vadd.f32 0.2548296, %v3099_v8  ;;  %v3106_v50 = vadd.f32 0.2548296, %v3098_v16 }
0x10c9   : > { %v3085_v30 = vmul.f32 %v9126_v62, %v3077_v45  ;;  %v3055_v9 = vmul.f32 1.0614054, %v9153_v40  ;;  %v3137_v21 = vmul.f32 %v3129_v20, %v9111_v5  ;;  %v10178_v42 = vsub.f32 1.0, %v9094_v25 }
0x10ca   : > { %v3078_v36 = vadd.f32 1.4214138, %v3070_v52  ;;  %v3064_v11 = vadd.f32 -1.4531521, %v3056_v48  ;;  %v9163_v0 = vmul.f32 %v9092_v14, %v2679_v33  ;;  %v3100_v8 = vmul.f32 %v9042_v54, %v3092_v59 }
0x10cb   : > { %v3093_v13 = vadd.f32 -0.28449672, %v3085_v30  ;;  %v2739_v22 = vsub.f32 0.0, %v10178_v42  ;;  %v3063_v2 = vadd.f32 -1.4531521, %v3055_v9  ;;  %8203 = vpow2.f32 %v3150_v26 }
0x10cc   : > { %v3086_v27 = vmul.f32 %v9134_v4, %v3078_v36  ;;  %v3072_v16 = vmul.f32 %v9149_v56, %v3064_v11  ;;  %v3115_v5 = vmul.f32 %v9097_v29, %v3107_v18  ;;  %8205 = vpow2.f32 %v3148_v12 }
0x10cd   : > { %v3101_v24 = vmul.f32 %v9126_v62, %v3093_v13  ;;  %v3071_v20 = vmul.f32 %v9153_v40, %v3063_v2  ;;  %v2673_v14 = vadd.f32 0.2548296, %v2665_v1  ;;  %v3114_v33 = vmul.f32 %v9027_v63, %v3106_v50 }
0x10ce   : > { %v3094_v45 = vadd.f32 -0.28449672, %v3086_v27  ;;  %v9171_v52 = vpop.eup %8193  ;;  %v3080_v30 = vadd.f32 1.4214138, %v3072_v16  ;;  %v3152_v48 = vmul.f32 1.442695, %v3137_v21 }
0x10cf   : > { %v3109_v59 = vadd.f32 0.2548296, %v3101_v24  ;;  %v3079_v9 = vadd.f32 1.4214138, %v3071_v20  ;;  %v3057_v26 = vmul.f32 1.0614054, %v9171_v52  ;;  %v8196_v29 = vpop.eup %8195  ;;  %v2681_v42 = vmul.f32 %v9016_v47, %v2673_v14 }
0x10d0   : > { %v3102_v36 = vmul.f32 %v9134_v4, %v3094_v45  ;;  %v2725_v18 = vsub.f32 1.0, %v9122_v44  ;;  %v2727_v12 = vsub.f32 1.0, %v9163_v0  ;;  %v3108_v13 = vadd.f32 0.2548296, %v3100_v8 }
0x10d1   : > { %v3088_v1 = vmul.f32 %v9149_v56, %v3080_v30  ;;  %v3155_v63 = vmul.f32 %v8196_v29, %v3115_v5  ;;  %v3087_v11 = vmul.f32 %v9153_v40, %v3079_v9  ;;  %v3065_v21 = vadd.f32 -1.4531521, %v3057_v26 }
0x10d2   : > { %v3110_v50 = vadd.f32 0.2548296, %v3102_v36  ;;  %v3154_v27 = vmul.f32 %v9138_v37, %v3114_v33  ;;  %8207 = vpow2.f32 %v3152_v48  ;;  %v8198_v24 = vpop.eup %8197  ;;  %v3117_v44 = vmul.f32 %v9126_v62, %v3109_v59 }
0x10d3   : > { %v3096_v2 = vadd.f32 -0.28449672, %v3088_v1  ;;  %v3095_v8 = vadd.f32 -0.28449672, %v3087_v11  ;;  %v3073_v16 = vmul.f32 %v9171_v52, %v3065_v21  ;;  %v8200_v45 = vpop.eup %8199  ;;  %v10179_v5 = vsub.f32 1.0, %v9094_v25 }
0x10d4   : > { %v3118_v0 = vmul.f32 %v9134_v4, %v3110_v50  ;;  %v2741_v30 = vsub.f32 0.0, %v2725_v18  ;;  %v3116_v47 = vmul.f32 %v9042_v54, %v3108_v13  ;;  %v3163_v14 = vsub.f32 1.0, %v3155_v63  ;;  %v8202_v48 = vpop.eup %8201 }
0x10d5   : > { %v2747_v20 = vsel %vm2731_vm6, %v2739_v22, %v10179_v5  ;;  %v3104_v37 = vmul.f32 %v9149_v56, %v3096_v2  ;;  %v3103_v4 = vmul.f32 %v9153_v40, %v3095_v8  ;;  %v3081_v33 = vadd.f32 1.4214138, %v3073_v16 }
0x10d6   : > { %v3158_v62 = vmul.f32 %v8200_v45, %v3118_v0  ;;  %v2743_v59 = vsub.f32 0.0, %v2727_v12  ;;  %v2721_v36 = vmul.f32 %v9105_v23, %v2681_v42  ;;  %v3162_v25 = vsub.f32 1.0, %v3154_v27 }
0x10d7   : > { %v3112_v9 = vadd.f32 0.2548296, %v3104_v37  ;;  %v3157_v49 = vmul.f32 %v8202_v48, %v3117_v44  ;;  %v3111_v26 = vadd.f32 0.2548296, %v3103_v4  ;;  %v3089_v54 = vmul.f32 %v9171_v52, %v3081_v33 }
0x10d8   : > { %v3166_v22 = vsub.f32 1.0, %v3158_v62  ;;  %v2755_v29 = vadd.f32 1.0, %v2747_v20  ;;  %v2749_v13 = vsel %vm2733_vm7, %v2741_v30, %v2725_v18  ;;  %v3156_v1 = vmul.f32 %v8198_v24, %v3116_v47  ;;  %v8204_v50 = vpop.eup %8203 }
0x10d9   : > { %v3120_v63 = vmul.f32 %v9149_v56, %v3112_v9  ;;  %v3179_v11 = vsub.f32 0.0, %v3163_v14  ;;  %v3119_v2 = vmul.f32 %v9153_v40, %v3111_v26  ;;  %v3097_v23 = vadd.f32 -0.28449672, %v3089_v54  ;;  %v8206_v42 = vpop.eup %8205 }
0x10da   : > { %v3182_v21 = vsub.f32 0.0, %v3166_v22  ;;  %v2751_v27 = vsel %vm2735_vm8, %v2743_v59, %v2727_v12  ;;  %v2729_v44 = vsub.f32 1.0, %v2721_v36  ;;  %v3178_v0 = vsub.f32 0.0, %v3162_v25 }
0x10db   : > { %v3160_v8 = vmul.f32 %v8204_v50, %v3120_v63  ;;  %v3165_v61 = vsub.f32 1.0, %v3157_v49  ;;  %vm3174_vm12 = vcmp.lt.f32.partialorder %v9040_v19, 0.0  ;;  %v3159_v56 = vmul.f32 %v8206_v42, %v3119_v2  ;;  %v7955_v42 = vld [vmem:[%s8457_s3 + $0x70] sm:$0xff]  }
0x10dc   : > { %v3105_v18 = vmul.f32 %v9171_v52, %v3097_v23  ;;  %v3164_v24 = vsub.f32 1.0, %v3156_v1  ;;  %vm3171_vm13 = vcmp.lt.f32.partialorder %v8989_v35, 0.0  ;;  %v3190_v40 = vsel %vm3174_vm12, %v3182_v21, %v3166_v22  ;;  %v7953_v21 = vld [vmem:[%s8457_s3 + $0x38] sm:$0xff]  }
0x10dd   : > { %v3168_v16 = vsub.f32 1.0, %v3160_v8  ;;  %v2763_v17 = vmul.f32 %v2755_v29, %v8965_v57  ;;  %v3187_v12 = vsel %vm3171_vm13, %v3179_v11, %v3163_v14  ;;  %v3167_v45 = vsub.f32 1.0, %v3159_v56 }
0x10de   : > { %v3113_v5 = vadd.f32 0.2548296, %v3105_v18  ;;  %v2759_v20 = vadd.f32 1.0, %v2751_v27  ;;  %v2745_v30 = vsub.f32 0.0, %v2729_v44  ;;  %v3186_v47 = vsel %vm3170_vm9, %v3178_v0, %v3162_v25 }
0x10df   : > { %v3184_v37 = vsub.f32 0.0, %v3168_v16  ;;  %v8208_v19 = vpop.eup %8207  ;;  %v3181_v62 = vsub.f32 0.0, %v3165_v61  ;;  %v3198_v4 = vadd.f32 1.0, %v3190_v40  ;;  %v3183_v33 = vsub.f32 0.0, %v3167_v45  ;;  %v7959_v40 = vld [vmem:[%s8457_s3 + $0x68] sm:$0xff]  }
0x10e0   : > { %v3121_v48 = vmul.f32 %v9171_v52, %v3113_v5  ;;  %v3180_v35 = vsub.f32 0.0, %v3164_v24  ;;  %v3195_v59 = vadd.f32 1.0, %v3187_v12  ;;  %v2998_v36 = vmul.f32 0.5, %v9025_v53  ;;  %v10185_v12 = vld [vmem:[#allocation23_spill] sm:$0xff]  ;;  %v10186_v5 = vld [vmem:[#allocation22_spill] sm:$0xff] }
0x10e1   : > { %vm3175_vm14 = vcmp.lt.f32.partialorder %v9067_v15, 0.0  ;;  %v3194_v57 = vadd.f32 1.0, %v3186_v47  ;;  %vm3176_vm15 = vcmp.lt.f32.partialorder %v9063_v43, 0.0  ;;  %vm3173_vm0 = vcmp.lt.f32.partialorder %v9022_v41, 0.0  ;;  %v7954_v47 = vld [vmem:[%s8457_s3 + $0xb8] sm:$0xff]  }
0x10e2   : > { %v3191_v14 = vsel %vm3175_vm14, %v3183_v33, %v3167_v45  ;;  %v3161_v9 = vmul.f32 %v8208_v19, %v3121_v48  ;;  %v3192_v39 = vsel %vm3176_vm15, %v3184_v37, %v3168_v16  ;;  %v2999_v25 = vmul.f32 0.5, %v9054_v51  ;;  %v10184_v16 = vld [vmem:[#allocation21_spill] sm:$0xff]  ;;  %v7956_v19 = vld [vmem:[%s8457_s3 + $0xf0] sm:$0xff]  }
0x10e3   : > { %v3199_v49 = vadd.f32 1.0, %v3191_v14  ;;  %v2753_v52 = vsel %vm2737_vm10, %v2745_v30, %v2729_v44  ;;  %v3189_v22 = vsel %vm3173_vm0, %v3181_v62, %v3165_v61  ;;  %v3206_v26 = vmul.f32 %v3198_v4, %v2998_v36  ;;  %v10180_v44 = vld [vmem:[#allocation19_spill] sm:$0xff]  ;;  %v10187_v62 = vld [vmem:[#allocation20_spill] sm:$0xff] }
0x10e4   : > { %v3169_v53 = vsub.f32 1.0, %v3161_v9  ;;  %v2767_v15 = vmul.f32 %v2759_v20, %v8993_v32  ;;  %v3188_v43 = vsel %vm3172_vm11, %v3180_v35, %v3164_v24  ;;  %v3203_v54 = vmul.f32 %v3195_v59, %v9057_v10  ;;  %v7957_v24 = vld [vmem:[%s8457_s3 + $0x30] sm:$0xff]   ;;  %v7961_v35 = vld [vmem:[%s8457_s3 + $0x28] sm:$0xff]   ;;  %v7963_v59 = vld [vmem:[%s8457_s3 + $0x60] sm:$0xff]  }
0x10e5   : > { %v3207_v41 = vmul.f32 %v3199_v49, %v2999_v25  ;;  %v2757_v29 = vadd.f32 1.0, %v2749_v13  ;;  %v3202_v51 = vmul.f32 %v3194_v57, %v9014_v38  ;;  %v3200_v1 = vadd.f32 1.0, %v3192_v39  ;;  %v7958_v14 = vld [vmem:[%s8457_s3 + $0xb0] sm:$0xff]   ;;  %v7960_v9 = vld [vmem:[%s8457_s3 + $0xe8] sm:$0xff]   ;;  %v10189_v39 = vld [vmem:[#allocation25_spill] sm:$0xff] }
0x10e6   : > { %v3185_v63 = vsub.f32 0.0, %v3169_v53  ;;  %v2761_v34 = vadd.f32 1.0, %v2753_v52  ;;  %v3197_v50 = vadd.f32 1.0, %v3189_v22  ;;  %vm3177_vm1 = vcmp.lt.f32.partialorder %v9103_v46, 0.0  ;;  %v7965_v52 = vld [vmem:[%s8457_s3 + $0x20] sm:$0xff]   ;;  %v7967_v22 = vld [vmem:[%s8457_s3 + $0x58] sm:$0xff]  }
0x10e7   : > { %v3211_v11 = vpack.c.bf16 %v3207_v41, %v3203_v54  ;;  %v3196_v2 = vadd.f32 1.0, %v3188_v43  ;;  %v3210_v32 = vpack.c.bf16 %v3206_v26, %v3202_v51  ;;  %v3000_v28 = vmul.f32 0.5, %v9047_v3  ;;  %v10181_v3 = vld [vmem:[#allocation28_spill] sm:$0xff]  ;;  %v7964_v43 = vld [vmem:[%s8457_s3 + $0xe0] sm:$0xff]  }
0x10e8   : > { %v3193_v23 = vsel %vm3177_vm1, %v3185_v63, %v3169_v53  ;;  %v2997_v10 = vmul.f32 0.5, %v9007_v6  ;;  %v3001_v13 = vmul.f32 0.5, %v9086_v60  ;;  %v2771_v27 = vpack.c.bf16 %v2767_v15, %v2763_v17  ;;  %v10182_v6 = vld [vmem:[#allocation24_spill] sm:$0xff]  ;;  %v7962_v15 = vld [vmem:[%s8457_s3 + $0xa8] sm:$0xff]  }
0x10e9   : > { %v3201_v38 = vadd.f32 1.0, %v3193_v23  ;;  %3502 = vmatprep.mubr.bf16.mxu0 %v3211_v11  ;;  %8209 = vpow2.f32 %v8982_v31  ;;  %v2664_v46 = vmul.f32 %v8998_v58, %v9115_v55  ;;  %v2996_v0 = vmul.f32 0.5, %v10180_v44  ;;  %v10183_v55 = vld [vmem:[#allocation26_spill] sm:$0xff]  ;;  %v7968_v11 = vld [vmem:[%s8457_s3 + $0xd8] sm:$0xff]  }
0x10ea   : > { %v3208_v8 = vmul.f32 %v3200_v1, %v3000_v28  ;;  %3503 = vmatmul.mubr.bf16.vlgmr.msra.gmra.mxu0 %v3210_v32  ;;  %v2666_v61 = vadd.f32 0.2548296, %v10181_v3  ;;  %v2769_v56 = vmul.f32 %v2761_v34, %v10182_v6  ;;  %v3205_v60 = vmul.f32 %v3197_v50, %v2997_v10  ;;  %v7971_v1 = vld [vmem:[%s8457_s3 + $0x50] sm:$0xff]   ;;  %v7966_v50 = vld [vmem:[%s8457_s3 + $0xa0] sm:$0xff]   ;;  %v10191_v28 = vld [vmem:[#allocation16_spill] sm:$0xff] }
0x10eb   : > { %v3209_v18 = vmul.f32 %v3201_v38, %v3001_v13  ;;  %7430 = vmatpush3.bf16.msra.mxu0 %v7953_v21  ;;  %3776 = vmatprep.mubr.bf16.mxu0 %v2771_v27  ;;  %v3204_v31 = vmul.f32 %v3196_v2, %v2996_v0  ;;  %v2660_v17 = vmul.f32 %v10184_v16, %v10183_v55  ;;  %v2672_v33 = vadd.f32 0.2548296, %v2664_v46  ;;  %v7973_v32 = vld [vmem:[%s8457_s3 + $0x10] sm:$0xff]   ;;  %v7975_v23 = vld [vmem:[%s8457_s3 + $0x48] sm:$0xff]   ;;  %v7970_v13 = vld [vmem:[%s8457_s3 + $0x98] sm:$0xff]  }
0x10ec   : > { %7431 = vmatprep.subr.bf16.mxu0 %v7955_v42  ;;  %v2765_v45 = vmul.f32 %v2757_v29, %v10185_v12  ;;  %v2678_v20 = vmul.f32 %v10186_v5, %v9140_v7  ;;  %v2674_v4 = vmul.f32 %v10187_v62, %v2666_v61  ;;  %v10188_v7 = vld [vmem:[#allocation27_spill] sm:$0xff]  ;;  %v10190_v29 = vld [vmem:[#allocation29_spill] sm:$0xff]  ;;  %vm2734_vm3 = vcmp.lt.f32.partialorder %v10191_v28, 0.0  ;;  %v7977_v0 = vld [vmem:[%s8457_s3 + $0x8] sm:$0xff]  }
0x10ed   : > { %v3213_v30 = vpack.c.bf16 %v3209_v18, %v3205_v60  ;;  %v3212_v37 = vpack.c.bf16 %v3208_v8, %v3204_v31  ;;  %v2668_v36 = vadd.f32 0.2548296, %v2660_v17  ;;  %v2680_v49 = vmul.f32 %v8998_v58, %v2672_v33  ;;  %v7969_v58 = vld [vmem:[%s8457_s3 + $0x18] sm:$0xff]   ;;  %v10192_v38 = vld [vmem:[#allocation13_spill] sm:$0xff]  ;;  %v7972_v27 = vld [vmem:[%s8457_s3 + $0xd0] sm:$0xff]  }
0x10ee   : > { %v2773_v48 = vpack.c.bf16 %v2769_v56, %v2765_v45  ;;  %v2718_v57 = vmul.f32 %v10188_v7, %v2678_v20  ;;  %v2714_v25 = vmul.f32 %v10189_v39, %v2674_v4  ;;  %vm2730_vm4 = vcmp.lt.f32.partialorder %v10192_v38, 0.0  ;;  %v7979_v3 = vld [vmem:[%s8457_s3 + $0x40] sm:$0xff]   ;;  %v7974_v6 = vld [vmem:[%s8457_s3 + $0x90] sm:$0xff]   ;;  %v7976_v55 = vld [vmem:[%s8457_s3 + $0xc8] sm:$0xff]  }
0x10ef   : > { %3543 = vmatprep.mubr.bf16.mxu1 %v3213_v30  ;;  %7432 = vmatpush3.bf16.msra.mxu0 %v7957_v24  ;;  %v2676_v26 = vmul.f32 %v10184_v16, %v2668_v36  ;;  %v2720_v51 = vmul.f32 %v10190_v29, %v2680_v49  ;;  %v3830_v56 = vld [vmem:[%s8447_s12 + $0xe0] sm:$0xff]  ;;  %v10193_v24 = vld [vmem:[#allocation15_spill] sm:$0xff]  ;;  %v10196_v5 = vld [vmem:[#allocation14_spill] sm:$0xff] }
0x10f0   : > { %3544 = vmatmul.mubr.bf16.vlgmr.msra.gmra.mxu1 %v3212_v37  ;;  %7433 = vmatprep.subr.bf16.mxu0 %v7959_v40  ;;  %v2726_v53 = vsub.f32 1.0, %v2718_v57  ;;  %v2722_v41 = vsub.f32 1.0, %v2714_v25  ;;  %v3832_v60 = vld [vmem:[%s8447_s12 + $0x140] sm:$0xff]  ;;  %v2558_v31 = vmul.f32 0.5, %v10193_v24  ;;  %v10194_v40 = vld [vmem:[#allocation18_spill] sm:$0xff]  ;;  %v10195_v12 = vld [vmem:[#allocation11_spill] sm:$0xff] }
0x10f1   : > { %7452 = vmatpush3.bf16.msra.mxu1 %v7954_v47  ;;  %3817 = vmatprep.mubr.bf16.mxu1 %v2773_v48  ;;  %v2728_v2 = vsub.f32 1.0, %v2720_v51  ;;  %vm2736_vm5 = vcmp.lt.f32.partialorder %v10194_v40, 0.0  ;;  %v7981_v17 = vld [vmem:[%s8457_s3] sm:$0xff]   ;;  %v2554_v45 = vmul.f32 0.5, %v10195_v12  ;;  %vm2732_vm6 = vcmp.lt.f32.partialorder %v10196_v5, 0.0  ;;  %v7978_v37 = vld [vmem:[%s8457_s3 + $0x88] sm:$0xff]  }
0x10f2   : > { %7453 = vmatprep.subr.bf16.mxu1 %v7956_v19  ;;  %v2742_v34 = vsub.f32 0.0, %v2726_v53  ;;  %v2738_v21 = vsub.f32 0.0, %v2722_v41  ;;  %v7138_v30 = vcombine.high %v3830_v56, %v3832_v60  ;;  %v3826_v19 = vld [vmem:[%s8447_s12 + $0x20] sm:$0xff]  ;;  %v3833_v36 = vld [vmem:[%s8447_s12 + $0x148] sm:$0xff]  ;;  %v10198_v49 = vld [vmem:[#allocation12_spill] sm:$0xff] }
0x10f3   : > { %7434 = vmatpush3.bf16.msra.mxu0 %v7961_v35  ;;  %v2744_v44 = vsub.f32 0.0, %v2728_v2  ;;  %v3828_v62 = vld [vmem:[%s8447_s12 + $0x80] sm:$0xff]  ;;  %v7137_v35 = vcombine.low %v3830_v56, %v3832_v60  ;;  %v7989_v28 = vld [vmem:[%s8457_s3 + $0x230] sm:$0xff]   ;;  %v7994_v38 = vld [vmem:[%s8457_s3 + $0x2a8] sm:$0xff]  }
0x10f4   : > { %7435 = vmatprep.subr.bf16.mxu0 %v7963_v59  ;;  %v2750_v10 = vsel %vm2734_vm3, %v2742_v34, %v2726_v53  ;;  %v2746_v46 = vsel %vm2730_vm4, %v2738_v21, %v2722_v41  ;;  %v7980_v48 = vld [vmem:[%s8457_s3 + $0xc0] sm:$0xff]   ;;  %v3831_v59 = vld [vmem:[%s8447_s12 + $0xe8] sm:$0xff]  ;;  %v7134_v39 = vcombine.high %v3826_v19, %v3828_v62  ;;  %v7133_v53 = vcombine.low %v3826_v19, %v3828_v62  ;;  %v7983_v34 = vld [vmem:[%s8457_s3 + $0x278] sm:$0xff]  }
0x10f5   : > { %7454 = vmatpush3.bf16.msra.mxu1 %v7958_v14  ;;  %v2758_v8 = vadd.f32 1.0, %v2750_v10  ;;  %v2754_v18 = vadd.f32 1.0, %v2746_v46  ;;  %v2752_v16 = vsel %vm2736_vm5, %v2744_v44, %v2728_v2  ;;  %v10197_v14 = vld [vmem:[#allocation17_spill] sm:$0xff]  ;;  %v7139_v29 = vcombine.low %v3831_v59, %v3833_v36  ;;  %v7986_v21 = vld [vmem:[%s8457_s3 + $0x2b8] sm:$0xff]   ;;  %v7987_v2 = vld [vmem:[%s8457_s3 + $0x270] sm:$0xff]  }
0x10f6   : > { %7455 = vmatprep.subr.bf16.mxu1 %v7960_v9  ;;  %v8210_v54 = vpop.eup %8209  ;;  %v2760_v33 = vadd.f32 1.0, %v2752_v16  ;;  %v2560_v9 = vmul.f32 0.5, %v10197_v14  ;;  %v7982_v25 = vld [vmem:[%s8457_s3 + $0x80] sm:$0xff]   ;;  %v7992_v10 = vld [vmem:[%s8457_s3 + $0x2e8] sm:$0xff]   ;;  %v8003_v56 = vld [vmem:[%s8457_s3 + $0x250] sm:$0xff]  }
0x10f7   : > { %7436 = vmatpush3.bf16.msra.mxu0 %v7965_v52  ;;  %v2716_v63 = vmul.f32 %v8210_v54, %v2676_v26  ;;  %v2766_v20 = vmul.f32 %v2758_v8, %v2558_v31  ;;  %v2762_v4 = vmul.f32 %v2754_v18, %v2554_v45  ;;  %v2556_v52 = vmul.f32 0.5, %v10198_v49  ;;  %v7996_v46 = vld [vmem:[%s8457_s3 + $0x2e0] sm:$0xff]   ;;  %v7999_v8 = vld [vmem:[%s8457_s3 + $0x258] sm:$0xff]   ;;  %v8004_v60 = vld [vmem:[%s8457_s3 + $0x2d0] sm:$0xff]  }
0x10f8   : > { %7437 = vmatprep.subr.bf16.mxu0 %v7967_v22  ;;  %v2768_v22 = vmul.f32 %v2760_v33, %v2560_v9  ;;  %v7140_v26 = vcombine.high %v3831_v59, %v3833_v36  ;;  %v10199_v54 = vmov 0   ;;  %v7997_v44 = vld [vmem:[%s8457_s3 + $0x220] sm:$0xff]   ;;  %v8005_v18 = vld [vmem:[%s8457_s3 + $0x210] sm:$0xff]   ;;  %v8007_v31 = vld [vmem:[%s8457_s3 + $0x248] sm:$0xff]  }
0x10f9   : > { %7456 = vmatpush3.bf16.msra.mxu1 %v7962_v15  ;;  %v2724_v42 = vsub.f32 1.0, %v2716_v63  ;;  %v2770_v57 = vpack.c.bf16 %v2766_v20, %v2762_v4  ;;  %v3827_v15 = vld [vmem:[%s8447_s12 + $0x28] sm:$0xff]  ;;  %v10200_v63 = vld [vmem:[#allocation9_spill] sm:$0xff]  ;;  %v8006_v24 = vld [vmem:[%s8457_s3 + $0x290] sm:$0xff]  }
0x10fa   : > { %7457 = vmatprep.subr.bf16.mxu1 %v7964_v43  ;;  %v3829_v43 = vld [vmem:[%s8447_s12 + $0x88] sm:$0xff]  ;;  %v8012_v12 = vld [vmem:[%s8457_s3 + $0x2c0] sm:$0xff]   ;;  %v9330_v20 = vld [vmem:[%s8447_s12 + $0xf0] sm:$0xff] }
0x10fb   : > { %7438 = vmatpush3.bf16.msra.mxu0 %v7969_v58  ;;  %v2740_v61 = vsub.f32 0.0, %v2724_v42  ;;  %v7136_v58 = vcombine.high %v3827_v15, %v3829_v43  ;;  %v8008_v40 = vld [vmem:[%s8457_s3 + $0x2c8] sm:$0xff]   ;;  %v8013_v45 = vld [vmem:[%s8457_s3 + $0x200] sm:$0xff]   ;;  %v9341_v19 = vld [vmem:[%s8447_s12 + $0x158] sm:$0xff] }
0x10fc   : > { %7439 = vmatprep.subr.bf16.mxu0 %v7971_v1  ;;  %v7135_v1 = vcombine.low %v3827_v15, %v3829_v43  ;;  %v8010_v16 = vld [vmem:[%s8457_s3 + $0x288] sm:$0xff]   ;;  %v8014_v5 = vld [vmem:[%s8457_s3 + $0x280] sm:$0xff]  }
0x10fd   : > { %7458 = vmatpush3.bf16.msra.mxu1 %v7966_v50  ;;  %v2748_v47 = vsel %vm2732_vm6, %v2740_v61, %v2724_v42  ;;  %v7984_v50 = vld [vmem:[%s8457_s3 + $0x2f8] sm:$0xff]   ;;  %v7991_v42 = vld [vmem:[%s8457_s3 + $0x268] sm:$0xff]  }
0x10fe   : > { %7459 = vmatprep.subr.bf16.mxu1 %v7968_v11  ;;  %v2756_v7 = vadd.f32 1.0, %v2748_v47  ;;  %v7985_v11 = vld [vmem:[%s8457_s3 + $0x238] sm:$0xff]   ;;  %v3834_v43 = vld [vmem:[%s8452_s5 + $0x8] sm:$0xf] }
0x10ff   : > { %7440 = vmatpush3.bf16.msra.mxu0 %v7973_v32  ;;  %v7988_v32 = vld [vmem:[%s8457_s3 + $0x2f0] sm:$0xff]   ;;  %v8001_v61 = vld [vmem:[%s8457_s3 + $0x218] sm:$0xff]  }
0x1100   : > { %7441 = vmatprep.subr.bf16.mxu0 %v7975_v23  ;;  %v2764_v41 = vmul.f32 %v2756_v7, %v2556_v52  ;;  %v7990_v23 = vld [vmem:[%s8457_s3 + $0x2b0] sm:$0xff]   ;;  %v9336_v47 = vld [vmem:[%s8447_s12 + $0xf8] sm:$0xff] }
0x1101   : > { %7460 = vmatpush3.bf16.msra.mxu1 %v7970_v13  ;;  %v7993_v13 = vld [vmem:[%s8457_s3 + $0x228] sm:$0xff]   ;;  %v7181_v4 = vcombine.low %v9336_v47, %v9341_v19  ;;  %v7182_v33 = vcombine.high %v9336_v47, %v9341_v19  ;;  %v8017_v47 = vld [vmem:[%s8457_s3 + $0x338] sm:$0xff]  }
0x1102   : > { %7461 = vmatprep.subr.bf16.mxu1 %v7972_v27  ;;  %v2772_v51 = vpack.c.bf16 %v2768_v22, %v2764_v41  ;;  %v7995_v27 = vld [vmem:[%s8457_s3 + $0x260] sm:$0xff]   ;;  %v8018_v19 = vld [vmem:[%s8457_s3 + $0x3b8] sm:$0xff]  }
0x1103   : > { %7442 = vmatpush3.bf16.msra.mxu0 %v7977_v0  ;;  %v7998_v0 = vld [vmem:[%s8457_s3 + $0x2a0] sm:$0xff]  }
0x1104   : > { %7443 = vmatprep.subr.bf16.mxu0 %v7979_v3  ;;  %v8000_v3 = vld [vmem:[%s8457_s3 + $0x2d8] sm:$0xff]  }
0x1105   : > { %7462 = vmatpush3.bf16.msra.mxu1 %v7974_v6  ;;  %v8002_v6 = vld [vmem:[%s8457_s3 + $0x298] sm:$0xff]  }
0x1106   : > { %7463 = vmatprep.subr.bf16.mxu1 %v7976_v55  ;;  %v8009_v55 = vld [vmem:[%s8457_s3 + $0x208] sm:$0xff]  }
0x1107   : > { %7444 = vmatpush3.bf16.msra.mxu0 %v7981_v17  ;;  %v8011_v17 = vld [vmem:[%s8457_s3 + $0x240] sm:$0xff]  }
0x1108   : > { %3908 = vmatprep.subr.bf16.mxu0 %v7138_v30  ;;  %v9333_v30 = vld [vmem:[%s8447_s12 + $0x150] sm:$0xff] }
0x1109   : > { %7464 = vmatpush3.bf16.msra.mxu1 %v7978_v37  ;;  %v7180_v37 = vcombine.high %v9330_v20, %v9333_v30  ;;  %v7179_v62 = vcombine.low %v9330_v20, %v9333_v30  ;;  %v8015_v20 = vld [vmem:[%s8457_s3 + $0x378] sm:$0xff]  }
0x110a   : > { %7465 = vmatprep.subr.bf16.mxu1 %v7980_v48  ;;  %3777 = vmatmul.mubr.bf16.vlgmr.msra.gmra.mxu0 %v2770_v57  ;;  %v8016_v30 = vld [vmem:[%s8457_s3 + $0x3f8] sm:$0xff]  }
0x110b   : > { %3909 = vmatpush1.bf16.msra.mxu0 %v7137_v35  ;;  %3928 = vmatprep.mubr.bf16.mxu0 %v10199_v54 }
0x110c   : > { %3910 = vmatprep.subr.bf16.mxu0 %v7134_v39 }
0x110d   : > { %7466 = vmatpush3.bf16.msra.mxu1 %v7982_v25 }
0x110e   : > { %3951 = vmatprep.subr.bf16.mxu1 %v7140_v26 }
0x110f   : > { %3911 = vmatpush1.bf16.msra.mxu0 %v7133_v53 }
0x1110   : > { %3818 = vmatmul.mubr.bf16.vlgmr.msra.gmra.mxu1 %v2772_v51  ;;  %7473 = vmatprep.subr.bf16.mxu0 %v7983_v34 }
0x1111   : > { %3952 = vmatpush1.bf16.msra.mxu1 %v7139_v29  ;;  %3971 = vmatprep.mubr.bf16.mxu1 %v10199_v54 }
0x1112   : > { %3953 = vmatprep.subr.bf16.mxu1 %v7136_v58  ;;  %7141 = vmatmul.mubr.msk.bf16.vlgmr.msra.gmra.mxu0 %vm499_vm2, %v10200_v63  ;;  %v10201_v58 = vld [vmem:[#allocation4_spill] sm:$0xff] }
0x1113   : > { %7474 = vmatpush3.bf16.msra.mxu0 %v7985_v11 }
0x1114   : > { %7475 = vmatprep.subr.bf16.mxu0 %v7987_v2 }
0x1115   : > { %3954 = vmatpush1.bf16.msra.mxu1 %v7135_v1  ;;  %v3839_v1 = vrot.slane %v3834_v43, %v10201_v58 }
0x1116   : > { %7495 = vmatprep.subr.bf16.mxu1 %v7984_v50 }
0x1117   : > { %7476 = vmatpush3.bf16.msra.mxu0 %v7989_v28 }
0x1118   : > { %7142 = vmatmul.mubr.msk.bf16.vlgmr.msra.gmra.mxu1 %vm499_vm2, %v10200_v63  ;;  %7477 = vmatprep.subr.bf16.mxu0 %v7991_v42 }
0x1119   : > { %7496 = vmatpush3.bf16.msra.mxu1 %v7986_v21  ;;  %v10202_v21 = vld [vmem:[#allocation5_spill] sm:$0xff] }
0x111a   : > { %7497 = vmatprep.subr.bf16.mxu1 %v7988_v32  ;;  %v3843_v2 = vrot.slane %v3834_v43, %v10202_v21 }
0x111b   : > { %7478 = vmatpush3.bf16.msra.mxu0 %v7993_v13 }
0x111c   : > { %7479 = vmatprep.subr.bf16.mxu0 %v7995_v27 }
0x111d   : > { %7498 = vmatpush3.bf16.msra.mxu1 %v7990_v23 }
0x111e   : > { %7499 = vmatprep.subr.bf16.mxu1 %v7992_v10 }
0x111f   : > { %7480 = vmatpush3.bf16.msra.mxu0 %v7997_v44  ;;  %v10203_v44 = vld [vmem:[#allocation6_spill] sm:$0xff] }
0x1120   : > { %7481 = vmatprep.subr.bf16.mxu0 %v7999_v8 }
0x1121   : > { %7500 = vmatpush3.bf16.msra.mxu1 %v7994_v38 }
0x1122   : > { %7501 = vmatprep.subr.bf16.mxu1 %v7996_v46 }
0x1123   : > { %7482 = vmatpush3.bf16.msra.mxu0 %v8001_v61 }
0x1124   : > { %7483 = vmatprep.subr.bf16.mxu0 %v8003_v56 }
0x1125   : > { %7502 = vmatpush3.bf16.msra.mxu1 %v7998_v0  ;;  %v3847_v0 = vrot.slane %v3834_v43, %v10203_v44 }
0x1126   : > { %7503 = vmatprep.subr.bf16.mxu1 %v8000_v3 }
0x1127   : > { %7484 = vmatpush3.bf16.msra.mxu0 %v8005_v18 }
0x1128   : > { %7485 = vmatprep.subr.bf16.mxu0 %v8007_v31 }
0x1129   : > { %7504 = vmatpush3.bf16.msra.mxu1 %v8002_v6 }
0x112a   : > { %7505 = vmatprep.subr.bf16.mxu1 %v8004_v60 }
0x112b   : > { %7486 = vmatpush3.bf16.msra.mxu0 %v8009_v55 }
0x112c   : > { %7487 = vmatprep.subr.bf16.mxu0 %v8011_v17 }
0x112d   : > { %7506 = vmatpush3.bf16.msra.mxu1 %v8006_v24  ;;  %v10204_v24 = vld [vmem:[#allocation10_spill] sm:$0xff] }
0x112e   : > { %7507 = vmatprep.subr.bf16.mxu1 %v8008_v40  ;;  %v3851_v31 = vrot.slane %v3834_v43, %v10204_v24 }
0x112f   : > { %7488 = vmatpush3.bf16.msra.mxu0 %v8013_v45 }
0x1130   : > { %4624 = vmatprep.subr.bf16.mxu0 %v7180_v37 }
0x1131   : > { %7508 = vmatpush3.bf16.msra.mxu1 %v8010_v16 }
0x1132   : > { %7509 = vmatprep.subr.bf16.mxu1 %v8012_v12 }
0x1135   : > { %7510 = vmatpush3.bf16.msra.mxu1 %v8014_v5 }
0x1136   : > { %4667 = vmatprep.subr.bf16.mxu1 %v7182_v33 }
0x11aa   : > { %v7401_v48 = vpop.f32.mrf.mxu0 }
0x11ac   : > { %v7402_v35 = vpop.f32.mrf.mxu0 }
0x11ad   : > { %v7403_v59 = vadd.f32 %v7402_v35, %v7401_v48 }
0x11ae   : > { %v7404_v36 = vpop.f32.mrf.mxu0 }
0x11b0   : > { %v7423_v7 = vpop.f32.mrf.mxu1  ;;  %v7405_v57 = vpop.f32.mrf.mxu0 }
0x11b1   : > { %v7406_v14 = vadd.f32 %v7405_v57, %v7404_v36 }
0x11b2   : > { %v7424_v9 = vpop.f32.mrf.mxu1 }
0x11b3   : > { %v7425_v39 = vadd.f32 %v7424_v9, %v7423_v7 }
0x11b4   : > { %v7426_v25 = vpop.f32.mrf.mxu1 }
0x11b5   : > { %v3546_v49 = vadd.f32 %v7425_v39, %v7403_v59 }
0x11b6   : > { %v7427_v52 = vpop.f32.mrf.mxu1 }
0x11b7   : > { %v7428_v22 = vadd.f32 %v7427_v52, %v7426_v25 }
0x11b9   : > { %v3549_v26 = vadd.f32 %v7428_v22, %v7406_v14 }
0x11ca   : > { %v7445_v53 = vpop.f32.mrf.mxu0 }
0x11cc   : > { %v7446_v15 = vpop.f32.mrf.mxu0 }
0x11cd   : > { %v7447_v41 = vadd.f32 %v7446_v15, %v7445_v53 }
0x11ce   : > { %v7448_v29 = vpop.f32.mrf.mxu0 }
0x11cf   : > { %v3779_v51 = vadd.f32 %v7447_v41, %v3546_v49 }
0x11d0   : > { %v7467_v34 = vpop.f32.mrf.mxu1  ;;  %v7449_v50 = vpop.f32.mrf.mxu0 }
0x11d1   : > { %v7450_v11 = vadd.f32 %v7449_v50, %v7448_v29 }
0x11d2   : > { %v7468_v32 = vpop.f32.mrf.mxu1  ;;  %v3930_v28 = vpop.f32.mrf.mxu0 }
0x11d3   : > { %v7469_v23 = vadd.f32 %v7468_v32, %v7467_v34  ;;  %v3782_v42 = vadd.f32 %v7450_v11, %v3549_v26  ;;  %v9352_v10 = vadd.f32 %v3930_v28, %v3839_v1 }
0x11d4   : > { %v7470_v13 = vpop.f32.mrf.mxu1  ;;  %v3932_v38 = vpop.f32.mrf.mxu0 }
0x11d5   : > { %v9354_v27 = vadd.f32 %v7469_v23, %v3779_v51  ;;  %v9357_v46 = vmul.f32 0.70710677, %v9352_v10  ;;  %v9360_v8 = vadd.f32 %v3932_v38, %v3843_v2 }
0x11d6   : > { %v7471_v3 = vpop.f32.mrf.mxu1  ;;  %v3934_v61 = vpop.f32.mrf.mxu0 }
0x11d7   : > { %v7472_v6 = vadd.f32 %v7471_v3, %v7470_v13  ;;  %v3998_v56 = vand.u32 2147483647, %v9357_v46  ;;  %v9364_v18 = vmul.f32 0.70710677, %v9360_v8  ;;  %v9367_v40 = vadd.f32 %v3934_v61, %v3839_v1 }
0x11d8   : > { %v3973_v60 = vpop.f32.mrf.mxu1  ;;  %v3936_v22 = vpop.f32.mrf.mxu0  ;;  %vm4158_vm7 = vcmp.lt.f32.partialorder %v9357_v46, 0.0 }
0x11d9   : > { %v9369_v55 = vadd.f32 %v7472_v6, %v3782_v42  ;;  %v4006_v16 = vmul.f32 0.3275911, %v3998_v56  ;;  %v9371_v17 = vadd.f32 %v3973_v60, %v3847_v0  ;;  %v3999_v12 = vand.u32 2147483647, %v9364_v18 }
0x11da   : > { %v3975_v45 = vpop.f32.mrf.mxu1  ;;  %v9375_v5 = vmul.f32 0.70710677, %v9367_v40  ;;  %v9390_v43 = vadd.f32 %v3936_v22, %v3843_v2  ;;  %v4110_v42 = vsub.f32 0.0, %v3998_v56  ;;  %vm4159_vm9 = vcmp.lt.f32.partialorder %v9364_v18, 0.0 }
0x11db   : > { %v4014_v37 = vadd.f32 1.0, %v4006_v16  ;;  %v9378_v33 = vmul.f32 0.70710677, %v9371_v17  ;;  %v4007_v48 = vmul.f32 0.3275911, %v3999_v12  ;;  %v9380_v35 = vadd.f32 %v3975_v45, %v3851_v31 }
0x11dc   : > { %v4002_v59 = vand.u32 2147483647, %v9375_v5  ;;  %v3977_v25 = vpop.f32.mrf.mxu1  ;;  %v9396_v51 = vmul.f32 0.70710677, %v9390_v43  ;;  %v4111_v50 = vsub.f32 0.0, %v3999_v12  ;;  %vm4162_vm8 = vcmp.lt.f32.partialorder %v9375_v5, 0.0 }
0x11dd   : > { %8211 = vrcp.f32 %v4014_v37  ;;  %v4000_v36 = vand.u32 2147483647, %v9378_v33  ;;  %v4015_v7 = vadd.f32 1.0, %v4007_v48  ;;  %v9385_v57 = vmul.f32 0.70710677, %v9380_v35 }
0x11de   : > { %v4010_v9 = vmul.f32 0.3275911, %v4002_v59  ;;  %v9388_v53 = vadd.f32 %v3977_v25, %v3847_v0  ;;  %v3979_v41 = vpop.f32.mrf.mxu1  ;;  %v9402_v11 = vand.u32 2147483647, %v9396_v51  ;;  %v4114_v32 = vsub.f32 0.0, %v4002_v59 }
0x11df   : > { %v4008_v14 = vmul.f32 0.3275911, %v4000_v36  ;;  %8213 = vrcp.f32 %v4015_v7  ;;  %v4001_v39 = vand.u32 2147483647, %v9385_v57  ;;  %v9399_v34 = vadd.f32 %v3979_v41, %v3851_v31 }
0x11e0   : > { %v4018_v52 = vadd.f32 1.0, %v4010_v9  ;;  %v9393_v29 = vmul.f32 0.70710677, %v9388_v53  ;;  %v4011_v13 = vmul.f32 0.3275911, %v9402_v11  ;;  %v4112_v0 = vsub.f32 0.0, %v4000_v36 }
0x11e1   : > { %v4016_v49 = vadd.f32 1.0, %v4008_v14  ;;  %v4009_v26 = vmul.f32 0.3275911, %v4001_v39  ;;  %v9405_v2 = vmul.f32 0.70710677, %v9399_v34  ;;  %v4119_v6 = vmul.f32 %v4111_v50, %v3999_v12 }
0x11e2   : > { %v4004_v1 = vand.u32 2147483647, %v9393_v29  ;;  %v4113_v60 = vsub.f32 0.0, %v4001_v39  ;;  %v4019_v31 = vadd.f32 1.0, %v4011_v13  ;;  %v4122_v37 = vmul.f32 %v4114_v32, %v4002_v59 }
0x11e3   : > { %8215 = vrcp.f32 %v4016_v49  ;;  %v4017_v15 = vadd.f32 1.0, %v4009_v26  ;;  %v9412_v61 = vand.u32 2147483647, %v9405_v2  ;;  %v4118_v7 = vmul.f32 %v4110_v42, %v3998_v56 }
0x11e4   : > { %8217 = vrcp.f32 %v4018_v52  ;;  %v4012_v28 = vmul.f32 0.3275911, %v4004_v1  ;;  %v4120_v25 = vmul.f32 %v4112_v0, %v4000_v36  ;;  %v4128_v22 = vmul.f32 1.442695, %v4119_v6 }
0x11e5   : > { %8219 = vrcp.f32 %v4017_v15  ;;  %v4013_v48 = vmul.f32 0.3275911, %v9412_v61  ;;  %v4121_v26 = vmul.f32 %v4113_v60, %v4001_v39  ;;  %v4134_v50 = vmul.f32 1.442695, %v4122_v37 }
0x11e6   : > { %v4020_v3 = vadd.f32 1.0, %v4012_v28  ;;  %v4126_v56 = vmul.f32 1.442695, %v4118_v7  ;;  %v4116_v0 = vsub.f32 0.0, %v4004_v1  ;;  %vm4160_vm10 = vcmp.lt.f32.partialorder %v9378_v33, 0.0 }
0x11e7   : > { %v4021_v49 = vadd.f32 1.0, %v4013_v48  ;;  %vm4164_vm11 = vcmp.lt.f32.partialorder %v9393_v29, 0.0  ;;  %vm4161_vm12 = vcmp.lt.f32.partialorder %v9385_v57, 0.0  ;;  %vm4163_vm13 = vcmp.lt.f32.partialorder %v9396_v51, 0.0 }
0x11e8   : > { %8221 = vrcp.f32 %v4020_v3  ;;  %v3986_v46 = vmul.f32 0.5, %v9367_v40  ;;  %v3987_v29 = vmul.f32 0.5, %v9390_v43  ;;  %vm4165_vm14 = vcmp.lt.f32.partialorder %v9405_v2, 0.0  ;;  %v4544_v40 = vld [vmem:[%s8447_s12 + $0x90] sm:$0xff] }
0x11e9   : > { %8223 = vrcp.f32 %v4019_v31  ;;  %v4132_v31 = vmul.f32 1.442695, %v4121_v26  ;;  %v3989_v43 = vmul.f32 0.5, %v9399_v34 }
0x11ea   : > { %v9407_v23 = vpop.eup %8211  ;;  %8225 = vrcp.f32 %v4021_v49  ;;  %v4117_v49 = vsub.f32 0.0, %v9412_v61 }
0x11eb   : > { %v4038_v38 = vmul.f32 1.0614054, %v9407_v23  ;;  %8227 = vpow2.f32 %v4128_v22 }
0x11ec   : > { %v9414_v16 = vpop.eup %8213  ;;  %8229 = vpow2.f32 %v4134_v50 }
0x11ed   : > { %v4046_v45 = vadd.f32 -1.4531521, %v4038_v38  ;;  %v4039_v14 = vmul.f32 1.0614054, %v9414_v16  ;;  %v4130_v38 = vmul.f32 1.442695, %v4120_v25  ;;  %8231 = vpow2.f32 %v4126_v56 }
0x11ee   : > { %v4124_v25 = vmul.f32 %v4116_v0, %v4004_v1 }
0x11ef   : > { %v4054_v9 = vmul.f32 %v9407_v23, %v4046_v45  ;;  %v4047_v12 = vadd.f32 -1.4531521, %v4039_v14  ;;  %v4115_v45 = vsub.f32 0.0, %v9402_v11  ;;  %8233 = vpow2.f32 %v4130_v38 }
0x11f0   : > { %v9419_v52 = vpop.eup %8215  ;;  %8235 = vpow2.f32 %v4132_v31  ;;  %v4138_v0 = vmul.f32 1.442695, %v4124_v25 }
0x11f1   : > { %v9421_v15 = vpop.eup %8217  ;;  %v4062_v41 = vadd.f32 1.4214138, %v4054_v9  ;;  %v4040_v59 = vmul.f32 1.0614054, %v9419_v52  ;;  %v4055_v32 = vmul.f32 %v9414_v16, %v4047_v12 }
0x11f2   : > { %v4042_v28 = vmul.f32 1.0614054, %v9421_v15  ;;  %v9426_v42 = vpop.eup %8219  ;;  %8237 = vpow2.f32 %v4138_v0 }
0x11f3   : > { %v4070_v36 = vmul.f32 %v9407_v23, %v4062_v41  ;;  %v4048_v13 = vadd.f32 -1.4531521, %v4040_v59  ;;  %v4063_v39 = vadd.f32 1.4214138, %v4055_v32  ;;  %v4041_v3 = vmul.f32 1.0614054, %v9426_v42 }
0x11f4   : > { %v4050_v6 = vadd.f32 -1.4531521, %v4042_v28  ;;  %v4123_v59 = vmul.f32 %v4115_v45, %v9402_v11 }
0x11f5   : > { %v4056_v60 = vmul.f32 %v9419_v52, %v4048_v13  ;;  %v4078_v37 = vadd.f32 -0.28449672, %v4070_v36  ;;  %v4071_v48 = vmul.f32 %v9414_v16, %v4063_v39  ;;  %v4049_v7 = vadd.f32 -1.4531521, %v4041_v3  ;;  %v9438_v50 = vpop.eup %8221 }
0x11f6   : > { %v4058_v14 = vmul.f32 %v9421_v15, %v4050_v6  ;;  %v9443_v36 = vpop.eup %8223  ;;  %v4044_v38 = vmul.f32 1.0614054, %v9438_v50  ;;  %v4125_v39 = vmul.f32 %v4117_v49, %v9412_v61 }
0x11f7   : > { %v4064_v9 = vadd.f32 1.4214138, %v4056_v60  ;;  %v4079_v12 = vadd.f32 -0.28449672, %v4071_v48  ;;  %v4057_v22 = vmul.f32 %v9426_v42, %v4049_v7  ;;  %v4086_v32 = vmul.f32 %v9407_v23, %v4078_v37  ;;  %v9450_v48 = vpop.eup %8225 }
0x11f8   : > { %v4066_v41 = vadd.f32 1.4214138, %v4058_v14  ;;  %v4043_v60 = vmul.f32 1.0614054, %v9443_v36  ;;  %v4052_v45 = vadd.f32 -1.4531521, %v4044_v38 }
0x11f9   : > { %v4072_v26 = vmul.f32 %v9419_v52, %v4064_v9  ;;  %v4087_v56 = vmul.f32 %v9414_v16, %v4079_v12  ;;  %v4065_v28 = vadd.f32 1.4214138, %v4057_v22  ;;  %v4136_v37 = vmul.f32 1.442695, %v4123_v59 }
0x11fa   : > { %v4074_v1 = vmul.f32 %v9421_v15, %v4066_v41  ;;  %v4094_v7 = vadd.f32 0.2548296, %v4086_v32  ;;  %v4051_v12 = vadd.f32 -1.4531521, %v4043_v60  ;;  %v4060_v25 = vmul.f32 %v9438_v50, %v4052_v45 }
0x11fb   : > { %v4080_v13 = vadd.f32 -0.28449672, %v4072_v26  ;;  %v4095_v3 = vadd.f32 0.2548296, %v4087_v56  ;;  %v4073_v11 = vmul.f32 %v9426_v42, %v4065_v28  ;;  %v4045_v61 = vmul.f32 1.0614054, %v9450_v48  ;;  %v8228_v56 = vpop.eup %8227 }
0x11fc   : > { %v4082_v6 = vadd.f32 -0.28449672, %v4074_v1  ;;  %v4140_v49 = vmul.f32 1.442695, %v4125_v39  ;;  %v4059_v59 = vmul.f32 %v9443_v36, %v4051_v12  ;;  %v4068_v32 = vadd.f32 1.4214138, %v4060_v25 }
0x11fd   : > { %v4088_v31 = vmul.f32 %v9419_v52, %v4080_v13  ;;  %v4081_v14 = vadd.f32 -0.28449672, %v4073_v11  ;;  %v4103_v22 = vmul.f32 %v9414_v16, %v4095_v3  ;;  %8239 = vpow2.f32 %v4136_v37  ;;  %v8230_v13 = vpop.eup %8229 }
0x11fe   : > { %v4090_v9 = vmul.f32 %v9421_v15, %v4082_v6  ;;  %v4053_v1 = vadd.f32 -1.4531521, %v4045_v61  ;;  %v4102_v38 = vmul.f32 %v9407_v23, %v4094_v7  ;;  %v4067_v6 = vadd.f32 1.4214138, %v4059_v59  ;;  %v8232_v3 = vpop.eup %8231 }
0x11ff   : > { %v4089_v41 = vmul.f32 %v9426_v42, %v4081_v14  ;;  %v4096_v28 = vadd.f32 0.2548296, %v4088_v31  ;;  %v4076_v39 = vmul.f32 %v9438_v50, %v4068_v32  ;;  %v4143_v60 = vmul.f32 %v8228_v56, %v4103_v22  ;;  %v8234_v31 = vpop.eup %8233 }
0x1200   : > { %v4098_v26 = vadd.f32 0.2548296, %v4090_v9  ;;  %v4061_v16 = vmul.f32 %v9450_v48, %v4053_v1  ;;  %8241 = vpow2.f32 %v4140_v49  ;;  %v4075_v23 = vmul.f32 %v9443_v36, %v4067_v6  ;;  %v8236_v12 = vpop.eup %8235 }
0x1201   : > { %v4097_v11 = vadd.f32 0.2548296, %v4089_v41  ;;  %v4104_v37 = vmul.f32 %v9419_v52, %v4096_v28  ;;  %v4084_v9 = vadd.f32 -0.28449672, %v4076_v39 }
0x1202   : > { %v4106_v0 = vmul.f32 %v9421_v15, %v4098_v26  ;;  %v4069_v7 = vadd.f32 1.4214138, %v4061_v16  ;;  %v4142_v15 = vmul.f32 %v8232_v3, %v4102_v38  ;;  %v4083_v61 = vadd.f32 -0.28449672, %v4075_v23 }
0x1203   : > { %v4105_v45 = vmul.f32 %v9426_v42, %v4097_v11  ;;  %v4092_v25 = vmul.f32 %v9438_v50, %v4084_v9  ;;  %v4144_v59 = vmul.f32 %v8234_v31, %v4104_v37  ;;  %v4151_v42 = vsub.f32 1.0, %v4143_v60 }
0x1204   : > { %v4146_v14 = vmul.f32 %v8230_v13, %v4106_v0  ;;  %v4077_v22 = vmul.f32 %v9450_v48, %v4069_v7  ;;  %v4091_v49 = vmul.f32 %v9443_v36, %v4083_v61  ;;  %v4150_v32 = vsub.f32 1.0, %v4142_v15  ;;  %v8238_v13 = vpop.eup %8237 }
0x1205   : > { %v4145_v41 = vmul.f32 %v8236_v12, %v4105_v45  ;;  %v4100_v56 = vadd.f32 0.2548296, %v4092_v25  ;;  %v4152_v6 = vsub.f32 1.0, %v4144_v59  ;;  %v4167_v39 = vsub.f32 0.0, %v4151_v42 }
0x1206   : > { %v4154_v26 = vsub.f32 1.0, %v4146_v14  ;;  %v4085_v52 = vadd.f32 -0.28449672, %v4077_v22  ;;  %v4099_v1 = vadd.f32 0.2548296, %v4091_v49  ;;  %v3982_v60 = vmul.f32 0.5, %v9352_v10 }
0x1207   : > { %v4108_v28 = vmul.f32 %v9438_v50, %v4100_v56  ;;  %v4153_v11 = vsub.f32 1.0, %v4145_v41  ;;  %v4166_v14 = vsub.f32 0.0, %v4150_v32  ;;  %v3983_v50 = vmul.f32 0.5, %v9360_v8 }
0x1208   : > { %v4170_v38 = vsub.f32 0.0, %v4154_v26  ;;  %v4093_v0 = vmul.f32 %v9450_v48, %v4085_v52  ;;  %v4107_v3 = vmul.f32 %v9443_v36, %v4099_v1  ;;  %v4168_v15 = vsub.f32 0.0, %v4152_v6 }
0x1209   : > { %v4148_v16 = vmul.f32 %v8238_v13, %v4108_v28  ;;  %v4169_v23 = vsub.f32 0.0, %v4153_v11  ;;  %v4175_v25 = vsel %vm4159_vm9, %v4167_v39, %v4151_v42  ;;  %v4174_v41 = vsel %vm4158_vm7, %v4166_v14, %v4150_v32 }
0x120a   : > { %v8240_v45 = vpop.eup %8239  ;;  %v4101_v31 = vadd.f32 0.2548296, %v4093_v0  ;;  %v4178_v7 = vsel %vm4162_vm8, %v4170_v38, %v4154_v26  ;;  %v4183_v22 = vadd.f32 1.0, %v4175_v25  ;;  %v4182_v42 = vadd.f32 1.0, %v4174_v41  ;;  %v4542_v0 = vld [vmem:[%s8447_s12 + $0x30] sm:$0xff]  ;;  %v8024_v25 = vld [vmem:[%s8457_s3 + $0x3e8] sm:$0xff]  }
0x120b   : > { %v4156_v37 = vsub.f32 1.0, %v4148_v16  ;;  %v4147_v9 = vmul.f32 %v8240_v45, %v4107_v3  ;;  %v4186_v18 = vadd.f32 1.0, %v4178_v7  ;;  %v4176_v56 = vsel %vm4160_vm10, %v4168_v15, %v4152_v6  ;;  %v8023_v15 = vld [vmem:[%s8457_s3 + $0x368] sm:$0xff]   ;;  %v8027_v41 = vld [vmem:[%s8457_s3 + $0x360] sm:$0xff]  }
0x120c   : > { %v4109_v12 = vmul.f32 %v9450_v48, %v4101_v31  ;;  %v4177_v48 = vsel %vm4161_vm12, %v4169_v23, %v4153_v11  ;;  %v3988_v1 = vmul.f32 0.5, %v9388_v53  ;;  %v4184_v51 = vadd.f32 1.0, %v4176_v56  ;;  %v8036_v56 = vld [vmem:[%s8457_s3 + $0x3d0] sm:$0xff]  }
0x120d   : > { %v8242_v36 = vpop.eup %8241  ;;  %v4172_v10 = vsub.f32 0.0, %v4156_v37  ;;  %v4155_v61 = vsub.f32 1.0, %v4147_v9  ;;  %v4185_v52 = vadd.f32 1.0, %v4177_v48  ;;  %v4194_v28 = vmul.f32 %v4186_v18, %v3986_v46  ;;  %v4545_v9 = vld [vmem:[%s8447_s12 + $0x98] sm:$0xff]  ;;  %v8029_v18 = vld [vmem:[%s8457_s3 + $0x320] sm:$0xff]   ;;  %v8037_v46 = vld [vmem:[%s8457_s3 + $0x310] sm:$0xff]  }
0x120e   : > { %v4149_v8 = vmul.f32 %v8242_v36, %v4109_v12  ;;  %v4191_v13 = vmul.f32 %v4183_v22, %v3983_v50  ;;  %v4190_v6 = vmul.f32 %v4182_v42, %v3982_v60  ;;  %v3985_v39 = vmul.f32 0.5, %v9380_v35  ;;  %v8021_v12 = vld [vmem:[%s8457_s3 + $0x330] sm:$0xff]   ;;  %v8032_v22 = vld [vmem:[%s8457_s3 + $0x3d8] sm:$0xff]  }
0x120f   : > { %v4180_v5 = vsel %vm4164_vm11, %v4172_v10, %v4156_v37  ;;  %v4171_v26 = vsub.f32 0.0, %v4155_v61  ;;  %v3984_v3 = vmul.f32 0.5, %v9371_v17  ;;  %v7176_v50 = vcombine.high %v4542_v0, %v4544_v40  ;;  %v4543_v37 = vld [vmem:[%s8447_s12 + $0x38] sm:$0xff]  ;;  %v8022_v36 = vld [vmem:[%s8457_s3 + $0x3b0] sm:$0xff]   ;;  %v8025_v10 = vld [vmem:[%s8457_s3 + $0x328] sm:$0xff]  }
0x1210   : > { %v4157_v59 = vsub.f32 1.0, %v4149_v8  ;;  %v4188_v49 = vadd.f32 1.0, %v4180_v5  ;;  %v4193_v14 = vmul.f32 %v4185_v52, %v3985_v39  ;;  %v4198_v2 = vpack.c.bf16 %v4194_v28, %v4190_v6  ;;  %v8028_v8 = vld [vmem:[%s8457_s3 + $0x3e0] sm:$0xff]   ;;  %v8033_v48 = vld [vmem:[%s8457_s3 + $0x318] sm:$0xff]   ;;  %v8035_v42 = vld [vmem:[%s8457_s3 + $0x350] sm:$0xff]  }
0x1211   : > { %v4179_v33 = vsel %vm4163_vm13, %v4171_v26, %v4155_v61  ;;  %v4192_v23 = vmul.f32 %v4184_v51, %v3984_v3  ;;  %v7175_v17 = vcombine.low %v4542_v0, %v4544_v40  ;;  %v7178_v35 = vcombine.high %v4543_v37, %v4545_v9  ;;  %v8026_v61 = vld [vmem:[%s8457_s3 + $0x3a8] sm:$0xff]   ;;  %v8030_v5 = vld [vmem:[%s8457_s3 + $0x3a0] sm:$0xff]   ;;  %v8031_v26 = vld [vmem:[%s8457_s3 + $0x358] sm:$0xff]  }
0x1212   : > { %v4187_v32 = vadd.f32 1.0, %v4179_v33  ;;  %v4173_v57 = vsub.f32 0.0, %v4157_v59  ;;  %v4196_v45 = vmul.f32 %v4188_v49, %v3988_v1  ;;  %v7177_v34 = vcombine.low %v4543_v37, %v4545_v9  ;;  %v8038_v33 = vld [vmem:[%s8457_s3 + $0x390] sm:$0xff]   ;;  %v8039_v49 = vld [vmem:[%s8457_s3 + $0x348] sm:$0xff]   ;;  %v8043_v52 = vld [vmem:[%s8457_s3 + $0x340] sm:$0xff]  }
0x1213   : > { %v8044_v28 = vld [vmem:[%s8457_s3 + $0x3c0] sm:$0xff]   ;;  %v9550_v40 = vld [vmem:[%s8447_s12 + $0x168] sm:$0xff] }
0x1214   : > { %v4195_v11 = vmul.f32 %v4187_v32, %v3987_v29  ;;  %v4181_v38 = vsel %vm4165_vm14, %v4173_v57, %v4157_v59  ;;  %v4200_v60 = vpack.c.bf16 %v4196_v45, %v4192_v23  ;;  %v8034_v59 = vld [vmem:[%s8457_s3 + $0x398] sm:$0xff]   ;;  %v8040_v29 = vld [vmem:[%s8457_s3 + $0x3c8] sm:$0xff]   ;;  %v8045_v1 = vld [vmem:[%s8457_s3 + $0x300] sm:$0xff]  }
0x1215   : > { %v4189_v16 = vadd.f32 1.0, %v4181_v38  ;;  %v8041_v32 = vld [vmem:[%s8457_s3 + $0x308] sm:$0xff]   ;;  %v8046_v51 = vld [vmem:[%s8457_s3 + $0x380] sm:$0xff]  }
0x1216   : > { %v4199_v53 = vpack.c.bf16 %v4195_v11, %v4191_v13  ;;  %v8042_v57 = vld [vmem:[%s8457_s3 + $0x388] sm:$0xff]   ;;  %v9539_v13 = vld [vmem:[%s8447_s12 + $0x100] sm:$0xff] }
0x1217   : > { %v4197_v31 = vmul.f32 %v4189_v16, %v3989_v43  ;;  %v9542_v11 = vld [vmem:[%s8447_s12 + $0x160] sm:$0xff]  ;;  %v9545_v38 = vld [vmem:[%s8447_s12 + $0x108] sm:$0xff] }
0x1218   : > { %4490 = vmatprep.mubr.bf16.mxu0 %v4199_v53  ;;  %v7222_v0 = vcombine.high %v9539_v13, %v9542_v11  ;;  %v7221_v6 = vcombine.low %v9539_v13, %v9542_v11  ;;  %v7223_v39 = vcombine.low %v9545_v38, %v9550_v40  ;;  %v7224_v43 = vcombine.high %v9545_v38, %v9550_v40  ;;  %v4550_v45 = vld [vmem:[%s8452_s5 + $0xc] sm:$0xf]  ;;  %v8047_v13 = vld [vmem:[%s8457_s3 + $0x478] sm:$0xff]  }
0x1219   : > { %v4201_v7 = vpack.c.bf16 %v4197_v31, %v4193_v14  ;;  %4491 = vmatmul.mubr.bf16.vlgmr.msra.gmra.mxu0 %v4198_v2  ;;  %v8048_v11 = vld [vmem:[%s8457_s3 + $0x4f8] sm:$0xff]  }
0x121a   : > { %4625 = vmatpush1.bf16.msra.mxu0 %v7179_v62  ;;  %4644 = vmatprep.mubr.bf16.mxu0 %v10199_v54  ;;  %v8019_v62 = vld [vmem:[%s8457_s3 + $0x370] sm:$0xff]   ;;  %v8049_v38 = vld [vmem:[%s8457_s3 + $0x438] sm:$0xff]  }
0x121b   : > { %4531 = vmatprep.mubr.bf16.mxu1 %v4201_v7  ;;  %4626 = vmatprep.subr.bf16.mxu0 %v7176_v50  ;;  %v4555_v50 = vrot.slane %v4550_v45, %v10201_v58  ;;  %v8050_v40 = vld [vmem:[%s8457_s3 + $0x4b8] sm:$0xff]  }
0x121c   : > { %4532 = vmatmul.mubr.bf16.vlgmr.msra.gmra.mxu1 %v4200_v60  ;;  %v4559_v60 = vrot.slane %v4550_v45, %v10202_v21 }
0x121d   : > { %4668 = vmatpush1.bf16.msra.mxu1 %v7181_v4  ;;  %4687 = vmatprep.mubr.bf16.mxu1 %v10199_v54  ;;  %v8020_v4 = vld [vmem:[%s8457_s3 + $0x3f0] sm:$0xff]  }
0x121e   : > { %4669 = vmatprep.subr.bf16.mxu1 %v7178_v35  ;;  %4627 = vmatpush1.bf16.msra.mxu0 %v7175_v17 }
0x121f   : > { %7517 = vmatprep.subr.bf16.mxu0 %v8015_v20 }
0x1221   : > { %4670 = vmatpush1.bf16.msra.mxu1 %v7177_v34  ;;  %7183 = vmatmul.mubr.msk.bf16.vlgmr.msra.gmra.mxu0 %vm499_vm2, %v10200_v63  ;;  %v4563_v34 = vrot.slane %v4550_v45, %v10203_v44 }
0x1222   : > { %7539 = vmatprep.subr.bf16.mxu1 %v8016_v30  ;;  %7518 = vmatpush3.bf16.msra.mxu0 %v8017_v47 }
0x1223   : > { %7519 = vmatprep.subr.bf16.mxu0 %v8019_v62 }
0x1224   : > { %7184 = vmatmul.mubr.msk.bf16.vlgmr.msra.gmra.mxu1 %vm499_vm2, %v10200_v63 }
0x1225   : > { %7540 = vmatpush3.bf16.msra.mxu1 %v8018_v19 }
0x1226   : > { %7541 = vmatprep.subr.bf16.mxu1 %v8020_v4  ;;  %7520 = vmatpush3.bf16.msra.mxu0 %v8021_v12  ;;  %v4567_v4 = vrot.slane %v4550_v45, %v10204_v24 }
0x1227   : > { %7521 = vmatprep.subr.bf16.mxu0 %v8023_v15 }
0x1229   : > { %7542 = vmatpush3.bf16.msra.mxu1 %v8022_v36 }
0x122a   : > { %7543 = vmatprep.subr.bf16.mxu1 %v8024_v25  ;;  %7522 = vmatpush3.bf16.msra.mxu0 %v8025_v10 }
0x122b   : > { %7523 = vmatprep.subr.bf16.mxu0 %v8027_v41 }
0x122d   : > { %7544 = vmatpush3.bf16.msra.mxu1 %v8026_v61 }
0x122e   : > { %7545 = vmatprep.subr.bf16.mxu1 %v8028_v8  ;;  %7524 = vmatpush3.bf16.msra.mxu0 %v8029_v18 }
0x122f   : > { %7525 = vmatprep.subr.bf16.mxu0 %v8031_v26 }
0x1231   : > { %7546 = vmatpush3.bf16.msra.mxu1 %v8030_v5 }
0x1232   : > { %7547 = vmatprep.subr.bf16.mxu1 %v8032_v22  ;;  %7526 = vmatpush3.bf16.msra.mxu0 %v8033_v48 }
0x1233   : > { %7527 = vmatprep.subr.bf16.mxu0 %v8035_v42 }
0x1235   : > { %7548 = vmatpush3.bf16.msra.mxu1 %v8034_v59 }
0x1236   : > { %7549 = vmatprep.subr.bf16.mxu1 %v8036_v56  ;;  %7528 = vmatpush3.bf16.msra.mxu0 %v8037_v46 }
0x1237   : > { %7529 = vmatprep.subr.bf16.mxu0 %v8039_v49 }
0x1239   : > { %7550 = vmatpush3.bf16.msra.mxu1 %v8038_v33 }
0x123a   : > { %7551 = vmatprep.subr.bf16.mxu1 %v8040_v29  ;;  %7530 = vmatpush3.bf16.msra.mxu0 %v8041_v32 }
0x123b   : > { %7531 = vmatprep.subr.bf16.mxu0 %v8043_v52 }
0x123d   : > { %7552 = vmatpush3.bf16.msra.mxu1 %v8042_v57 }
0x123e   : > { %7553 = vmatprep.subr.bf16.mxu1 %v8044_v28  ;;  %7532 = vmatpush3.bf16.msra.mxu0 %v8045_v1 }
0x123f   : > { %5340 = vmatprep.subr.bf16.mxu0 %v7222_v0 }
0x1241   : > { %7554 = vmatpush3.bf16.msra.mxu1 %v8046_v51 }
0x1242   : > { %5383 = vmatprep.subr.bf16.mxu1 %v7224_v43 }
0x12d9   : > { %v7489_v16 = vpop.f32.mrf.mxu0 }
0x12db   : > { %v7490_v3 = vpop.f32.mrf.mxu0 }
0x12dc   : > { %v7511_v53 = vpop.f32.mrf.mxu1  ;;  %v7491_v14 = vadd.f32 %v7490_v3, %v7489_v16 }
0x12dd   : > { %v7492_v2 = vpop.f32.mrf.mxu0 }
0x12de   : > { %v7512_v31 = vpop.f32.mrf.mxu1 }
0x12df   : > { %v7513_v37 = vadd.f32 %v7512_v31, %v7511_v53  ;;  %v7493_v9 = vpop.f32.mrf.mxu0 }
0x12e0   : > { %v7514_v23 = vpop.f32.mrf.mxu1  ;;  %v7494_v7 = vadd.f32 %v7493_v9, %v7492_v2 }
0x12e1   : > { %v4534_v17 = vadd.f32 %v7513_v37, %v7491_v14  ;;  %v4646_v35 = vpop.f32.mrf.mxu0 }
0x12e2   : > { %v7515_v20 = vpop.f32.mrf.mxu1  ;;  %v9562_v30 = vadd.f32 %v4646_v35, %v4555_v50 }
0x12e3   : > { %v9565_v47 = vadd.f32 %v4534_v17, %v9354_v27  ;;  %v7516_v19 = vadd.f32 %v7515_v20, %v7514_v23  ;;  %v4648_v62 = vpop.f32.mrf.mxu0 }
0x12e4   : > { %v9569_v12 = vmul.f32 0.70710677, %v9562_v30  ;;  %v4689_v36 = vpop.f32.mrf.mxu1  ;;  %v9571_v15 = vadd.f32 %v4648_v62, %v4559_v60 }
0x12e5   : > { %v4537_v25 = vadd.f32 %v7516_v19, %v7494_v7  ;;  %v9573_v10 = vadd.f32 %v4689_v36, %v4563_v34  ;;  %v4650_v46 = vpop.f32.mrf.mxu0 }
0x12e6   : > { %v4714_v61 = vand.u32 2147483647, %v9569_v12  ;;  %v9577_v41 = vmul.f32 0.70710677, %v9571_v15  ;;  %v4691_v27 = vpop.f32.mrf.mxu1  ;;  %v9593_v52 = vadd.f32 %v4650_v46, %v4555_v50  ;;  %vm4874_vm15 = vcmp.lt.f32.partialorder %v9569_v12, 0.0 }
0x12e7   : > { %v9580_v8 = vadd.f32 %v4537_v25, %v9369_v55  ;;  %v9583_v18 = vmul.f32 0.70710677, %v9573_v10  ;;  %v9585_v5 = vadd.f32 %v4691_v27, %v4567_v4  ;;  %v4652_v1 = vpop.f32.mrf.mxu0 }
0x12e8   : > { %v4722_v26 = vmul.f32 0.3275911, %v4714_v61  ;;  %v4715_v22 = vand.u32 2147483647, %v9577_v41  ;;  %v4693_v49 = vpop.f32.mrf.mxu1  ;;  %v9598_v43 = vmul.f32 0.70710677, %v9593_v52  ;;  %v9603_v3 = vadd.f32 %v4652_v1, %v4559_v60 }
0x12e9   : > { %v4716_v48 = vand.u32 2147483647, %v9583_v18  ;;  %v9590_v59 = vmul.f32 0.70710677, %v9585_v5  ;;  %v9595_v28 = vadd.f32 %v4693_v49, %v4563_v34  ;;  %v4826_v14 = vsub.f32 0.0, %v4714_v61 }
0x12ea   : > { %v4730_v42 = vadd.f32 1.0, %v4722_v26  ;;  %v4723_v56 = vmul.f32 0.3275911, %v4715_v22  ;;  %v4695_v0 = vpop.f32.mrf.mxu1  ;;  %v4718_v45 = vand.u32 2147483647, %v9598_v43  ;;  %v4827_v35 = vsub.f32 0.0, %v4715_v22 }
0x12eb   : > { %v4724_v33 = vmul.f32 0.3275911, %v4716_v48  ;;  %v4717_v55 = vand.u32 2147483647, %v9590_v59  ;;  %v9601_v16 = vmul.f32 0.70710677, %v9595_v28  ;;  %v9606_v53 = vadd.f32 %v4695_v0, %v4567_v4 }
0x12ec   : > { %8243 = vrcp.f32 %v4730_v42  ;;  %v4731_v29 = vadd.f32 1.0, %v4723_v56  ;;  %v4726_v31 = vmul.f32 0.3275911, %v4718_v45  ;;  %v9610_v50 = vmul.f32 0.70710677, %v9603_v3 }
0x12ed   : > { %v4732_v32 = vadd.f32 1.0, %v4724_v33  ;;  %v4725_v57 = vmul.f32 0.3275911, %v4717_v55  ;;  %v4720_v2 = vand.u32 2147483647, %v9601_v16  ;;  %v4828_v23 = vsub.f32 0.0, %v4716_v48 }
0x12ee   : > { %v9613_v9 = vmul.f32 0.70710677, %v9606_v53  ;;  %v4734_v7 = vadd.f32 1.0, %v4726_v31  ;;  %v4719_v60 = vand.u32 2147483647, %v9610_v50  ;;  %v4834_v17 = vmul.f32 %v4826_v14, %v4714_v61 }
0x12ef   : > { %8245 = vrcp.f32 %v4732_v32  ;;  %v4733_v51 = vadd.f32 1.0, %v4725_v57  ;;  %v4728_v37 = vmul.f32 0.3275911, %v4720_v2  ;;  %v4829_v19 = vsub.f32 0.0, %v4717_v55 }
0x12f0   : > { %8247 = vrcp.f32 %v4731_v29  ;;  %v4721_v20 = vand.u32 2147483647, %v9613_v9  ;;  %v4727_v62 = vmul.f32 0.3275911, %v4719_v60  ;;  %v4836_v27 = vmul.f32 %v4828_v23, %v4716_v48 }
0x12f1   : > { %8249 = vrcp.f32 %v4733_v51  ;;  %v4736_v34 = vadd.f32 1.0, %v4728_v37  ;;  %v4830_v26 = vsub.f32 0.0, %v4718_v45  ;;  %v4842_v56 = vmul.f32 1.442695, %v4834_v17 }
0x12f2   : > { %8251 = vrcp.f32 %v4734_v7  ;;  %v4729_v36 = vmul.f32 0.3275911, %v4721_v20  ;;  %v4735_v42 = vadd.f32 1.0, %v4727_v62  ;;  %v4835_v46 = vmul.f32 %v4827_v35, %v4715_v22 }
0x12f3   : > { %8253 = vrcp.f32 %v4736_v34  ;;  %v4837_v29 = vmul.f32 %v4829_v19, %v4717_v55  ;;  %v4832_v32 = vsub.f32 0.0, %v4720_v2  ;;  %v4846_v0 = vmul.f32 1.442695, %v4836_v27 }
0x12f4   : > { %v4737_v33 = vadd.f32 1.0, %v4729_v36  ;;  %8255 = vrcp.f32 %v4735_v42  ;;  %v4838_v14 = vmul.f32 %v4830_v26, %v4718_v45  ;;  %v4844_v31 = vmul.f32 1.442695, %v4835_v46 }
0x12f5   : > { %v4848_v7 = vmul.f32 1.442695, %v4837_v29  ;;  %v4840_v17 = vmul.f32 %v4832_v32, %v4720_v2  ;;  %v4831_v19 = vsub.f32 0.0, %v4719_v60  ;;  %v4833_v62 = vsub.f32 0.0, %v4721_v20 }
0x12f6   : > { %8257 = vrcp.f32 %v4737_v33  ;;  %vm4875_vm0 = vcmp.lt.f32.partialorder %v9577_v41, 0.0  ;;  %vm4878_vm1 = vcmp.lt.f32.partialorder %v9598_v43, 0.0  ;;  %vm4876_vm3 = vcmp.lt.f32.partialorder %v9583_v18, 0.0 }
0x12f7   : > { %8259 = vpow2.f32 %v4842_v56  ;;  %v4854_v46 = vmul.f32 1.442695, %v4840_v17  ;;  %v4839_v29 = vmul.f32 %v4831_v19, %v4719_v60  ;;  %v4841_v32 = vmul.f32 %v4833_v62, %v4721_v20 }
0x12f8   : > { %8261 = vpow2.f32 %v4846_v0  ;;  %vm4880_vm4 = vcmp.lt.f32.partialorder %v9601_v16, 0.0  ;;  %vm4877_vm5 = vcmp.lt.f32.partialorder %v9590_v59, 0.0  ;;  %vm4879_vm6 = vcmp.lt.f32.partialorder %v9610_v50, 0.0 }
0x12f9   : > { %v9617_v4 = vpop.eup %8243  ;;  %8263 = vpow2.f32 %v4844_v31  ;;  %v4852_v17 = vmul.f32 1.442695, %v4839_v29  ;;  %v4702_v12 = vmul.f32 0.5, %v9593_v52  ;;  %v4703_v16 = vmul.f32 0.5, %v9603_v3  ;;  %v5260_v52 = vld [vmem:[%s8447_s12 + $0xa0] sm:$0xff] }
0x12fa   : > { %v4754_v25 = vmul.f32 1.0614054, %v9617_v4  ;;  %8265 = vpow2.f32 %v4848_v7  ;;  %vm4881_vm7 = vcmp.lt.f32.partialorder %v9613_v9, 0.0  ;;  %v4705_v3 = vmul.f32 0.5, %v9606_v53 }
0x12fc   : > { %v9620_v61 = vpop.eup %8245  ;;  %v4762_v49 = vadd.f32 -1.4531521, %v4754_v25  ;;  %v4850_v25 = vmul.f32 1.442695, %v4838_v14 }
0x12fd   : > { %v9622_v57 = vpop.eup %8247  ;;  %v4756_v1 = vmul.f32 1.0614054, %v9620_v61 }
0x12fe   : > { %v4770_v51 = vmul.f32 %v9617_v4, %v4762_v49  ;;  %v4755_v48 = vmul.f32 1.0614054, %v9622_v57  ;;  %v9627_v37 = vpop.eup %8249  ;;  %8267 = vpow2.f32 %v4850_v25 }
0x12ff   : > { %v4764_v22 = vadd.f32 -1.4531521, %v4756_v1  ;;  %v4757_v34 = vmul.f32 1.0614054, %v9627_v37  ;;  %v9633_v2 = vpop.eup %8251  ;;  %8269 = vpow2.f32 %v4854_v46 }
0x1300   : > { %v4778_v23 = vadd.f32 1.4214138, %v4770_v51  ;;  %v4763_v55 = vadd.f32 -1.4531521, %v4755_v48  ;;  %v9637_v1 = vpop.eup %8253  ;;  %v4758_v0 = vmul.f32 1.0614054, %v9633_v2  ;;  %8271 = vpow2.f32 %v4852_v17 }
0x1301   : > { %v4772_v35 = vmul.f32 %v9620_v61, %v4764_v22  ;;  %v4765_v26 = vadd.f32 -1.4531521, %v4757_v34  ;;  %v4760_v31 = vmul.f32 1.0614054, %v9637_v1  ;;  %v9643_v7 = vpop.eup %8255 }
0x1302   : > { %v4786_v36 = vmul.f32 %v9617_v4, %v4778_v23  ;;  %v4771_v45 = vmul.f32 %v9622_v57, %v4763_v55  ;;  %v4766_v55 = vadd.f32 -1.4531521, %v4758_v0 }
0x1303   : > { %v4780_v27 = vadd.f32 1.4214138, %v4772_v35  ;;  %v4773_v49 = vmul.f32 %v9627_v37, %v4765_v26  ;;  %v4768_v20 = vadd.f32 -1.4531521, %v4760_v31  ;;  %v4856_v35 = vmul.f32 1.442695, %v4841_v32  ;;  %v9646_v34 = vpop.eup %8257 }
0x1304   : > { %v4794_v42 = vadd.f32 -0.28449672, %v4786_v36  ;;  %v4779_v56 = vadd.f32 1.4214138, %v4771_v45  ;;  %v4774_v36 = vmul.f32 %v9633_v2, %v4766_v55  ;;  %v4759_v45 = vmul.f32 1.0614054, %v9643_v7 }
0x1305   : > { %v4788_v33 = vmul.f32 %v9620_v61, %v4780_v27  ;;  %v4781_v22 = vadd.f32 1.4214138, %v4773_v49  ;;  %v4776_v26 = vmul.f32 %v9637_v1, %v4768_v20  ;;  %8273 = vpow2.f32 %v4856_v35 }
0x1306   : > { %v4787_v51 = vmul.f32 %v9622_v57, %v4779_v56  ;;  %v4802_v48 = vmul.f32 %v9617_v4, %v4794_v42  ;;  %v4761_v42 = vmul.f32 1.0614054, %v9646_v34  ;;  %v8260_v56 = vpop.eup %8259  ;;  %v4767_v49 = vadd.f32 -1.4531521, %v4759_v45 }
0x1307   : > { %v4796_v14 = vadd.f32 -0.28449672, %v4788_v33  ;;  %v4789_v60 = vmul.f32 %v9627_v37, %v4781_v22  ;;  %v4782_v33 = vadd.f32 1.4214138, %v4774_v36  ;;  %v4784_v32 = vadd.f32 1.4214138, %v4776_v26  ;;  %v8262_v31 = vpop.eup %8261 }
0x1308   : > { %v4795_v23 = vadd.f32 -0.28449672, %v4787_v51  ;;  %v4810_v25 = vadd.f32 0.2548296, %v4802_v48  ;;  %v4769_v51 = vadd.f32 -1.4531521, %v4761_v42  ;;  %v4775_v48 = vmul.f32 %v9643_v7, %v4767_v49 }
0x1309   : > { %v4804_v19 = vmul.f32 %v9620_v61, %v4796_v14  ;;  %v4797_v27 = vadd.f32 -0.28449672, %v4789_v60  ;;  %v4790_v22 = vmul.f32 %v9633_v2, %v4782_v33  ;;  %v4792_v60 = vmul.f32 %v9637_v1, %v4784_v32 }
0x130a   : > { %v4803_v62 = vmul.f32 %v9622_v57, %v4795_v23  ;;  %v4818_v23 = vmul.f32 %v9617_v4, %v4810_v25  ;;  %v4777_v20 = vmul.f32 %v9646_v34, %v4769_v51  ;;  %v4783_v45 = vadd.f32 1.4214138, %v4775_v48 }
0x130b   : > { %v4805_v29 = vmul.f32 %v9627_v37, %v4797_v27  ;;  %v4812_v0 = vadd.f32 0.2548296, %v4804_v19  ;;  %v4798_v36 = vadd.f32 -0.28449672, %v4790_v22  ;;  %v4800_v27 = vadd.f32 -0.28449672, %v4792_v60 }
0x130c   : > { %v4811_v46 = vadd.f32 0.2548296, %v4803_v62  ;;  %v8264_v62 = vpop.eup %8263  ;;  %v4791_v4 = vmul.f32 %v9643_v7, %v4783_v45  ;;  %v4858_v33 = vmul.f32 %v8260_v56, %v4818_v23 }
0x130d   : > { %v4813_v55 = vadd.f32 0.2548296, %v4805_v29  ;;  %v8266_v17 = vpop.eup %8265  ;;  %v4820_v26 = vmul.f32 %v9620_v61, %v4812_v0  ;;  %v4808_v49 = vmul.f32 %v9637_v1, %v4800_v27 }
0x130e   : > { %v4819_v14 = vmul.f32 %v9622_v57, %v4811_v46  ;;  %v4785_v57 = vadd.f32 1.4214138, %v4777_v20  ;;  %v4806_v46 = vmul.f32 %v9633_v2, %v4798_v36  ;;  %v8268_v25 = vpop.eup %8267  ;;  %v4799_v32 = vadd.f32 -0.28449672, %v4791_v4 }
0x130f   : > { %v4821_v19 = vmul.f32 %v9627_v37, %v4813_v55  ;;  %v8270_v22 = vpop.eup %8269  ;;  %v4816_v48 = vadd.f32 0.2548296, %v4808_v49  ;;  %v4860_v55 = vmul.f32 %v8262_v31, %v4820_v26 }
0x1310   : > { %v4859_v42 = vmul.f32 %v8264_v62, %v4819_v14  ;;  %v4814_v29 = vadd.f32 0.2548296, %v4806_v46  ;;  %v4793_v51 = vmul.f32 %v9646_v34, %v4785_v57  ;;  %v4807_v0 = vmul.f32 %v9643_v7, %v4799_v32 }
0x1311   : > { %v4861_v37 = vmul.f32 %v8266_v17, %v4821_v19  ;;  %v4866_v14 = vsub.f32 1.0, %v4858_v33  ;;  %v4824_v60 = vmul.f32 %v9637_v1, %v4816_v48  ;;  %v4698_v62 = vmul.f32 0.5, %v9562_v30  ;;  %v8272_v17 = vpop.eup %8271 }
0x1312   : > { %v4867_v35 = vsub.f32 1.0, %v4859_v42  ;;  %v4822_v61 = vmul.f32 %v9633_v2, %v4814_v29  ;;  %v4801_v20 = vadd.f32 -0.28449672, %v4793_v51  ;;  %v4815_v23 = vadd.f32 0.2548296, %v4807_v0  ;;  %v8274_v29 = vpop.eup %8273 }
0x1313   : > { %v4869_v36 = vsub.f32 1.0, %v4861_v37  ;;  %v4864_v45 = vmul.f32 %v8270_v22, %v4824_v60  ;;  %v4868_v19 = vsub.f32 1.0, %v4860_v55  ;;  %v4882_v26 = vsub.f32 0.0, %v4866_v14 }
0x1314   : > { %v4862_v56 = vmul.f32 %v8268_v25, %v4822_v61  ;;  %v4809_v27 = vmul.f32 %v9646_v34, %v4801_v20  ;;  %v4883_v31 = vsub.f32 0.0, %v4867_v35  ;;  %v4823_v2 = vmul.f32 %v9643_v7, %v4815_v23 }
0x1315   : > { %v4872_v42 = vsub.f32 1.0, %v4864_v45  ;;  %v4699_v46 = vmul.f32 0.5, %v9571_v15  ;;  %v4885_v25 = vsub.f32 0.0, %v4869_v36  ;;  %v4884_v32 = vsub.f32 0.0, %v4868_v19 }
0x1316   : > { %v4870_v57 = vsub.f32 1.0, %v4862_v56  ;;  %v4817_v1 = vadd.f32 0.2548296, %v4809_v27  ;;  %v4863_v4 = vmul.f32 %v8272_v17, %v4823_v2  ;;  %v4891_v7 = vsel %vm4875_vm0, %v4883_v31, %v4867_v35  ;;  %v5258_v17 = vld [vmem:[%s8447_s12 + $0x40] sm:$0xff] }
0x1317   : > { %v4888_v33 = vsub.f32 0.0, %v4872_v42  ;;  %v4890_v37 = vsel %vm4874_vm15, %v4882_v26, %v4866_v14  ;;  %v4899_v55 = vadd.f32 1.0, %v4891_v7  ;;  %v4892_v0 = vsel %vm4876_vm3, %v4884_v32, %v4868_v19  ;;  %v8055_v32 = vld [vmem:[%s8457_s3 + $0x468] sm:$0xff]  }
0x1318   : > { %v4886_v30 = vsub.f32 0.0, %v4870_v57  ;;  %v4825_v49 = vmul.f32 %v9646_v34, %v4817_v1  ;;  %v4871_v22 = vsub.f32 1.0, %v4863_v4  ;;  %v4893_v34 = vsel %vm4877_vm5, %v4885_v25, %v4869_v36  ;;  %v5261_v4 = vld [vmem:[%s8447_s12 + $0xa8] sm:$0xff] }
0x1319   : > { %v4896_v43 = vsel %vm4880_vm4, %v4888_v33, %v4872_v42  ;;  %v4898_v61 = vadd.f32 1.0, %v4890_v37  ;;  %v4901_v20 = vadd.f32 1.0, %v4893_v34  ;;  %v4704_v23 = vmul.f32 0.5, %v9595_v28  ;;  %v8056_v7 = vld [vmem:[%s8457_s3 + $0x4e8] sm:$0xff]   ;;  %v8059_v37 = vld [vmem:[%s8457_s3 + $0x460] sm:$0xff]   ;;  %v8065_v34 = vld [vmem:[%s8457_s3 + $0x418] sm:$0xff]  }
0x131a   : > { %v4894_v51 = vsel %vm4878_vm1, %v4886_v30, %v4870_v57  ;;  %v4865_v15 = vmul.f32 %v8274_v29, %v4825_v49  ;;  %v4887_v48 = vsub.f32 0.0, %v4871_v22  ;;  %v4904_v14 = vadd.f32 1.0, %v4896_v43  ;;  %v5259_v30 = vld [vmem:[%s8447_s12 + $0x48] sm:$0xff]  ;;  %v8053_v49 = vld [vmem:[%s8457_s3 + $0x430] sm:$0xff]   ;;  %v8062_v43 = vld [vmem:[%s8457_s3 + $0x4a0] sm:$0xff]  }
0x131b   : > { %v4902_v41 = vadd.f32 1.0, %v4894_v51  ;;  %v4900_v50 = vadd.f32 1.0, %v4892_v0  ;;  %v4907_v36 = vmul.f32 %v4899_v55, %v4699_v46  ;;  %v4906_v19 = vmul.f32 %v4898_v61, %v4698_v62  ;;  %v8054_v29 = vld [vmem:[%s8457_s3 + $0x4b0] sm:$0xff]   ;;  %v8057_v51 = vld [vmem:[%s8457_s3 + $0x428] sm:$0xff]   ;;  %v8064_v55 = vld [vmem:[%s8457_s3 + $0x4d8] sm:$0xff]  }
0x131c   : > { %v4873_v35 = vsub.f32 1.0, %v4865_v15  ;;  %v4895_v18 = vsel %vm4879_vm6, %v4887_v48, %v4871_v22  ;;  %v4701_v31 = vmul.f32 0.5, %v9585_v5  ;;  %v4700_v2 = vmul.f32 0.5, %v9573_v10  ;;  %v8058_v22 = vld [vmem:[%s8457_s3 + $0x4a8] sm:$0xff]   ;;  %v8060_v15 = vld [vmem:[%s8457_s3 + $0x4e0] sm:$0xff]   ;;  %v8063_v48 = vld [vmem:[%s8457_s3 + $0x458] sm:$0xff]  }
0x131d   : > { %v4903_v60 = vadd.f32 1.0, %v4895_v18  ;;  %v4910_v56 = vmul.f32 %v4902_v41, %v4702_v12  ;;  %v4912_v26 = vmul.f32 %v4904_v14, %v4704_v23  ;;  %v7218_v46 = vcombine.high %v5258_v17, %v5260_v52  ;;  %v8061_v41 = vld [vmem:[%s8457_s3 + $0x420] sm:$0xff]   ;;  %v8067_v61 = vld [vmem:[%s8457_s3 + $0x450] sm:$0xff]   ;;  %v8071_v14 = vld [vmem:[%s8457_s3 + $0x448] sm:$0xff]  }
0x131e   : > { %v4889_v59 = vsub.f32 0.0, %v4873_v35  ;;  %v4909_v42 = vmul.f32 %v4901_v20, %v4701_v31  ;;  %v4908_v25 = vmul.f32 %v4900_v50, %v4700_v2  ;;  %v7217_v10 = vcombine.low %v5258_v17, %v5260_v52  ;;  %v8068_v0 = vld [vmem:[%s8457_s3 + $0x4d0] sm:$0xff]   ;;  %v8075_v20 = vld [vmem:[%s8457_s3 + $0x440] sm:$0xff]   ;;  %v9751_v52 = vld [vmem:[%s8447_s12 + $0x178] sm:$0xff] }
0x131f   : > { %v4911_v45 = vmul.f32 %v4903_v60, %v4703_v16  ;;  %v4914_v9 = vpack.c.bf16 %v4910_v56, %v4906_v19  ;;  %v7220_v5 = vcombine.high %v5259_v30, %v5261_v4  ;;  %v7219_v53 = vcombine.low %v5259_v30, %v5261_v4  ;;  %v8069_v12 = vld [vmem:[%s8457_s3 + $0x410] sm:$0xff]   ;;  %v8072_v16 = vld [vmem:[%s8457_s3 + $0x4c8] sm:$0xff]   ;;  %v8076_v56 = vld [vmem:[%s8457_s3 + $0x4c0] sm:$0xff]  }
0x1320   : > { %v4897_v27 = vsel %vm4881_vm7, %v4889_v59, %v4873_v35  ;;  %v4916_v62 = vpack.c.bf16 %v4912_v26, %v4908_v25  ;;  %v8066_v35 = vld [vmem:[%s8457_s3 + $0x498] sm:$0xff]   ;;  %v8070_v18 = vld [vmem:[%s8457_s3 + $0x490] sm:$0xff]   ;;  %v8073_v60 = vld [vmem:[%s8457_s3 + $0x408] sm:$0xff]  }
0x1321   : > { %v4905_v57 = vadd.f32 1.0, %v4897_v27  ;;  %v4915_v28 = vpack.c.bf16 %v4911_v45, %v4907_v36  ;;  %v8074_v59 = vld [vmem:[%s8457_s3 + $0x488] sm:$0xff]   ;;  %v8077_v23 = vld [vmem:[%s8457_s3 + $0x400] sm:$0xff]   ;;  %v9740_v36 = vld [vmem:[%s8447_s12 + $0x110] sm:$0xff] }
0x1322   : > { %v8078_v50 = vld [vmem:[%s8457_s3 + $0x480] sm:$0xff]   ;;  %v9743_v45 = vld [vmem:[%s8447_s12 + $0x170] sm:$0xff]  ;;  %v9746_v27 = vld [vmem:[%s8447_s12 + $0x118] sm:$0xff] }
0x1323   : > { %v4913_v1 = vmul.f32 %v4905_v57, %v4705_v3  ;;  %5206 = vmatprep.mubr.bf16.mxu0 %v4915_v28  ;;  %v7264_v17 = vcombine.high %v9740_v36, %v9743_v45  ;;  %v7263_v19 = vcombine.low %v9740_v36, %v9743_v45  ;;  %v7265_v31 = vcombine.low %v9746_v27, %v9751_v52  ;;  %v5266_v26 = vld [vmem:[%s8452_s5 + $0x10] sm:$0xf]  ;;  %v8079_v36 = vld [vmem:[%s8457_s3 + $0x578] sm:$0xff]  }
0x1324   : > { %5207 = vmatmul.mubr.bf16.vlgmr.msra.gmra.mxu0 %v4914_v9  ;;  %v7266_v3 = vcombine.high %v9746_v27, %v9751_v52  ;;  %v8080_v45 = vld [vmem:[%s8457_s3 + $0x5f8] sm:$0xff]  }
0x1325   : > { %v4917_v33 = vpack.c.bf16 %v4913_v1, %v4909_v42  ;;  %5341 = vmatpush1.bf16.msra.mxu0 %v7221_v6  ;;  %5360 = vmatprep.mubr.bf16.mxu0 %v10199_v54  ;;  %v8051_v6 = vld [vmem:[%s8457_s3 + $0x470] sm:$0xff]   ;;  %v8081_v27 = vld [vmem:[%s8457_s3 + $0x538] sm:$0xff]  }
0x1326   : > { %5342 = vmatprep.subr.bf16.mxu0 %v7218_v46  ;;  %v5271_v46 = vrot.slane %v5266_v26, %v10201_v58  ;;  %v8082_v52 = vld [vmem:[%s8457_s3 + $0x5b8] sm:$0xff]  }
0x1327   : > { %5247 = vmatprep.mubr.bf16.mxu1 %v4917_v33 }
0x1328   : > { %5248 = vmatmul.mubr.bf16.vlgmr.msra.gmra.mxu1 %v4916_v62  ;;  %v5275_v62 = vrot.slane %v5266_v26, %v10202_v21 }
0x1329   : > { %5384 = vmatpush1.bf16.msra.mxu1 %v7223_v39  ;;  %5403 = vmatprep.mubr.bf16.mxu1 %v10199_v54  ;;  %v8052_v39 = vld [vmem:[%s8457_s3 + $0x4f0] sm:$0xff]  }
0x132a   : > { %5385 = vmatprep.subr.bf16.mxu1 %v7220_v5  ;;  %5343 = vmatpush1.bf16.msra.mxu0 %v7217_v10 }
0x132b   : > { %7561 = vmatprep.subr.bf16.mxu0 %v8047_v13 }
0x132d   : > { %5386 = vmatpush1.bf16.msra.mxu1 %v7219_v53  ;;  %7225 = vmatmul.mubr.msk.bf16.vlgmr.msra.gmra.mxu0 %vm499_vm2, %v10200_v63  ;;  %v5279_v53 = vrot.slane %v5266_v26, %v10203_v44 }
0x132e   : > { %7583 = vmatprep.subr.bf16.mxu1 %v8048_v11  ;;  %7562 = vmatpush3.bf16.msra.mxu0 %v8049_v38 }
0x132f   : > { %7563 = vmatprep.subr.bf16.mxu0 %v8051_v6 }
0x1330   : > { %7226 = vmatmul.mubr.msk.bf16.vlgmr.msra.gmra.mxu1 %vm499_vm2, %v10200_v63 }
0x1331   : > { %7584 = vmatpush3.bf16.msra.mxu1 %v8050_v40 }
0x1332   : > { %7585 = vmatprep.subr.bf16.mxu1 %v8052_v39  ;;  %7564 = vmatpush3.bf16.msra.mxu0 %v8053_v49  ;;  %v5283_v39 = vrot.slane %v5266_v26, %v10204_v24 }
0x1333   : > { %7565 = vmatprep.subr.bf16.mxu0 %v8055_v32 }
0x1335   : > { %7586 = vmatpush3.bf16.msra.mxu1 %v8054_v29 }
0x1336   : > { %7587 = vmatprep.subr.bf16.mxu1 %v8056_v7  ;;  %7566 = vmatpush3.bf16.msra.mxu0 %v8057_v51 }
0x1337   : > { %7567 = vmatprep.subr.bf16.mxu0 %v8059_v37 }
0x1339   : > { %7588 = vmatpush3.bf16.msra.mxu1 %v8058_v22 }
0x133a   : > { %7589 = vmatprep.subr.bf16.mxu1 %v8060_v15  ;;  %7568 = vmatpush3.bf16.msra.mxu0 %v8061_v41 }
0x133b   : > { %7569 = vmatprep.subr.bf16.mxu0 %v8063_v48 }
0x133d   : > { %7590 = vmatpush3.bf16.msra.mxu1 %v8062_v43 }
0x133e   : > { %7591 = vmatprep.subr.bf16.mxu1 %v8064_v55  ;;  %7570 = vmatpush3.bf16.msra.mxu0 %v8065_v34 }
0x133f   : > { %7571 = vmatprep.subr.bf16.mxu0 %v8067_v61 }
0x1341   : > { %7592 = vmatpush3.bf16.msra.mxu1 %v8066_v35 }
0x1342   : > { %7593 = vmatprep.subr.bf16.mxu1 %v8068_v0  ;;  %7572 = vmatpush3.bf16.msra.mxu0 %v8069_v12 }
0x1343   : > { %7573 = vmatprep.subr.bf16.mxu0 %v8071_v14 }
0x1345   : > { %7594 = vmatpush3.bf16.msra.mxu1 %v8070_v18 }
0x1346   : > { %7595 = vmatprep.subr.bf16.mxu1 %v8072_v16  ;;  %7574 = vmatpush3.bf16.msra.mxu0 %v8073_v60 }
0x1347   : > { %7575 = vmatprep.subr.bf16.mxu0 %v8075_v20 }
0x1349   : > { %7596 = vmatpush3.bf16.msra.mxu1 %v8074_v59 }
0x134a   : > { %7597 = vmatprep.subr.bf16.mxu1 %v8076_v56  ;;  %7576 = vmatpush3.bf16.msra.mxu0 %v8077_v23 }
0x134b   : > { %6056 = vmatprep.subr.bf16.mxu0 %v7264_v17 }
0x134d   : > { %7598 = vmatpush3.bf16.msra.mxu1 %v8078_v50 }
0x134e   : > { %6099 = vmatprep.subr.bf16.mxu1 %v7266_v3 }
0x13e4   : > { %v7533_v57 = vpop.f32.mrf.mxu0 }
0x13e6   : > { %v7534_v2 = vpop.f32.mrf.mxu0 }
0x13e7   : > { %v7535_v42 = vadd.f32 %v7534_v2, %v7533_v57 }
0x13e8   : > { %v7555_v28 = vpop.f32.mrf.mxu1  ;;  %v7536_v9 = vpop.f32.mrf.mxu0 }
0x13ea   : > { %v7556_v1 = vpop.f32.mrf.mxu1  ;;  %v7537_v4 = vpop.f32.mrf.mxu0 }
0x13eb   : > { %v7557_v30 = vadd.f32 %v7556_v1, %v7555_v28  ;;  %v7538_v33 = vadd.f32 %v7537_v4, %v7536_v9 }
0x13ec   : > { %v7558_v25 = vpop.f32.mrf.mxu1 }
0x13ed   : > { %v5250_v10 = vadd.f32 %v7557_v30, %v7535_v42  ;;  %v5362_v5 = vpop.f32.mrf.mxu0 }
0x13ee   : > { %v7559_v13 = vpop.f32.mrf.mxu1  ;;  %v9763_v11 = vadd.f32 %v5362_v5, %v5271_v46 }
0x13ef   : > { %v9766_v38 = vadd.f32 %v5250_v10, %v9565_v47  ;;  %v7560_v40 = vadd.f32 %v7559_v13, %v7558_v25  ;;  %v5364_v6 = vpop.f32.mrf.mxu0 }
0x13f0   : > { %v9770_v49 = vmul.f32 0.70710677, %v9763_v11  ;;  %v5405_v29 = vpop.f32.mrf.mxu1  ;;  %v9772_v32 = vadd.f32 %v5364_v6, %v5275_v62 }
0x13f1   : > { %v5253_v7 = vadd.f32 %v7560_v40, %v7538_v33  ;;  %v9774_v51 = vadd.f32 %v5405_v29, %v5279_v53  ;;  %v5366_v12 = vpop.f32.mrf.mxu0 }
0x13f2   : > { %v5430_v22 = vand.u32 2147483647, %v9770_v49  ;;  %v9778_v37 = vmul.f32 0.70710677, %v9772_v32  ;;  %v5407_v47 = vpop.f32.mrf.mxu1  ;;  %v9794_v20 = vadd.f32 %v5366_v12, %v5271_v46  ;;  %vm5590_vm8 = vcmp.lt.f32.partialorder %v9770_v49, 0.0 }
0x13f3   : > { %v9781_v15 = vadd.f32 %v5253_v7, %v9580_v8  ;;  %v9784_v41 = vmul.f32 0.70710677, %v9774_v51  ;;  %v9786_v43 = vadd.f32 %v5407_v47, %v5283_v39  ;;  %v5368_v23 = vpop.f32.mrf.mxu0 }
0x13f4   : > { %v5438_v48 = vmul.f32 0.3275911, %v5430_v22  ;;  %v5431_v55 = vand.u32 2147483647, %v9778_v37  ;;  %v5409_v14 = vpop.f32.mrf.mxu1  ;;  %v9799_v3 = vmul.f32 0.70710677, %v9794_v20  ;;  %v9804_v2 = vadd.f32 %v5368_v23, %v5275_v62 }
0x13f5   : > { %v5432_v34 = vand.u32 2147483647, %v9784_v41  ;;  %v9791_v35 = vmul.f32 0.70710677, %v9786_v43  ;;  %v9796_v56 = vadd.f32 %v5409_v14, %v5279_v53  ;;  %v5542_v42 = vsub.f32 0.0, %v5430_v22 }
0x13f6   : > { %v5446_v61 = vadd.f32 1.0, %v5438_v48  ;;  %v5439_v0 = vmul.f32 0.3275911, %v5431_v55  ;;  %v5411_v17 = vpop.f32.mrf.mxu1  ;;  %v5434_v26 = vand.u32 2147483647, %v9799_v3  ;;  %v5543_v5 = vsub.f32 0.0, %v5431_v55 }
0x13f7   : > { %v5440_v18 = vmul.f32 0.3275911, %v5432_v34  ;;  %v5433_v8 = vand.u32 2147483647, %v9791_v35  ;;  %v9802_v57 = vmul.f32 0.70710677, %v9796_v56  ;;  %v9807_v28 = vadd.f32 %v5411_v17, %v5283_v39 }
0x13f8   : > { %8275 = vrcp.f32 %v5446_v61  ;;  %v5447_v16 = vadd.f32 1.0, %v5439_v0  ;;  %v5442_v1 = vmul.f32 0.3275911, %v5434_v26  ;;  %v9811_v46 = vmul.f32 0.70710677, %v9804_v2 }
0x13f9   : > { %v5448_v60 = vadd.f32 1.0, %v5440_v18  ;;  %v5441_v59 = vmul.f32 0.3275911, %v5433_v8  ;;  %v5436_v9 = vand.u32 2147483647, %v9802_v57  ;;  %v5544_v25 = vsub.f32 0.0, %v5432_v34 }
0x13fa   : > { %v9814_v4 = vmul.f32 0.70710677, %v9807_v28  ;;  %v5450_v33 = vadd.f32 1.0, %v5442_v1  ;;  %v5435_v62 = vand.u32 2147483647, %v9811_v46  ;;  %v5550_v10 = vmul.f32 %v5542_v42, %v5430_v22 }
0x13fb   : > { %8277 = vrcp.f32 %v5448_v60  ;;  %v5449_v50 = vadd.f32 1.0, %v5441_v59  ;;  %v5444_v30 = vmul.f32 0.3275911, %v5436_v9  ;;  %v5545_v40 = vsub.f32 0.0, %v5433_v8 }
0x13fc   : > { %8279 = vrcp.f32 %v5447_v16  ;;  %v5437_v13 = vand.u32 2147483647, %v9814_v4  ;;  %v5443_v6 = vmul.f32 0.3275911, %v5435_v62  ;;  %v5552_v47 = vmul.f32 %v5544_v25, %v5432_v34 }
0x13fd   : > { %8281 = vrcp.f32 %v5449_v50  ;;  %v5452_v53 = vadd.f32 1.0, %v5444_v30  ;;  %v5546_v48 = vsub.f32 0.0, %v5434_v26  ;;  %v5558_v0 = vmul.f32 1.442695, %v5550_v10 }
0x13fe   : > { %8283 = vrcp.f32 %v5450_v33  ;;  %v5445_v29 = vmul.f32 0.3275911, %v5437_v13  ;;  %v5451_v61 = vadd.f32 1.0, %v5443_v6  ;;  %v5551_v12 = vmul.f32 %v5543_v5, %v5431_v55 }
0x13ff   : > { %8285 = vrcp.f32 %v5452_v53  ;;  %v5553_v16 = vmul.f32 %v5545_v40, %v5433_v8  ;;  %v5548_v60 = vsub.f32 0.0, %v5436_v9  ;;  %v5562_v17 = vmul.f32 1.442695, %v5552_v47 }
0x1400   : > { %v5453_v18 = vadd.f32 1.0, %v5445_v29  ;;  %8287 = vrcp.f32 %v5451_v61  ;;  %v5554_v42 = vmul.f32 %v5546_v48, %v5434_v26  ;;  %v5560_v1 = vmul.f32 1.442695, %v5551_v12 }
0x1401   : > { %v5564_v33 = vmul.f32 1.442695, %v5553_v16  ;;  %v5556_v10 = vmul.f32 %v5548_v60, %v5436_v9  ;;  %v5547_v40 = vsub.f32 0.0, %v5435_v62  ;;  %v5549_v6 = vsub.f32 0.0, %v5437_v13 }
0x1402   : > { %8289 = vrcp.f32 %v5453_v18  ;;  %vm5591_vm9 = vcmp.lt.f32.partialorder %v9778_v37, 0.0  ;;  %vm5594_vm10 = vcmp.lt.f32.partialorder %v9799_v3, 0.0  ;;  %vm5592_vm11 = vcmp.lt.f32.partialorder %v9784_v41, 0.0 }
0x1403   : > { %8291 = vpow2.f32 %v5558_v0  ;;  %v5570_v12 = vmul.f32 1.442695, %v5556_v10  ;;  %v5555_v16 = vmul.f32 %v5547_v40, %v5435_v62  ;;  %v5557_v60 = vmul.f32 %v5549_v6, %v5437_v13 }
0x1404   : > { %8293 = vpow2.f32 %v5562_v17  ;;  %vm5596_vm12 = vcmp.lt.f32.partialorder %v9802_v57, 0.0  ;;  %vm5593_vm13 = vcmp.lt.f32.partialorder %v9791_v35, 0.0  ;;  %vm5595_vm14 = vcmp.lt.f32.partialorder %v9811_v46, 0.0 }
0x1405   : > { %v9818_v39 = vpop.eup %8275  ;;  %8295 = vpow2.f32 %v5560_v1  ;;  %v5568_v10 = vmul.f32 1.442695, %v5555_v16  ;;  %v5418_v49 = vmul.f32 0.5, %v9794_v20  ;;  %v5419_v57 = vmul.f32 0.5, %v9804_v2  ;;  %v5976_v20 = vld [vmem:[%s8447_s12 + $0xb0] sm:$0xff] }
0x1406   : > { %v5470_v7 = vmul.f32 1.0614054, %v9818_v39  ;;  %8297 = vpow2.f32 %v5564_v33  ;;  %vm5597_vm15 = vcmp.lt.f32.partialorder %v9814_v4, 0.0  ;;  %v5421_v2 = vmul.f32 0.5, %v9807_v28 }
0x1408   : > { %v9821_v22 = vpop.eup %8277  ;;  %v5478_v14 = vadd.f32 -1.4531521, %v5470_v7  ;;  %v5566_v7 = vmul.f32 1.442695, %v5554_v42 }
0x1409   : > { %v9823_v59 = vpop.eup %8279  ;;  %v5472_v23 = vmul.f32 1.0614054, %v9821_v22 }
0x140a   : > { %v5486_v50 = vmul.f32 %v9818_v39, %v5478_v14  ;;  %v5471_v34 = vmul.f32 1.0614054, %v9823_v59  ;;  %v9828_v30 = vpop.eup %8281  ;;  %8299 = vpow2.f32 %v5566_v7 }
0x140b   : > { %v5480_v55 = vadd.f32 -1.4531521, %v5472_v23  ;;  %v5473_v53 = vmul.f32 1.0614054, %v9828_v30  ;;  %v9834_v9 = vpop.eup %8283  ;;  %8301 = vpow2.f32 %v5570_v12 }
0x140c   : > { %v5494_v25 = vadd.f32 1.4214138, %v5486_v50  ;;  %v5479_v8 = vadd.f32 -1.4531521, %v5471_v34  ;;  %v9838_v23 = vpop.eup %8285  ;;  %v5474_v17 = vmul.f32 1.0614054, %v9834_v9  ;;  %8303 = vpow2.f32 %v5568_v10 }
0x140d   : > { %v5488_v5 = vmul.f32 %v9821_v22, %v5480_v55  ;;  %v5481_v48 = vadd.f32 -1.4531521, %v5473_v53  ;;  %v5476_v1 = vmul.f32 1.0614054, %v9838_v23  ;;  %v9844_v33 = vpop.eup %8287 }
0x140e   : > { %v5502_v29 = vmul.f32 %v9818_v39, %v5494_v25  ;;  %v5487_v26 = vmul.f32 %v9823_v59, %v5479_v8  ;;  %v5482_v8 = vadd.f32 -1.4531521, %v5474_v17 }
0x140f   : > { %v5496_v47 = vadd.f32 1.4214138, %v5488_v5  ;;  %v5489_v14 = vmul.f32 %v9828_v30, %v5481_v48  ;;  %v5484_v13 = vadd.f32 -1.4531521, %v5476_v1  ;;  %v5572_v5 = vmul.f32 1.442695, %v5557_v60  ;;  %v9847_v53 = vpop.eup %8289 }
0x1410   : > { %v5510_v61 = vadd.f32 -0.28449672, %v5502_v29  ;;  %v5495_v0 = vadd.f32 1.4214138, %v5487_v26  ;;  %v5490_v29 = vmul.f32 %v9834_v9, %v5482_v8  ;;  %v5475_v26 = vmul.f32 1.0614054, %v9844_v33 }
0x1411   : > { %v5504_v18 = vmul.f32 %v9821_v22, %v5496_v47  ;;  %v5497_v55 = vadd.f32 1.4214138, %v5489_v14  ;;  %v5492_v48 = vmul.f32 %v9838_v23, %v5484_v13  ;;  %8305 = vpow2.f32 %v5572_v5 }
0x1412   : > { %v5503_v50 = vmul.f32 %v9823_v59, %v5495_v0  ;;  %v5518_v34 = vmul.f32 %v9818_v39, %v5510_v61  ;;  %v5477_v61 = vmul.f32 1.0614054, %v9847_v53  ;;  %v8292_v0 = vpop.eup %8291  ;;  %v5483_v14 = vadd.f32 -1.4531521, %v5475_v26 }
0x1413   : > { %v5512_v42 = vadd.f32 -0.28449672, %v5504_v18  ;;  %v5505_v62 = vmul.f32 %v9828_v30, %v5497_v55  ;;  %v5498_v18 = vadd.f32 1.4214138, %v5490_v29  ;;  %v5500_v60 = vadd.f32 1.4214138, %v5492_v48  ;;  %v8294_v1 = vpop.eup %8293 }
0x1414   : > { %v5511_v25 = vadd.f32 -0.28449672, %v5503_v50  ;;  %v5526_v7 = vadd.f32 0.2548296, %v5518_v34  ;;  %v5485_v50 = vadd.f32 -1.4531521, %v5477_v61  ;;  %v5491_v34 = vmul.f32 %v9844_v33, %v5483_v14 }
0x1415   : > { %v5520_v40 = vmul.f32 %v9821_v22, %v5512_v42  ;;  %v5513_v47 = vadd.f32 -0.28449672, %v5505_v62  ;;  %v5506_v55 = vmul.f32 %v9834_v9, %v5498_v18  ;;  %v5508_v62 = vmul.f32 %v9838_v23, %v5500_v60 }
0x1416   : > { %v5519_v6 = vmul.f32 %v9823_v59, %v5511_v25  ;;  %v5534_v25 = vmul.f32 %v9818_v39, %v5526_v7  ;;  %v5493_v13 = vmul.f32 %v9847_v53, %v5485_v50  ;;  %v5499_v26 = vadd.f32 1.4214138, %v5491_v34 }
0x1417   : > { %v5521_v16 = vmul.f32 %v9828_v30, %v5513_v47  ;;  %v5528_v17 = vadd.f32 0.2548296, %v5520_v40  ;;  %v5514_v29 = vadd.f32 -0.28449672, %v5506_v55  ;;  %v5516_v47 = vadd.f32 -0.28449672, %v5508_v62 }
0x1418   : > { %v5527_v12 = vadd.f32 0.2548296, %v5519_v6  ;;  %v8296_v6 = vpop.eup %8295  ;;  %v5507_v39 = vmul.f32 %v9844_v33, %v5499_v26  ;;  %v5574_v18 = vmul.f32 %v8292_v0, %v5534_v25 }
0x1419   : > { %v5529_v8 = vadd.f32 0.2548296, %v5521_v16  ;;  %v8298_v10 = vpop.eup %8297  ;;  %v5536_v48 = vmul.f32 %v9821_v22, %v5528_v17  ;;  %v5524_v14 = vmul.f32 %v9838_v23, %v5516_v47 }
0x141a   : > { %v5535_v42 = vmul.f32 %v9823_v59, %v5527_v12  ;;  %v5501_v59 = vadd.f32 1.4214138, %v5493_v13  ;;  %v5522_v12 = vmul.f32 %v9834_v9, %v5514_v29  ;;  %v8300_v7 = vpop.eup %8299  ;;  %v5515_v60 = vadd.f32 -0.28449672, %v5507_v39 }
0x141b   : > { %v5537_v40 = vmul.f32 %v9828_v30, %v5529_v8  ;;  %v8302_v55 = vpop.eup %8301  ;;  %v5532_v34 = vadd.f32 0.2548296, %v5524_v14  ;;  %v5576_v8 = vmul.f32 %v8294_v1, %v5536_v48 }
0x141c   : > { %v5575_v61 = vmul.f32 %v8296_v6, %v5535_v42  ;;  %v5530_v16 = vadd.f32 0.2548296, %v5522_v12  ;;  %v5509_v50 = vmul.f32 %v9847_v53, %v5501_v59  ;;  %v5523_v17 = vmul.f32 %v9844_v33, %v5515_v60 }
0x141d   : > { %v5577_v30 = vmul.f32 %v8298_v10, %v5537_v40  ;;  %v5582_v42 = vsub.f32 1.0, %v5574_v18  ;;  %v5540_v62 = vmul.f32 %v9838_v23, %v5532_v34  ;;  %v5414_v6 = vmul.f32 0.5, %v9763_v11  ;;  %v8304_v10 = vpop.eup %8303 }
0x141e   : > { %v5583_v5 = vsub.f32 1.0, %v5575_v61  ;;  %v5538_v22 = vmul.f32 %v9834_v9, %v5530_v16  ;;  %v5517_v13 = vadd.f32 -0.28449672, %v5509_v50  ;;  %v5531_v25 = vadd.f32 0.2548296, %v5523_v17  ;;  %v8306_v16 = vpop.eup %8305 }
0x141f   : > { %v5585_v29 = vsub.f32 1.0, %v5577_v30  ;;  %v5580_v26 = vmul.f32 %v8302_v55, %v5540_v62  ;;  %v5584_v40 = vsub.f32 1.0, %v5576_v8  ;;  %v5598_v48 = vsub.f32 0.0, %v5582_v42 }
0x1420   : > { %v5578_v0 = vmul.f32 %v8300_v7, %v5538_v22  ;;  %v5525_v47 = vmul.f32 %v9847_v53, %v5517_v13  ;;  %v5599_v1 = vsub.f32 0.0, %v5583_v5  ;;  %v5539_v9 = vmul.f32 %v9844_v33, %v5531_v25 }
0x1421   : > { %v5588_v61 = vsub.f32 1.0, %v5580_v26  ;;  %v5415_v12 = vmul.f32 0.5, %v9772_v32  ;;  %v5601_v7 = vsub.f32 0.0, %v5585_v29  ;;  %v5600_v60 = vsub.f32 0.0, %v5584_v40 }
0x1422   : > { %v5586_v59 = vsub.f32 1.0, %v5578_v0  ;;  %v5533_v23 = vadd.f32 0.2548296, %v5525_v47  ;;  %v5579_v39 = vmul.f32 %v8304_v10, %v5539_v9  ;;  %v5607_v33 = vsel %vm5591_vm9, %v5599_v1, %v5583_v5  ;;  %v5974_v10 = vld [vmem:[%s8447_s12 + $0x50] sm:$0xff] }
0x1423   : > { %v5604_v18 = vsub.f32 0.0, %v5588_v61  ;;  %v5606_v30 = vsel %vm5590_vm8, %v5598_v48, %v5582_v42  ;;  %v5615_v8 = vadd.f32 1.0, %v5607_v33  ;;  %v5608_v17 = vsel %vm5592_vm11, %v5600_v60, %v5584_v40  ;;  %v8089_v60 = vld [vmem:[%s8457_s3 + $0x528] sm:$0xff]  }
0x1424   : > { %v5602_v11 = vsub.f32 0.0, %v5586_v59  ;;  %v5541_v14 = vmul.f32 %v9847_v53, %v5533_v23  ;;  %v5587_v55 = vsub.f32 1.0, %v5579_v39  ;;  %v5609_v53 = vsel %vm5593_vm13, %v5601_v7, %v5585_v29  ;;  %v5977_v39 = vld [vmem:[%s8447_s12 + $0xb8] sm:$0xff]  ;;  %v8090_v33 = vld [vmem:[%s8457_s3 + $0x5a8] sm:$0xff]  }
0x1425   : > { %v5612_v3 = vsel %vm5596_vm12, %v5604_v18, %v5588_v61  ;;  %v5614_v22 = vadd.f32 1.0, %v5606_v30  ;;  %v5617_v13 = vadd.f32 1.0, %v5609_v53  ;;  %v5420_v25 = vmul.f32 0.5, %v9796_v56  ;;  %v8093_v30 = vld [vmem:[%s8457_s3 + $0x520] sm:$0xff]   ;;  %v8099_v53 = vld [vmem:[%s8457_s3 + $0x550] sm:$0xff]  }
0x1426   : > { %v5610_v50 = vsel %vm5594_vm10, %v5602_v11, %v5586_v59  ;;  %v5581_v32 = vmul.f32 %v8306_v16, %v5541_v14  ;;  %v5603_v34 = vsub.f32 0.0, %v5587_v55  ;;  %v5620_v42 = vadd.f32 1.0, %v5612_v3  ;;  %v5975_v11 = vld [vmem:[%s8447_s12 + $0x58] sm:$0xff]  ;;  %v8086_v14 = vld [vmem:[%s8457_s3 + $0x5b0] sm:$0xff]   ;;  %v8088_v16 = vld [vmem:[%s8457_s3 + $0x5e8] sm:$0xff]  }
0x1427   : > { %v5618_v37 = vadd.f32 1.0, %v5610_v50  ;;  %v5616_v46 = vadd.f32 1.0, %v5608_v17  ;;  %v5623_v29 = vmul.f32 %v5615_v8, %v5415_v12  ;;  %v5622_v40 = vmul.f32 %v5614_v22, %v5414_v6  ;;  %v8091_v50 = vld [vmem:[%s8457_s3 + $0x560] sm:$0xff]   ;;  %v8096_v3 = vld [vmem:[%s8457_s3 + $0x5d8] sm:$0xff]   ;;  %v8101_v22 = vld [vmem:[%s8457_s3 + $0x510] sm:$0xff]  }
0x1428   : > { %v5589_v5 = vsub.f32 1.0, %v5581_v32  ;;  %v5611_v41 = vsel %vm5595_vm14, %v5603_v34, %v5587_v55  ;;  %v5417_v1 = vmul.f32 0.5, %v9786_v43  ;;  %v5416_v9 = vmul.f32 0.5, %v9774_v51  ;;  %v8092_v55 = vld [vmem:[%s8457_s3 + $0x5e0] sm:$0xff]   ;;  %v8097_v34 = vld [vmem:[%s8457_s3 + $0x518] sm:$0xff]   ;;  %v8102_v17 = vld [vmem:[%s8457_s3 + $0x590] sm:$0xff]  }
0x1429   : > { %v5619_v62 = vadd.f32 1.0, %v5611_v41  ;;  %v5626_v0 = vmul.f32 %v5618_v37, %v5418_v49  ;;  %v5628_v48 = vmul.f32 %v5620_v42, %v5420_v25  ;;  %v7260_v12 = vcombine.high %v5974_v10, %v5976_v20  ;;  %v8094_v32 = vld [vmem:[%s8457_s3 + $0x5a0] sm:$0xff]   ;;  %v8095_v37 = vld [vmem:[%s8457_s3 + $0x558] sm:$0xff]   ;;  %v8103_v49 = vld [vmem:[%s8457_s3 + $0x548] sm:$0xff]  }
0x142a   : > { %v5605_v35 = vsub.f32 0.0, %v5589_v5  ;;  %v5625_v61 = vmul.f32 %v5617_v13, %v5417_v1  ;;  %v5624_v7 = vmul.f32 %v5616_v46, %v5416_v9  ;;  %v7259_v51 = vcombine.low %v5974_v10, %v5976_v20  ;;  %v8098_v8 = vld [vmem:[%s8457_s3 + $0x598] sm:$0xff]   ;;  %v8104_v41 = vld [vmem:[%s8457_s3 + $0x5c8] sm:$0xff]   ;;  %v8109_v13 = vld [vmem:[%s8457_s3 + $0x500] sm:$0xff]  }
0x142b   : > { %v5627_v26 = vmul.f32 %v5619_v62, %v5419_v57  ;;  %v5630_v4 = vpack.c.bf16 %v5626_v0, %v5622_v40  ;;  %v7262_v43 = vcombine.high %v5975_v11, %v5977_v39  ;;  %v7261_v28 = vcombine.low %v5975_v11, %v5977_v39  ;;  %v8105_v42 = vld [vmem:[%s8457_s3 + $0x508] sm:$0xff]   ;;  %v8107_v62 = vld [vmem:[%s8457_s3 + $0x540] sm:$0xff]  }
0x142c   : > { %v5613_v47 = vsel %vm5597_vm15, %v5605_v35, %v5589_v5  ;;  %v5632_v6 = vpack.c.bf16 %v5628_v48, %v5624_v7  ;;  %v8100_v5 = vld [vmem:[%s8457_s3 + $0x5d0] sm:$0xff]   ;;  %v8106_v57 = vld [vmem:[%s8457_s3 + $0x588] sm:$0xff]   ;;  %v8108_v35 = vld [vmem:[%s8457_s3 + $0x5c0] sm:$0xff]  }
0x142d   : > { %v5621_v59 = vadd.f32 1.0, %v5613_v47  ;;  %v5631_v56 = vpack.c.bf16 %v5627_v26, %v5623_v29  ;;  %v8110_v0 = vld [vmem:[%s8457_s3 + $0x580] sm:$0xff]   ;;  %v5982_v29 = vld [vmem:[%s8452_s5 + $0x14] sm:$0xf] }
0x142e   : > { %v5987_v40 = vrot.slane %v5982_v29, %v10201_v58  ;;  %v5991_v48 = vrot.slane %v5982_v29, %v10202_v21  ;;  %v5999_v58 = vrot.slane %v5982_v29, %v10204_v24 }
0x142f   : > { %v5629_v23 = vmul.f32 %v5621_v59, %v5421_v2  ;;  %5922 = vmatprep.mubr.bf16.mxu0 %v5631_v56 }
0x1430   : > { %5923 = vmatmul.mubr.bf16.vlgmr.msra.gmra.mxu0 %v5630_v4  ;;  %v5995_v4 = vrot.slane %v5982_v29, %v10203_v44 }
0x1431   : > { %v5633_v18 = vpack.c.bf16 %v5629_v23, %v5625_v61  ;;  %6057 = vmatpush1.bf16.msra.mxu0 %v7263_v19  ;;  %6076 = vmatprep.mubr.bf16.mxu0 %v10199_v54  ;;  %v8084_v19 = vld [vmem:[%s8457_s3 + $0x5f0] sm:$0xff]  }
0x1432   : > { %6058 = vmatprep.subr.bf16.mxu0 %v7260_v12 }
0x1433   : > { %5963 = vmatprep.mubr.bf16.mxu1 %v5633_v18 }
0x1434   : > { %5964 = vmatmul.mubr.bf16.vlgmr.msra.gmra.mxu1 %v5632_v6 }
0x1435   : > { %6100 = vmatpush1.bf16.msra.mxu1 %v7265_v31  ;;  %6119 = vmatprep.mubr.bf16.mxu1 %v10199_v54  ;;  %v8083_v54 = vld [vmem:[%s8457_s3 + $0x570] sm:$0xff]  }
0x1436   : > { %6101 = vmatprep.subr.bf16.mxu1 %v7262_v43  ;;  %6059 = vmatpush1.bf16.msra.mxu0 %v7259_v51  ;;  %v8085_v31 = vld [vmem:[%s8457_s3 + $0x530] sm:$0xff]  }
0x1437   : > { %7605 = vmatprep.subr.bf16.mxu0 %v8079_v36 }
0x1439   : > { %6102 = vmatpush1.bf16.msra.mxu1 %v7261_v28  ;;  %7267 = vmatmul.mubr.msk.bf16.vlgmr.msra.gmra.mxu0 %vm499_vm2, %v10200_v63 }
0x143a   : > { %7627 = vmatprep.subr.bf16.mxu1 %v8080_v45  ;;  %7606 = vmatpush3.bf16.msra.mxu0 %v8081_v27 }
0x143b   : > { %7607 = vmatprep.subr.bf16.mxu0 %v8083_v54 }
0x143c   : > { %7268 = vmatmul.mubr.msk.bf16.vlgmr.msra.gmra.mxu1 %vm499_vm2, %v10200_v63  ;;  %v8087_v63 = vld [vmem:[%s8457_s3 + $0x568] sm:$0xff]  }
0x143d   : > { %7628 = vmatpush3.bf16.msra.mxu1 %v8082_v52 }
0x143e   : > { %7629 = vmatprep.subr.bf16.mxu1 %v8084_v19  ;;  %7608 = vmatpush3.bf16.msra.mxu0 %v8085_v31 }
0x143f   : > { %7609 = vmatprep.subr.bf16.mxu0 %v8087_v63 }
0x1441   : > { %7630 = vmatpush3.bf16.msra.mxu1 %v8086_v14 }
0x1442   : > { %7631 = vmatprep.subr.bf16.mxu1 %v8088_v16  ;;  %7610 = vmatpush3.bf16.msra.mxu0 %v8089_v60 }
0x1443   : > { %7611 = vmatprep.subr.bf16.mxu0 %v8091_v50 }
0x1445   : > { %7632 = vmatpush3.bf16.msra.mxu1 %v8090_v33 }
0x1446   : > { %7633 = vmatprep.subr.bf16.mxu1 %v8092_v55  ;;  %7612 = vmatpush3.bf16.msra.mxu0 %v8093_v30 }
0x1447   : > { %7613 = vmatprep.subr.bf16.mxu0 %v8095_v37 }
0x1449   : > { %7634 = vmatpush3.bf16.msra.mxu1 %v8094_v32 }
0x144a   : > { %7635 = vmatprep.subr.bf16.mxu1 %v8096_v3  ;;  %7614 = vmatpush3.bf16.msra.mxu0 %v8097_v34 }
0x144b   : > { %7615 = vmatprep.subr.bf16.mxu0 %v8099_v53 }
0x144d   : > { %7636 = vmatpush3.bf16.msra.mxu1 %v8098_v8 }
0x144e   : > { %7637 = vmatprep.subr.bf16.mxu1 %v8100_v5  ;;  %7616 = vmatpush3.bf16.msra.mxu0 %v8101_v22 }
0x144f   : > { %7617 = vmatprep.subr.bf16.mxu0 %v8103_v49 }
0x1451   : > { %7638 = vmatpush3.bf16.msra.mxu1 %v8102_v17 }
0x1452   : > { %7639 = vmatprep.subr.bf16.mxu1 %v8104_v41  ;;  %7618 = vmatpush3.bf16.msra.mxu0 %v8105_v42 }
0x1453   : > { %7619 = vmatprep.subr.bf16.mxu0 %v8107_v62 }
0x1455   : > { %7640 = vmatpush3.bf16.msra.mxu1 %v8106_v57 }
0x1456   : > { %7641 = vmatprep.subr.bf16.mxu1 %v8108_v35  ;;  %7620 = vmatpush3.bf16.msra.mxu0 %v8109_v13 }
0x1459   : > { %7642 = vmatpush3.bf16.msra.mxu1 %v8110_v0 }
0x14f0   : > { %v7577_v25 = vpop.f32.mrf.mxu0 }
0x14f2   : > { %v7578_v46 = vpop.f32.mrf.mxu0 }
0x14f3   : > { %v7579_v47 = vadd.f32 %v7578_v46, %v7577_v25 }
0x14f4   : > { %v7599_v26 = vpop.f32.mrf.mxu1  ;;  %v7580_v10 = vpop.f32.mrf.mxu0 }
0x14f6   : > { %v7600_v20 = vpop.f32.mrf.mxu1  ;;  %v7581_v2 = vpop.f32.mrf.mxu0 }
0x14f7   : > { %v7601_v1 = vadd.f32 %v7600_v20, %v7599_v26  ;;  %v7582_v9 = vadd.f32 %v7581_v2, %v7580_v10 }
0x14f8   : > { %v7602_v59 = vpop.f32.mrf.mxu1 }
0x14f9   : > { %v5966_v56 = vadd.f32 %v7601_v1, %v7579_v47  ;;  %v6078_v61 = vpop.f32.mrf.mxu0 }
0x14fa   : > { %v7603_v23 = vpop.f32.mrf.mxu1  ;;  %v9944_v12 = vadd.f32 %v6078_v61, %v5987_v40 }
0x14fb   : > { %v9947_v11 = vadd.f32 %v5966_v56, %v9766_v38  ;;  %v7604_v39 = vadd.f32 %v7603_v23, %v7602_v59  ;;  %v6080_v7 = vpop.f32.mrf.mxu0 }
0x14fc   : > { %v9951_v18 = vmul.f32 0.70710677, %v9944_v12  ;;  %v6121_v6 = vpop.f32.mrf.mxu1  ;;  %v9953_v51 = vadd.f32 %v6080_v7, %v5991_v48 }
0x14fd   : > { %v5969_v21 = vadd.f32 %v7604_v39, %v7582_v9  ;;  %v9955_v43 = vadd.f32 %v6121_v6, %v5995_v4  ;;  %v6082_v16 = vpop.f32.mrf.mxu0 }
0x14fe   : > { %v6146_v44 = vand.u32 2147483647, %v9951_v18  ;;  %v9959_v28 = vmul.f32 0.70710677, %v9953_v51  ;;  %v6123_v38 = vpop.f32.mrf.mxu1  ;;  %v9975_v32 = vadd.f32 %v6082_v16, %v5987_v40  ;;  %vm6306_vm0 = vcmp.lt.f32.partialorder %v9951_v18, 0.0 }
0x14ff   : > { %v9962_v36 = vadd.f32 %v5969_v21, %v9781_v15  ;;  %v9965_v45 = vmul.f32 0.70710677, %v9955_v43  ;;  %v9967_v27 = vadd.f32 %v6123_v38, %v5999_v58  ;;  %v6084_v3 = vpop.f32.mrf.mxu0 }
0x1500   : > { %v6154_v52 = vmul.f32 0.3275911, %v6146_v44  ;;  %v6147_v54 = vand.u32 2147483647, %v9959_v28  ;;  %v6125_v33 = vpop.f32.mrf.mxu1  ;;  %v9980_v53 = vmul.f32 0.70710677, %v9975_v32  ;;  %v9985_v22 = vadd.f32 %v6084_v3, %v5991_v48 }
0x1501   : > { %v6148_v19 = vand.u32 2147483647, %v9965_v45  ;;  %v9972_v31 = vmul.f32 0.70710677, %v9967_v27  ;;  %v9977_v37 = vadd.f32 %v6125_v33, %v5995_v4  ;;  %v6258_v41 = vsub.f32 0.0, %v6146_v44 }
0x1502   : > { %v6162_v14 = vadd.f32 1.0, %v6154_v52  ;;  %v6155_v63 = vmul.f32 0.3275911, %v6147_v54  ;;  %v6127_v8 = vpop.f32.mrf.mxu1  ;;  %v6150_v17 = vand.u32 2147483647, %v9980_v53  ;;  %v6259_v26 = vsub.f32 0.0, %v6147_v54 }
0x1503   : > { %v6156_v60 = vmul.f32 0.3275911, %v6148_v19  ;;  %v6149_v15 = vand.u32 2147483647, %v9972_v31  ;;  %v9983_v5 = vmul.f32 0.70710677, %v9977_v37  ;;  %v9988_v49 = vadd.f32 %v6127_v8, %v5999_v58 }
0x1504   : > { %8307 = vrcp.f32 %v6162_v14  ;;  %v6163_v50 = vadd.f32 1.0, %v6155_v63  ;;  %v6158_v57 = vmul.f32 0.3275911, %v6150_v17  ;;  %v9992_v62 = vmul.f32 0.70710677, %v9985_v22 }
0x1505   : > { %v6164_v55 = vadd.f32 1.0, %v6156_v60  ;;  %v6157_v30 = vmul.f32 0.3275911, %v6149_v15  ;;  %v6152_v42 = vand.u32 2147483647, %v9983_v5  ;;  %v6260_v0 = vsub.f32 0.0, %v6148_v19 }
0x1506   : > { %v9995_v13 = vmul.f32 0.70710677, %v9988_v49  ;;  %v6166_v25 = vadd.f32 1.0, %v6158_v57  ;;  %v6151_v46 = vand.u32 2147483647, %v9992_v62  ;;  %v6266_v29 = vmul.f32 %v6258_v41, %v6146_v44 }
0x1507   : > { %8309 = vrcp.f32 %v6164_v55  ;;  %v6165_v34 = vadd.f32 1.0, %v6157_v30  ;;  %v6160_v35 = vmul.f32 0.3275911, %v6152_v42  ;;  %v6261_v20 = vsub.f32 0.0, %v6149_v15 }
0x1508   : > { %8311 = vrcp.f32 %v6163_v50  ;;  %v6153_v10 = vand.u32 2147483647, %v9995_v13  ;;  %v6159_v40 = vmul.f32 0.3275911, %v6151_v46  ;;  %v6268_v9 = vmul.f32 %v6260_v0, %v6148_v19 }
0x1509   : > { %8313 = vrcp.f32 %v6165_v34  ;;  %v6168_v47 = vadd.f32 1.0, %v6160_v35  ;;  %v6262_v48 = vsub.f32 0.0, %v6150_v17  ;;  %v6274_v61 = vmul.f32 1.442695, %v6266_v29 }
0x150a   : > { %8315 = vrcp.f32 %v6166_v25  ;;  %v6161_v2 = vmul.f32 0.3275911, %v6153_v10  ;;  %v6167_v56 = vadd.f32 1.0, %v6159_v40  ;;  %v6267_v4 = vmul.f32 %v6259_v26, %v6147_v54 }
0x150b   : > { %8317 = vrcp.f32 %v6168_v47  ;;  %v6269_v58 = vmul.f32 %v6261_v20, %v6149_v15  ;;  %v6264_v6 = vsub.f32 0.0, %v6152_v42  ;;  %v6278_v52 = vmul.f32 1.442695, %v6268_v9 }
0x150c   : > { %v6169_v23 = vadd.f32 1.0, %v6161_v2  ;;  %8319 = vrcp.f32 %v6167_v56  ;;  %v6270_v14 = vmul.f32 %v6262_v48, %v6150_v17  ;;  %v6276_v63 = vmul.f32 1.442695, %v6267_v4 }
0x150d   : > { %v6280_v33 = vmul.f32 1.442695, %v6269_v58  ;;  %v6272_v50 = vmul.f32 %v6264_v6, %v6152_v42  ;;  %v6263_v3 = vsub.f32 0.0, %v6151_v46  ;;  %v6265_v34 = vsub.f32 0.0, %v6153_v10 }
0x150e   : > { %8321 = vrcp.f32 %v6169_v23  ;;  %v6282_v41 = vmul.f32 1.442695, %v6270_v14  ;;  %vm6307_vm1 = vcmp.lt.f32.partialorder %v9959_v28, 0.0  ;;  %vm6310_vm3 = vcmp.lt.f32.partialorder %v9980_v53, 0.0 }
0x150f   : > { %8323 = vpow2.f32 %v6274_v61  ;;  %v6286_v29 = vmul.f32 1.442695, %v6272_v50  ;;  %v6271_v20 = vmul.f32 %v6263_v3, %v6151_v46  ;;  %v6273_v40 = vmul.f32 %v6265_v34, %v6153_v10 }
0x1510   : > { %8325 = vpow2.f32 %v6278_v52  ;;  %vm6308_vm4 = vcmp.lt.f32.partialorder %v9965_v45, 0.0  ;;  %vm6312_vm5 = vcmp.lt.f32.partialorder %v9983_v5, 0.0  ;;  %vm6309_vm6 = vcmp.lt.f32.partialorder %v9972_v31, 0.0 }
0x1511   : > { %v9999_v1 = vpop.eup %8307  ;;  %8327 = vpow2.f32 %v6276_v63  ;;  %v6284_v6 = vmul.f32 1.442695, %v6271_v20  ;;  %vm6311_vm7 = vcmp.lt.f32.partialorder %v9992_v62, 0.0  ;;  %v6134_v18 = vmul.f32 0.5, %v9975_v32 }
0x1512   : > { %v6186_v59 = vmul.f32 1.0614054, %v9999_v1  ;;  %8329 = vpow2.f32 %v6280_v33  ;;  %v6135_v45 = vmul.f32 0.5, %v9985_v22  ;;  %vm6313_vm8 = vcmp.lt.f32.partialorder %v9995_v13, 0.0 }
0x1513   : > { %8331 = vpow2.f32 %v6282_v41  ;;  %v6137_v32 = vmul.f32 0.5, %v9988_v49  ;;  %v6132_v22 = vmul.f32 0.5, %v9955_v43 }
0x1514   : > { %v10002_v39 = vpop.eup %8309  ;;  %v6194_v7 = vadd.f32 -1.4531521, %v6186_v59  ;;  %8333 = vpow2.f32 %v6286_v29 }
0x1515   : > { %v10004_v21 = vpop.eup %8311  ;;  %v6188_v44 = vmul.f32 1.0614054, %v10002_v39  ;;  %8335 = vpow2.f32 %v6284_v6 }
0x1516   : > { %v6202_v38 = vmul.f32 %v9999_v1, %v6194_v7  ;;  %v6187_v19 = vmul.f32 1.0614054, %v10004_v21  ;;  %v10009_v16 = vpop.eup %8313 }
0x1517   : > { %v6196_v54 = vadd.f32 -1.4531521, %v6188_v44  ;;  %v6189_v30 = vmul.f32 1.0614054, %v10009_v16  ;;  %v10015_v42 = vpop.eup %8315  ;;  %v6288_v44 = vmul.f32 1.442695, %v6273_v40 }
0x1518   : > { %v6210_v60 = vadd.f32 1.4214138, %v6202_v38  ;;  %v6195_v15 = vadd.f32 -1.4531521, %v6187_v19  ;;  %v10019_v2 = vpop.eup %8317  ;;  %v6190_v9 = vmul.f32 1.0614054, %v10015_v42 }
0x1519   : > { %v6204_v55 = vmul.f32 %v10002_v39, %v6196_v54  ;;  %v6197_v35 = vadd.f32 -1.4531521, %v6189_v30  ;;  %v6192_v4 = vmul.f32 1.0614054, %v10019_v2  ;;  %v10025_v58 = vpop.eup %8319  ;;  %8337 = vpow2.f32 %v6288_v44 }
0x151a   : > { %v6218_v8 = vmul.f32 %v9999_v1, %v6210_v60  ;;  %v6203_v17 = vmul.f32 %v10004_v21, %v6195_v15  ;;  %v6198_v7 = vadd.f32 -1.4531521, %v6190_v9  ;;  %v6191_v54 = vmul.f32 1.0614054, %v10025_v58 }
0x151b   : > { %v6212_v57 = vadd.f32 1.4214138, %v6204_v55  ;;  %v6205_v47 = vmul.f32 %v10009_v16, %v6197_v35  ;;  %v6200_v10 = vadd.f32 -1.4531521, %v6192_v4  ;;  %v10028_v38 = vpop.eup %8321 }
0x151c   : > { %v6226_v0 = vadd.f32 -0.28449672, %v6218_v8  ;;  %v6211_v25 = vadd.f32 1.4214138, %v6203_v17  ;;  %v6206_v14 = vmul.f32 %v10015_v42, %v6198_v7  ;;  %v6193_v33 = vmul.f32 1.0614054, %v10028_v38  ;;  %v8324_v50 = vpop.eup %8323 }
0x151d   : > { %v6220_v26 = vmul.f32 %v10002_v39, %v6212_v57  ;;  %v6213_v61 = vadd.f32 1.4214138, %v6205_v47  ;;  %v6208_v15 = vmul.f32 %v10019_v2, %v6200_v10  ;;  %v6199_v3 = vadd.f32 -1.4531521, %v6191_v54 }
0x151e   : > { %v6219_v59 = vmul.f32 %v10004_v21, %v6211_v25  ;;  %v6234_v48 = vmul.f32 %v9999_v1, %v6226_v0  ;;  %v6214_v30 = vadd.f32 1.4214138, %v6206_v14  ;;  %v6201_v17 = vadd.f32 -1.4531521, %v6193_v33  ;;  %v8326_v25 = vpop.eup %8325 }
0x151f   : > { %v6228_v56 = vadd.f32 -0.28449672, %v6220_v26  ;;  %v6221_v46 = vmul.f32 %v10009_v16, %v6213_v61  ;;  %v6216_v8 = vadd.f32 1.4214138, %v6208_v15  ;;  %v6207_v0 = vmul.f32 %v10025_v58, %v6199_v3  ;;  %v8328_v40 = vpop.eup %8327 }
0x1520   : > { %v6227_v23 = vadd.f32 -0.28449672, %v6219_v59  ;;  %v6242_v63 = vadd.f32 0.2548296, %v6234_v48  ;;  %v6222_v35 = vmul.f32 %v10015_v42, %v6214_v30  ;;  %v6209_v20 = vmul.f32 %v10028_v38, %v6201_v17  ;;  %v8330_v48 = vpop.eup %8329 }
0x1521   : > { %v6236_v52 = vmul.f32 %v10002_v39, %v6228_v56  ;;  %v6229_v60 = vadd.f32 -0.28449672, %v6221_v46  ;;  %v6224_v47 = vmul.f32 %v10019_v2, %v6216_v8  ;;  %v6215_v9 = vadd.f32 1.4214138, %v6207_v0  ;;  %v8332_v46 = vpop.eup %8331 }
0x1522   : > { %v6235_v19 = vmul.f32 %v10004_v21, %v6227_v23  ;;  %v6250_v29 = vmul.f32 %v9999_v1, %v6242_v63  ;;  %v6230_v59 = vadd.f32 -0.28449672, %v6222_v35  ;;  %v8334_v54 = vpop.eup %8333 }
0x1523   : > { %v6237_v34 = vmul.f32 %v10009_v16, %v6229_v60  ;;  %v6244_v41 = vadd.f32 0.2548296, %v6236_v52  ;;  %v6232_v61 = vadd.f32 -0.28449672, %v6224_v47  ;;  %v6223_v1 = vmul.f32 %v10025_v58, %v6215_v9 }
0x1524   : > { %v6243_v55 = vadd.f32 0.2548296, %v6235_v19  ;;  %v6238_v7 = vmul.f32 %v10015_v42, %v6230_v59  ;;  %v6290_v10 = vmul.f32 %v8324_v50, %v6250_v29  ;;  %v6131_v47 = vmul.f32 0.5, %v9953_v51 }
0x1525   : > { %v6245_v26 = vadd.f32 0.2548296, %v6237_v34  ;;  %v6252_v4 = vmul.f32 %v10002_v39, %v6244_v41  ;;  %v6240_v6 = vmul.f32 %v10019_v2, %v6232_v61  ;;  %v6231_v19 = vadd.f32 -0.28449672, %v6223_v1 }
0x1526   : > { %v6251_v57 = vmul.f32 %v10004_v21, %v6243_v55  ;;  %v6217_v21 = vadd.f32 1.4214138, %v6209_v20  ;;  %v6246_v52 = vadd.f32 0.2548296, %v6238_v7  ;;  %v6298_v33 = vsub.f32 1.0, %v6290_v10 }
0x1527   : > { %v6253_v56 = vmul.f32 %v10009_v16, %v6245_v26  ;;  %v6248_v63 = vadd.f32 0.2548296, %v6240_v6  ;;  %v6292_v60 = vmul.f32 %v8326_v25, %v6252_v4  ;;  %v6239_v15 = vmul.f32 %v10025_v58, %v6231_v19 }
0x1528   : > { %v6291_v23 = vmul.f32 %v8328_v40, %v6251_v57  ;;  %v6225_v14 = vmul.f32 %v10028_v38, %v6217_v21  ;;  %v6254_v39 = vmul.f32 %v10015_v42, %v6246_v52  ;;  %v6130_v34 = vmul.f32 0.5, %v9944_v12  ;;  %v8336_v57 = vpop.eup %8335 }
0x1529   : > { %v6293_v16 = vmul.f32 %v8330_v48, %v6253_v56  ;;  %v6256_v55 = vmul.f32 %v10019_v2, %v6248_v63  ;;  %v6247_v3 = vadd.f32 0.2548296, %v6239_v15  ;;  %v6300_v35 = vsub.f32 1.0, %v6292_v60  ;;  %v8338_v48 = vpop.eup %8337 }
0x152a   : > { %v6299_v44 = vsub.f32 1.0, %v6291_v23  ;;  %v6233_v30 = vadd.f32 -0.28449672, %v6225_v14  ;;  %v6294_v50 = vmul.f32 %v8332_v46, %v6254_v39  ;;  %v6314_v29 = vsub.f32 0.0, %v6298_v33 }
0x152b   : > { %v6301_v8 = vsub.f32 1.0, %v6293_v16  ;;  %v6296_v17 = vmul.f32 %v8334_v54, %v6256_v55  ;;  %v6255_v42 = vmul.f32 %v10025_v58, %v6247_v3  ;;  %v6316_v56 = vsub.f32 0.0, %v6300_v35 }
0x152c   : > { %v6241_v41 = vmul.f32 %v10028_v38, %v6233_v30  ;;  %v6315_v0 = vsub.f32 0.0, %v6299_v44  ;;  %v6302_v25 = vsub.f32 1.0, %v6294_v50  ;;  %v6322_v4 = vsel %vm6306_vm0, %v6314_v29, %v6298_v33  ;;  %v8345_v29 = vld [vmem:[%s8462_s27] sm:$0xff] }
0x152d   : > { %v6304_v26 = vsub.f32 1.0, %v6296_v17  ;;  %v6295_v20 = vmul.f32 %v8336_v57, %v6255_v42  ;;  %v6317_v40 = vsub.f32 0.0, %v6301_v8  ;;  %v6330_v46 = vadd.f32 1.0, %v6322_v4 }
0x152e   : > { %v6249_v2 = vadd.f32 0.2548296, %v6241_v41  ;;  %v6318_v12 = vsub.f32 0.0, %v6302_v25  ;;  %v6323_v58 = vsel %vm6307_vm1, %v6315_v0, %v6299_v44  ;;  %v6324_v10 = vsel %vm6308_vm4, %v6316_v56, %v6300_v35 }
0x152f   : > { %v6320_v59 = vsub.f32 0.0, %v6304_v26  ;;  %v6303_v21 = vsub.f32 1.0, %v6295_v20  ;;  %v6331_v7 = vadd.f32 1.0, %v6323_v58  ;;  %v6136_v54 = vmul.f32 0.5, %v9977_v37 }
0x1530   : > { %v6257_v9 = vmul.f32 %v10028_v38, %v6249_v2  ;;  %v6326_v61 = vsel %vm6310_vm3, %v6318_v12, %v6302_v25  ;;  %v6325_v38 = vsel %vm6309_vm6, %v6317_v40, %v6301_v8  ;;  %v6332_v16 = vadd.f32 1.0, %v6324_v10 }
0x1531   : > { %v6334_v28 = vadd.f32 1.0, %v6326_v61  ;;  %v6328_v53 = vsel %vm6312_vm5, %v6320_v59, %v6304_v26  ;;  %v6319_v23 = vsub.f32 0.0, %v6303_v21  ;;  %v6333_v14 = vadd.f32 1.0, %v6325_v38  ;;  %v10206_v61 = vld [vmem:[#allocation8_spill] sm:$0xff] }
0x1532   : > { %v6297_v51 = vmul.f32 %v8338_v48, %v6257_v9  ;;  %v6336_v52 = vadd.f32 1.0, %v6328_v53  ;;  %v6339_v63 = vmul.f32 %v6331_v7, %v6131_v47  ;;  %v6338_v44 = vmul.f32 %v6330_v46, %v6130_v34  ;;  %v10205_v9 = vld [vmem:[#allocation7_spill] sm:$0xff] }
0x1533   : > { %v6327_v6 = vsel %vm6311_vm7, %v6319_v23, %v6303_v21  ;;  %v6342_v31 = vmul.f32 %v6334_v28, %v6134_v18  ;;  %v6133_v39 = vmul.f32 0.5, %v9967_v27  ;;  %v6340_v37 = vmul.f32 %v6332_v16, %v6132_v22 }
0x1534   : > { %v6305_v1 = vsub.f32 1.0, %v6297_v51  ;;  %v6335_v5 = vadd.f32 1.0, %v6327_v6  ;;  %v6344_v33 = vmul.f32 %v6336_v52, %v6136_v54  ;;  %v6693_v26 = vrot.slane %v8345_v29, %v10204_v24 }
0x1535   : > { %v6341_v30 = vmul.f32 %v6333_v14, %v6133_v39  ;;  %v6346_v50 = vpack.c.bf16 %v6342_v31, %v6338_v44 }
0x1536   : > { %v6321_v19 = vsub.f32 0.0, %v6305_v1  ;;  %v6343_v62 = vmul.f32 %v6335_v5, %v6135_v45  ;;  %v6348_v8 = vpack.c.bf16 %v6344_v33, %v6340_v37  ;;  %v10207_v5 = vld [vmem:[#allocation3_spill] sm:$0xff] }
0x1537   : > { %v6732_v14 = vsub.s32 5, %v10207_v5 }
0x1538   : > { %v6329_v60 = vsel %vm6313_vm8, %v6321_v19, %v6305_v1  ;;  %v6347_v55 = vpack.c.bf16 %v6343_v62, %v6339_v63  ;;  %v6726_v19 = vsub.s32 4, %v10207_v5 }
0x1539   : > { %v6337_v15 = vadd.f32 1.0, %v6329_v60  ;;  %v6733_v16 = vrot.slane %v8345_v29, %v6732_v14 }
0x153a   : > { %6638 = vmatprep.mubr.bf16.mxu0 %v6347_v55  ;;  %v6727_v31 = vrot.slane %v8345_v29, %v6726_v19 }
0x153b   : > { %v6345_v3 = vmul.f32 %v6337_v15, %v6137_v32  ;;  %6639 = vmatmul.mubr.bf16.vlgmr.msra.gmra.mxu0 %v6346_v50 }
0x153d   : > { %v6349_v13 = vpack.c.bf16 %v6345_v3, %v6341_v30 }
0x153f   : > { %6679 = vmatprep.mubr.bf16.mxu1 %v6349_v13 }
0x1540   : > { %6680 = vmatmul.mubr.bf16.vlgmr.msra.gmra.mxu1 %v6348_v8 }
0x15fb   : > { %v7621_v34 = vpop.f32.mrf.mxu0 }
0x15fd   : > { %v7622_v27 = vpop.f32.mrf.mxu0 }
0x15fe   : > { %v7623_v49 = vadd.f32 %v7622_v27, %v7621_v34 }
0x15ff   : > { %v7624_v41 = vpop.f32.mrf.mxu0 }
0x1600   : > { %v7643_v17 = vpop.f32.mrf.mxu1 }
0x1601   : > { %v7625_v35 = vpop.f32.mrf.mxu0 }
0x1602   : > { %v7644_v57 = vpop.f32.mrf.mxu1  ;;  %v7626_v42 = vadd.f32 %v7625_v35, %v7624_v41 }
0x1603   : > { %v7645_v43 = vadd.f32 %v7644_v57, %v7643_v17 }
0x1604   : > { %v7646_v0 = vpop.f32.mrf.mxu1 }
0x1605   : > { %v6682_v25 = vadd.f32 %v7645_v43, %v7623_v49 }
0x1606   : > { %v7647_v2 = vpop.f32.mrf.mxu1 }
0x1607   : > { %v6688_v47 = vadd.f32 %v6682_v25, %v9947_v11  ;;  %v7648_v12 = vadd.f32 %v7647_v2, %v7646_v0 }
0x1609   : > { %v6685_v20 = vadd.f32 %v7648_v12, %v7626_v42  ;;  %v6694_v40 = vadd.f32 %v6693_v26, %v6688_v47 }
0x160b   : > { %v6689_v59 = vadd.f32 %v6685_v20, %v9962_v36  ;;  %v6696_v48 = vadd.f32 %v6694_v40, %v10205_v9 }
0x160d   : > { %v6698_v56 = vsel %vm499_vm2, %v6696_v48, 0.0  ;;  %v6695_v58 = vadd.f32 %v6693_v26, %v6689_v59 }
0x160e   : > { %6699 = vadd.xlane.f32.xlu0 %v6698_v56 }
0x160f   : > { %v6697_v21 = vadd.f32 %v6695_v58, %v10206_v61 }
0x1611   : > { %v6701_v4 = vsel %vm499_vm2, %v6697_v21, 0.0 }
0x1612   : > { %6702 = vadd.xlane.f32.xlu1 %v6701_v4 }
0x1697   : > { %v6700_v24 = vpop.xlane.xlu0 %6699 }
0x1698   : > { %v6704_v51 = vmul.f32 0.03125, %v6700_v24 }
0x169a   : > { %v6706_v28 = vsub.f32 %v6696_v48, %v6704_v51 }
0x169b   : > { %v6703_v11 = vpop.xlane.xlu1 %6702 }
0x169c   : > { %v6705_v53 = vmul.f32 0.03125, %v6703_v11  ;;  %v6708_v23 = vmul.f32 %v6706_v28, %v6706_v28 }
0x169e   : > { %v6707_v7 = vsub.f32 %v6697_v21, %v6705_v53  ;;  %v6710_v36 = vsel %vm499_vm2, %v6708_v23, 0.0 }
0x169f   : > { %6711 = vadd.xlane.f32.xlu0 %v6710_v36 }
0x16a0   : > { %v6709_v38 = vmul.f32 %v6707_v7, %v6707_v7 }
0x16a2   : > { %v6713_v1 = vsel %vm499_vm2, %v6709_v38, 0.0 }
0x16a3   : > { %6714 = vadd.xlane.f32.xlu1 %v6713_v1 }
0x1728   : > { %v6712_v46 = vpop.xlane.xlu0 %6711 }
0x1729   : > { %v6716_v10 = vmul.f32 0.03125, %v6712_v46 }
0x172b   : > { %v6718_v18 = vadd.f32 1e-12, %v6716_v10 }
0x172c   : > { %v6715_v6 = vpop.xlane.xlu1 %6714 }
0x172d   : > { %8339 = vrsqrt.f32 %v6718_v18  ;;  %v6717_v52 = vmul.f32 0.03125, %v6715_v6 }
0x172f   : > { %v6719_v45 = vadd.f32 1e-12, %v6717_v52 }
0x1731   : > { %8341 = vrsqrt.f32 %v6719_v45 }
0x173a   : > { %v8340_v54 = vpop.eup %8339 }
0x173b   : > { %v6722_v63 = vmul.f32 %v8340_v54, %v6706_v28 }
0x173d   : > { %v6728_v62 = vmul.f32 %v6727_v31, %v6722_v63 }
0x173e   : > { %v8342_v60 = vpop.eup %8341 }
0x173f   : > { %v6734_v44 = vadd.f32 %v6733_v16, %v6728_v62  ;;  %v6723_v39 = vmul.f32 %v8342_v60, %v6707_v7 }
0x1741   : > { %6736 = vst.msk [vmem:[#allocation2] sm:$0xff] %vm499_vm2, %v6734_v44  ;;  %v6729_v32 = vmul.f32 %v6727_v31, %v6723_v39  ;;  %6741 = sbr.rel (%p7301_p5) target bundleno = 6167 (0x1817), region = 68 }
0x1743   : > { %v6735_v15 = vadd.f32 %v6733_v16, %v6729_v32 }
0x1745   : > { %6737 = vst.msk [vmem:[#allocation2 + $0x8] sm:$0xff] %vm499_vm2, %v6735_v15 }
0x1746   : > { %v8346_v22 = vld [vmem:[%s10108_s1 + $0x8] sm:$0xff]   ;;  %v8360_v33 = vmov 0.0   ;;  %v8347_v55 = vld [vmem:[%s10108_s1] sm:$0xff]   ;;  %vm8361_vm9 = vmmov 0   ;;  %v6742_v30 = vpack.c.bf16 %v6735_v15, %v6734_v44 }
0x1747   : > { %7868 = vmatprep.subr.bf16.mxu0 %v8360_v33  ;;  %7872 = vmatprep.mubr.msk.bf16.mxu0 %vm8361_vm9, %v8360_v33  ;;  %v7302_v50 = vld [vmem:[%s10109_s2] ss:$0 sm:$0xff] }
0x1748   : > { %7869 = vmatpush3.bf16.msra.mxu0 %v8346_v22 }
0x1749   : > { %7870 = vmatprep.subr.bf16.mxu0 %v8360_v33 }
0x174c   : > { %7871 = vmatpush3.bf16.msra.mxu0 %v8347_v55 }
0x174f   : > { %7873 = vmatmul.mubr.msk.bf16.vlgmr.msra.gmra.mxu0 %vm499_vm2, %v6742_v30 }
0x180f   : > { %v6803_v3 = vpop.f32.mrf.mxu0 }
0x1810   : > { %v6804_v37 = vadd.f32 %v7302_v50, %v6803_v3 }
0x1811   : > { %v7874_v13 = vpop.f32.mrf.mxu0 }
0x1812   : > { %6810 = vst [vmem:[%s10117_s10] sm:$0xff] %v6804_v37 }
0x1813   : > { %v6806_v8 = vpop.f32.mrf.mxu0 }
0x1814   : > { %v6807_v34 = vadd.f32 %v7302_v50, %v6806_v8 }
0x1815   : > { %v7875_v27 = vpop.f32.mrf.mxu0 }
0x1816   : > { %6811 = vst [vmem:[%s10117_s10 + $0x8] sm:$0xff] %v6807_v34 }
0x1817 PF: > { %s20_s13 = sadd.s32 1, %s8354_s13  }
0x1818   : > { %p17_p6 = scmp.ge.s32.totalorder %s20_s13, 6  }
0x181a   :  { %19 = sbr.rel (!%p17_p6) target bundleno = 3 (0x3), region = 137 }

</bundles_post_ra>
